<compile_context>
chip_gen: v7x
topology: tpu7x:2x2x1
jax: 0.10.0
libtpu: 0.0.40
codegen_flags: <defaults>
</compile_context>

<pallas_src>
import functools

import jax
import jax.numpy as jnp
import numpy as np
from jax.experimental import pallas as pl
from jax.experimental.pallas import tpu as pltpu


_NEG_LARGE = -1e30  # finite "-inf": keeps masked-row math NaN-free


# ----------------------------- Pallas kernel -------------------------------


def clam_mb_tile_kernel(
    h_ref, w1_ref, b1_ref, wab_ref, bab_ref, wc_ref, bc_ref,
    at_ref, stats_ref, tacc_ref,
    *, n_valid, d2, compute_dtype,
):
    i = pl.program_id(0)
    tn = h_ref.shape[0]

    h_tile = h_ref[...]                                          # (tn, L), compute_dtype

    # first FC + ReLU (f32 accumulation, f32 activations; no HBM writeback of h1)
    h1 = jnp.dot(h_tile, w1_ref[...], preferred_element_type=jnp.float32)
    h1 = jnp.maximum(h1 + b1_ref[...], 0.0)                      # (tn, D1) f32
    h1_c = h1.astype(compute_dtype)

    # fused gated attention: one (D1, 2*D2) matmul, then split for tanh / sigmoid
    ab = jnp.dot(h1_c, wab_ref[...],
                 preferred_element_type=jnp.float32) + bab_ref[...]   # (tn, 2*D2) f32
    a = jnp.tanh(ab[:, :d2])
    b = jax.nn.sigmoid(ab[:, d2:])

    s = jnp.dot((a * b).astype(compute_dtype), wc_ref[...],
                preferred_element_type=jnp.float32) + bc_ref[...]     # (tn, C) f32

    # mask padded rows (bag size N need not be a multiple of tn)
    row = jax.lax.broadcasted_iota(jnp.int32, (tn, 1), 0)
    valid = (i * tn + row) < n_valid                             # (tn, 1)
    s = jnp.where(valid, s, _NEG_LARGE)

    # lane-dense raw scores: store A transposed, (C, tn) (XLU transpose is free-ish)
    at_ref[...] = s.T

    # per-tile softmax partials over the instance axis (combined outside)
    m_t = jnp.max(s, axis=0, keepdims=True)                      # (1, C)
    p = jnp.exp(s - m_t)                                         # (tn, C), <= 1
    p = jnp.where(valid, p, 0.0)
    l_t = jnp.sum(p, axis=0, keepdims=True)                      # (1, C)
    stats_ref[...] = jnp.concatenate([m_t, l_t], axis=0)[None]   # (1, 2, C)

    # lane-dense partial bag feature:  acc[c, d] = sum_n p[n, c] * h1[n, d]
    acc = jax.lax.dot_general(
        p.astype(compute_dtype), h1_c, (((0,), (0,)), ((), ())),
        preferred_element_type=jnp.float32)                      # (C, D1)
    tacc_ref[...] = acc[None]                                    # (1, C, D1)


def clam_mb_pallas(params, h2d, *, tn=512, compute_dtype=jnp.bfloat16,
                   vmem_limit_bytes=48 * 1024 * 1024):
    """Attention / bag-feature hot path. Returns (A_raw^T (C,N), M, logits, Y_prob)."""
    N, L = h2d.shape
    D1 = params["w1"].shape[1]
    D2 = params["wa"].shape[1]
    C = params["wc"].shape[1]
    # bf16 packs 16 rows per vreg sublane group -> require tn % 16 == 0.
    assert tn % 16 == 0, "tn must be a multiple of 16"

    num_tiles = (N + tn - 1) // tn
    n_pad = num_tiles * tn
    h2d_p = jnp.pad(h2d, ((0, n_pad - N), (0, 0))) if n_pad != N else h2d

    # bf16 (by default) for everything the MXU consumes; biases stay f32.
    h_in = h2d_p.astype(compute_dtype)
    w1 = params["w1"].astype(compute_dtype)
    wab = jnp.concatenate([params["wa"], params["wb"]], axis=1).astype(compute_dtype)
    bab = jnp.concatenate([params["ba"], params["bb"]], axis=1)      # (1, 2*D2) f32
    wc = params["wc"].astype(compute_dtype)

    kernel = functools.partial(
        clam_mb_tile_kernel, n_valid=N, d2=D2, compute_dtype=compute_dtype)

    itemsize = jnp.dtype(compute_dtype).itemsize
    cost = pl.CostEstimate(
        flops=2 * n_pad * (L * D1 + 2 * D1 * D2 + D2 * C + C * D1),
        transcendentals=n_pad * (2 * D2 + C),
        bytes_accessed=(n_pad * L * itemsize
                        + (L * D1 + 2 * D1 * D2 + D2 * C) * itemsize
                        + n_pad * C * 4
                        + num_tiles * (2 * C + C * D1) * 4),
    )

    out_shapes = (
        jax.ShapeDtypeStruct((C, n_pad), jnp.float32),        # raw scores, transposed
        jax.ShapeDtypeStruct((num_tiles, 2, C), jnp.float32),  # [m_t; l_t] per tile
        jax.ShapeDtypeStruct((num_tiles, C, D1), jnp.float32),  # per-tile acc (C, D1)
    )

    def call(single_buffer_weights):
        def const_spec(shape):
            # Weights/biases are grid-invariant; request a single VMEM buffer to
            # reclaim VMEM (biggest lever on v7x's 64 MiB), fall back if unsupported.
            if single_buffer_weights:
                return pl.BlockSpec(shape, lambda i: (0,) * len(shape),
                                    pipeline_mode=pl.Buffered(1))
            return pl.BlockSpec(shape, lambda i: (0,) * len(shape))

        grid_spec = pltpu.PrefetchScalarGridSpec(
            num_scalar_prefetch=0,
            grid=(num_tiles,),
            in_specs=[
                pl.BlockSpec((tn, L), lambda i: (i, 0)),  # h tile (only O(N) input)
                const_spec((L, D1)),                      # w1
                const_spec((1, D1)),                      # b1
                const_spec((D1, 2 * D2)),                 # [wa | wb] fused
                const_spec((1, 2 * D2)),                  # [ba | bb] fused
                const_spec((D2, C)),                      # wc
                const_spec((1, C)),                       # bc
            ],
            out_specs=[
                pl.BlockSpec((C, tn), lambda i: (0, i)),       # A^T, lane-dense
                pl.BlockSpec((1, 2, C), lambda i: (i, 0, 0)),  # per-tile [max; sumexp]
                pl.BlockSpec((1, C, D1), lambda i: (i, 0, 0)),  # per-tile acc
            ],
        )
        return pl.pallas_call(
            kernel,
            out_shape=out_shapes,
            grid_spec=grid_spec,
            compiler_params=pltpu.CompilerParams(
                # fully independent tiles -> megacore / 2-TC splittable on v7x
                dimension_semantics=("parallel",),
                vmem_limit_bytes=vmem_limit_bytes),
            cost_estimate=cost,
        )(h_in, w1, params["b1"], wab, bab, wc, params["bc"])

    try:
        a_t, stats, tacc = call(True)
    except Exception:
        # pipeline_mode=pl.Buffered(1) not supported on this JAX version.
        a_t, stats, tacc = call(False)

    # ---- tiny log-sum-exp combine over tiles (plain JAX, O(T * C * D1)) ----
    tm = stats[:, 0:1, :]                                    # (T, 1, C) per-tile max
    tl = stats[:, 1:2, :]                                    # (T, 1, C) per-tile sumexp
    m = jnp.max(tm, axis=0)                                  # (1, C) global max
    scale = jnp.exp(tm - m)                                  # (T, 1, C)
    l = jnp.sum(tl * scale, axis=0)                          # (1, C)
    acc = jnp.sum(tacc * jnp.transpose(scale, (0, 2, 1)), axis=0)   # (C, D1)
    M = acc / jnp.transpose(l)                               # (C, D1) = softmax(A.T) @ h1

    # per-class bag heads: logits[c] = <M[c], wcls[c]> + bcls[c]
    logits = jnp.sum(M * params["wcls"], axis=1)[None, :] + params["bcls"]   # (1, C)
    y_prob = jax.nn.softmax(logits, axis=1)

    return a_t[:, :N], M, logits, y_prob


# ------------------------------ full forward -------------------------------


def clam_mb_forward(params, h, label, *, k_sample=8, n_classes=2,
                    subtyping=False, instance_eval=True, tn=512,
                    compute_dtype=jnp.bfloat16):
    """Mirrors CLAM_MB.forward: returns (logits, Y_prob, Y_hat, results_dict)."""
    h2d = h.reshape(-1, h.shape[-1])                         # torch h.squeeze(): (N, L)
    a_t, _m, logits, y_prob = clam_mb_pallas(
        params, h2d, tn=tn, compute_dtype=compute_dtype)     # a_t: (C, N) raw scores
    y_hat = jnp.argmax(logits, axis=1, keepdims=True)        # torch.topk(logits, 1)[1]

    results_dict = {}
    if instance_eval:
        N = h2d.shape[0]
        k = k_sample if N >= 2 * k_sample else (N - 1) // 2
        all_preds, all_targets = [], []
        total_inst_loss = 0.0
        if k > 0:   # guard degenerate bags (N < 3)
            # softmax over instances is monotonic per class -> top-k ids on raw scores
            # are identical to top-k on F.softmax(A.T); skip the extra softmax pass.
            inst_labels = np.asarray(
                jax.nn.one_hot(jnp.asarray(label), n_classes)).reshape(-1)
            for i in range(n_classes):
                w_i = params["winst"][i]                     # (D1, 2)
                b_i = params["binst"][i]                     # (2,)
                if int(inst_labels[i]) == 1:
                    top_p_ids = jax.lax.top_k(a_t[i], k)[1]
                    top_n_ids = jax.lax.top_k(-a_t[i], k)[1]
                    ids = jnp.concatenate([top_p_ids, top_n_ids], axis=0)
                    targets = jnp.concatenate(
                        [jnp.ones((k,), jnp.int32), jnp.zeros((k,), jnp.int32)])
                elif subtyping:
                    ids = jax.lax.top_k(a_t[i], k)[1]
                    targets = jnp.zeros((k,), jnp.int32)
                else:
                    continue
                # h1 is NOT streamed back to HBM by the kernel; recompute only the
                # ~2*k gathered rows here (tiny compared to the saved N*D1*4 bytes).
                h1_rows = jnp.maximum(h2d[ids] @ params["w1"] + params["b1"], 0.0)
                inst_logits = h1_rows @ w_i + b_i
                preds = jnp.argmax(inst_logits, axis=1)
                all_preds.append(np.asarray(preds))
                all_targets.append(np.asarray(targets))
                # TODO(synk): SmoothTop1SVM instance loss (external dep) not implemented.
                total_inst_loss += 0.0
            if subtyping:
                total_inst_loss /= n_classes
        results_dict = {
            "instance_loss": total_inst_loss,
            "inst_labels": np.concatenate(all_targets) if all_targets else np.array([]),
            "inst_preds": np.concatenate(all_preds) if all_preds else np.array([]),
        }
    return logits, y_prob, y_hat, results_dict


# ------------------------------ param init ---------------------------------


def init_params(key, L, D1, D2, C):
    """Xavier-normal weights, zero biases (mirrors the torch __init__)."""
    ks = list(jax.random.split(key, 4 + 2 * C))

    def xavier(k, fan_in, fan_out, shape=None):
        std = (2.0 / (fan_in + fan_out)) ** 0.5
        return std * jax.random.normal(
            k, shape if shape is not None else (fan_in, fan_out), dtype=jnp.float32)

    wcls = jnp.stack([xavier(ks[4 + c], D1, 1, (D1,)) for c in range(C)])          # (C, D1)
    winst = jnp.stack([xavier(ks[4 + C + c], D1, 2, (D1, 2)) for c in range(C)])   # (C, D1, 2)
    return dict(
        w1=xavier(ks[0], L, D1),   b1=jnp.zeros((1, D1), jnp.float32),
        wa=xavier(ks[1], D1, D2),  ba=jnp.zeros((1, D2), jnp.float32),
        wb=xavier(ks[2], D1, D2),  bb=jnp.zeros((1, D2), jnp.float32),
        wc=xavier(ks[3], D2, C),   bc=jnp.zeros((1, C), jnp.float32),
        wcls=wcls,                 bcls=jnp.zeros((1, C), jnp.float32),
        winst=winst,               binst=jnp.zeros((C, 2), jnp.float32),
    )


# ------------------------------ reference ----------------------------------


def ref_forward(params, h2d):
    h1 = jnp.maximum(h2d @ params["w1"] + params["b1"], 0.0)
    a = jnp.tanh(h1 @ params["wa"] + params["ba"])
    b = jax.nn.sigmoid(h1 @ params["wb"] + params["bb"])
    A = (a * b) @ params["wc"] + params["bc"]                        # (N, C)
    A_soft = jax.nn.softmax(A.T, axis=1)                             # (C, N)
    M = A_soft @ h1                                                  # (C, D1)
    logits = jnp.sum(M * params["wcls"], axis=1)[None, :] + params["bcls"]
    y_prob = jax.nn.softmax(logits, axis=1)
    return logits, y_prob, A, h1


# --------------------------------- main -------------------------------------


if __name__ == "__main__":
    # small shapes consistent with the module: bag of N instances, feat_dim=L,
    # hidden_feat=D1, attention dim D2, n_classes=C.  N deliberately NOT a
    # multiple of tn to exercise the padding/masking path.  D2 kept a multiple
    # of 128 so the fused-gating column slice stays lane-aligned.
    N, L, D1, D2, C = 300, 128, 64, 128, 2
    key = jax.random.PRNGKey(0)
    kp, kh = jax.random.split(key)
    params = init_params(kp, L, D1, D2, C)

    h = jax.random.normal(kh, (1, N, L), dtype=jnp.float32)          # torch passes (1, N, feat)
    label = 1

    # f32 compute path (tight check vs pure-JAX reference)
    logits, y_prob, y_hat, results = clam_mb_forward(
        params, h, label, k_sample=8, n_classes=C, subtyping=False,
        instance_eval=True, tn=128, compute_dtype=jnp.float32)
    jax.block_until_ready((logits, y_prob, y_hat))

    ref_logits, ref_prob, ref_A, ref_h1 = ref_forward(params, h.reshape(N, L))
    assert np.allclose(np.asarray(logits), np.asarray(ref_logits), atol=1e-3, rtol=1e-3)
    assert np.allclose(np.asarray(y_prob), np.asarray(ref_prob), atol=1e-4, rtol=1e-4)
    assert logits.shape == (1, C) and y_hat.shape == (1, 1) and y_prob.shape == (1, C)
    assert results["inst_preds"].shape == (16,) and results["inst_labels"].shape == (16,)

    # bf16 streamed-h path (recommended default): f32 accumulation, looser tolerance.
    logits_bf, y_prob_bf, _, _ = clam_mb_forward(
        params, h, label, k_sample=8, n_classes=C, subtyping=False,
        instance_eval=False, tn=128, compute_dtype=jnp.bfloat16)
    jax.block_until_ready((logits_bf, y_prob_bf))
    assert np.allclose(np.asarray(y_prob_bf), np.asarray(ref_prob), atol=5e-2, rtol=5e-2)

    # padding edge case: N < tn (single, mostly-padded tile) + instance_eval.
    N2 = 50
    h_small = jax.random.normal(jax.random.PRNGKey(1), (1, N2, L), dtype=jnp.float32)
    lg2, pr2, _, res2 = clam_mb_forward(
        params, h_small, 0, k_sample=8, n_classes=C, subtyping=False,
        instance_eval=True, tn=128, compute_dtype=jnp.float32)
    jax.block_until_ready((lg2, pr2))
    rlg2, rpr2, _, _ = ref_forward(params, h_small.reshape(N2, L))
    assert np.allclose(np.asarray(lg2), np.asarray(rlg2), atol=1e-3, rtol=1e-3)
    assert np.allclose(np.asarray(pr2), np.asarray(rpr2), atol=1e-4, rtol=1e-4)

    print("KERNEL_OK")
</pallas_src>

<mosaic_0001>
module attributes {stable_mosaic.version = 11 : i64} {
  func.func @clam_mb_tile_kernel(%arg0: i32, %arg1: memref<128x128xf32, #tpu.memory_space<vmem>>, %arg2: memref<128x64xf32, #tpu.memory_space<vmem>>, %arg3: memref<1x64xf32, #tpu.memory_space<vmem>>, %arg4: memref<64x256xf32, #tpu.memory_space<vmem>>, %arg5: memref<1x256xf32, #tpu.memory_space<vmem>>, %arg6: memref<128x2xf32, #tpu.memory_space<vmem>>, %arg7: memref<1x2xf32, #tpu.memory_space<vmem>>, %arg8: memref<2x128xf32, #tpu.memory_space<vmem>>, %arg9: memref<1x2x2xf32, #tpu.memory_space<vmem>>, %arg10: memref<1x2x64xf32, #tpu.memory_space<vmem>>) attributes {dimension_semantics = [#tpu.dimension_semantics<parallel>], iteration_bounds = array<i64: 3>, scalar_prefetch = 0 : i64, scratch_operands = 0 : i64, tpu.core_type = #tpu.core_type<tc>, window_params = [{transform_indices = @transform_0, window_bounds = array<i64: 128, 128>}, {pipeline_mode = #tpu.pipeline_mode<synchronous>, transform_indices = @transform_1, window_bounds = array<i64: 128, 64>}, {pipeline_mode = #tpu.pipeline_mode<synchronous>, transform_indices = @transform_2, window_bounds = array<i64: 1, 64>}, {pipeline_mode = #tpu.pipeline_mode<synchronous>, transform_indices = @transform_3, window_bounds = array<i64: 64, 256>}, {pipeline_mode = #tpu.pipeline_mode<synchronous>, transform_indices = @transform_4, window_bounds = array<i64: 1, 256>}, {pipeline_mode = #tpu.pipeline_mode<synchronous>, transform_indices = @transform_5, window_bounds = array<i64: 128, 2>}, {pipeline_mode = #tpu.pipeline_mode<synchronous>, transform_indices = @transform_6, window_bounds = array<i64: 1, 2>}, {transform_indices = @transform_7, window_bounds = array<i64: 2, 128>}, {transform_indices = @transform_8, window_bounds = array<i64: 1, 2, 2>}, {transform_indices = @transform_9, window_bounds = array<i64: 1, 2, 64>}]} {
    %c0 = arith.constant 0 : index
    %c0_0 = arith.constant 0 : index
    %0 = vector.load %arg1[%c0, %c0_0] : memref<128x128xf32, #tpu.memory_space<vmem>>, vector<128x128xf32>
    %c0_1 = arith.constant 0 : index
    %c0_2 = arith.constant 0 : index
    %1 = vector.load %arg2[%c0_1, %c0_2] : memref<128x64xf32, #tpu.memory_space<vmem>>, vector<128x64xf32>
    %cst = arith.constant dense<0.000000e+00> : vector<128x64xf32>
    %2 = tpu.matmul %0, %1, %cst {dimension_numbers = #tpu.dot_dimension_numbers<[1], [0], [0], [1], [0, 0, 1, 1], [], []>} : vector<128x128xf32>, vector<128x64xf32>, vector<128x64xf32> -> vector<128x64xf32>
    %c0_3 = arith.constant 0 : index
    %c0_4 = arith.constant 0 : index
    %3 = vector.load %arg3[%c0_3, %c0_4] : memref<1x64xf32, #tpu.memory_space<vmem>>, vector<1x64xf32>
    %4 = vector.broadcast %3 : vector<1x64xf32> to vector<128x64xf32>
    %5 = arith.addf %2, %4 : vector<128x64xf32>
    %cst_5 = arith.constant 0.000000e+00 : f32
    %6 = vector.broadcast %cst_5 : f32 to vector<128x64xf32>
    %7 = arith.maximumf %5, %6 : vector<128x64xf32>
    %c0_6 = arith.constant 0 : index
    %c0_7 = arith.constant 0 : index
    %8 = vector.load %arg4[%c0_6, %c0_7] : memref<64x256xf32, #tpu.memory_space<vmem>>, vector<64x256xf32>
    %cst_8 = arith.constant dense<0.000000e+00> : vector<128x256xf32>
    %9 = tpu.matmul %7, %8, %cst_8 {dimension_numbers = #tpu.dot_dimension_numbers<[1], [0], [0], [1], [0, 0, 1, 1], [], []>} : vector<128x64xf32>, vector<64x256xf32>, vector<128x256xf32> -> vector<128x256xf32>
    %c0_9 = arith.constant 0 : index
    %c0_10 = arith.constant 0 : index
    %10 = vector.load %arg5[%c0_9, %c0_10] : memref<1x256xf32, #tpu.memory_space<vmem>>, vector<1x256xf32>
    %11 = vector.broadcast %10 : vector<1x256xf32> to vector<128x256xf32>
    %12 = arith.addf %9, %11 : vector<128x256xf32>
    %13 = vector.extract_strided_slice %12 {offsets = [0, 0], sizes = [128, 128], strides = [1, 1]} : vector<128x256xf32> to vector<128x128xf32>
    %14 = math.tanh %13 : vector<128x128xf32>
    %15 = vector.extract_strided_slice %12 {offsets = [0, 128], sizes = [128, 128], strides = [1, 1]} : vector<128x256xf32> to vector<128x128xf32>
    %16 = arith.negf %15 : vector<128x128xf32>
    %17 = math.exp %16 : vector<128x128xf32>
    %cst_11 = arith.constant 1.000000e+00 : f32
    %18 = vector.broadcast %cst_11 : f32 to vector<128x128xf32>
    %19 = arith.addf %18, %17 : vector<128x128xf32>
    %20 = arith.divf %18, %19 : vector<128x128xf32>
    %21 = arith.mulf %14, %20 : vector<128x128xf32>
    %c0_12 = arith.constant 0 : index
    %c0_13 = arith.constant 0 : index
    %22 = vector.load %arg6[%c0_12, %c0_13] : memref<128x2xf32, #tpu.memory_space<vmem>>, vector<128x2xf32>
    %cst_14 = arith.constant dense<0.000000e+00> : vector<128x2xf32>
    %23 = tpu.matmul %21, %22, %cst_14 {dimension_numbers = #tpu.dot_dimension_numbers<[1], [0], [0], [1], [0, 0, 1, 1], [], []>} : vector<128x128xf32>, vector<128x2xf32>, vector<128x2xf32> -> vector<128x2xf32>
    %c0_15 = arith.constant 0 : index
    %c0_16 = arith.constant 0 : index
    %24 = vector.load %arg7[%c0_15, %c0_16] : memref<1x2xf32, #tpu.memory_space<vmem>>, vector<1x2xf32>
    %25 = vector.broadcast %24 : vector<1x2xf32> to vector<128x2xf32>
    %26 = arith.addf %23, %25 : vector<128x2xf32>
    %27 = tpu.iota {dimensions = array<i32: 0>} : vector<128x1xi32>
    %c128_i32 = arith.constant 128 : i32
    %28 = arith.muli %arg0, %c128_i32 : i32
    %29 = vector.broadcast %28 : i32 to vector<128x1xi32>
    %30 = arith.addi %29, %27 : vector<128x1xi32>
    %c300_i32 = arith.constant 300 : i32
    %31 = vector.broadcast %c300_i32 : i32 to vector<128x1xi32>
    %32 = arith.cmpi slt, %30, %31 : vector<128x1xi32>
    %cst_17 = arith.constant -1.000000e+30 : f32
    %33 = vector.shape_cast %32 : vector<128x1xi1> to vector<128x1xi1>
    %34 = vector.broadcast %33 : vector<128x1xi1> to vector<128x2xi1>
    %35 = vector.broadcast %cst_17 : f32 to vector<128x2xf32>
    %36 = arith.select %34, %26, %35 : vector<128x2xi1>, vector<128x2xf32>
    %37 = tpu.transpose %36, [1, 0] : vector<128x2xf32> -> vector<2x128xf32>
    %c0_18 = arith.constant 0 : index
    %c0_19 = arith.constant 0 : index
    %38 = vector.load %arg8[%c0_18, %c0_19] : memref<2x128xf32, #tpu.memory_space<vmem>>, vector<2x128xf32>
    tpu.vector_store %arg8[%c0_18, %c0_19], %37 {strides = array<i32>} : memref<2x128xf32, #tpu.memory_space<vmem>>, vector<2x128xf32>,
    %cst_20 = arith.constant dense<0xFF800000> : vector<2xf32>
    %39 = vector.multi_reduction <maximumf>, %36, %cst_20 [0] : vector<128x2xf32> to vector<2xf32>
    %40 = vector.shape_cast %39 : vector<2xf32> to vector<1x2xf32>
    %41 = vector.broadcast %40 : vector<1x2xf32> to vector<128x2xf32>
    %42 = arith.subf %36, %41 : vector<128x2xf32>
    %43 = math.exp %42 : vector<128x2xf32>
    %cst_21 = arith.constant 0.000000e+00 : f32
    %44 = vector.shape_cast %32 : vector<128x1xi1> to vector<128x1xi1>
    %45 = vector.broadcast %44 : vector<128x1xi1> to vector<128x2xi1>
    %46 = vector.broadcast %cst_21 : f32 to vector<128x2xf32>
    %47 = arith.select %45, %43, %46 : vector<128x2xi1>, vector<128x2xf32>
    %cst_22 = arith.constant dense<0.000000e+00> : vector<2xf32>
    %48 = vector.multi_reduction <add>, %47, %cst_22 [0] : vector<128x2xf32> to vector<2xf32>
    %49 = vector.shape_cast %48 : vector<2xf32> to vector<1x2xf32>
    %50 = tpu.concatenate %40, %49 in 0 : vector<1x2xf32>, vector<1x2xf32> -> vector<2x2xf32>
    %51 = vector.shape_cast %50 : vector<2x2xf32> to vector<1x2x2xf32>
    %c0_23 = arith.constant 0 : index
    %c0_24 = arith.constant 0 : index
    %c0_25 = arith.constant 0 : index
    %52 = vector.load %arg9[%c0_23, %c0_24, %c0_25] : memref<1x2x2xf32, #tpu.memory_space<vmem>>, vector<1x2x2xf32>
    tpu.vector_store %arg9[%c0_23, %c0_24, %c0_25], %51 {strides = array<i32>} : memref<1x2x2xf32, #tpu.memory_space<vmem>>, vector<1x2x2xf32>,
    %cst_26 = arith.constant dense<0.000000e+00> : vector<2x64xf32>
    %53 = tpu.matmul %47, %7, %cst_26 {dimension_numbers = #tpu.dot_dimension_numbers<[0], [0], [1], [1], [0, 1, 1, 1], [], []>} : vector<128x2xf32>, vector<128x64xf32>, vector<2x64xf32> -> vector<2x64xf32>
    %54 = vector.shape_cast %53 : vector<2x64xf32> to vector<1x2x64xf32>
    %c0_27 = arith.constant 0 : index
    %c0_28 = arith.constant 0 : index
    %c0_29 = arith.constant 0 : index
    %55 = vector.load %arg10[%c0_27, %c0_28, %c0_29] : memref<1x2x64xf32, #tpu.memory_space<vmem>>, vector<1x2x64xf32>
    tpu.vector_store %arg10[%c0_27, %c0_28, %c0_29], %54 {strides = array<i32>} : memref<1x2x64xf32, #tpu.memory_space<vmem>>, vector<1x2x64xf32>,
    return
  }
  func.func @transform_0(%arg0: i32) -> (i32, i32) {
    %c0_i32 = arith.constant 0 : i32
    %c0_i32_0 = arith.constant 0 : i32
    return %arg0, %c0_i32 : i32, i32
  }
  func.func @transform_1(%arg0: i32) -> (i32, i32) {
    %c0_i32 = arith.constant 0 : i32
    %c0_i32_0 = arith.constant 0 : i32
    %c0_i32_1 = arith.constant 0 : i32
    return %c0_i32, %c0_i32_0 : i32, i32
  }
  func.func @transform_2(%arg0: i32) -> (i32, i32) {
    %c0_i32 = arith.constant 0 : i32
    %c0_i32_0 = arith.constant 0 : i32
    %c0_i32_1 = arith.constant 0 : i32
    return %c0_i32, %c0_i32_0 : i32, i32
  }
  func.func @transform_3(%arg0: i32) -> (i32, i32) {
    %c0_i32 = arith.constant 0 : i32
    %c0_i32_0 = arith.constant 0 : i32
    %c0_i32_1 = arith.constant 0 : i32
    return %c0_i32, %c0_i32_0 : i32, i32
  }
  func.func @transform_4(%arg0: i32) -> (i32, i32) {
    %c0_i32 = arith.constant 0 : i32
    %c0_i32_0 = arith.constant 0 : i32
    %c0_i32_1 = arith.constant 0 : i32
    return %c0_i32, %c0_i32_0 : i32, i32
  }
  func.func @transform_5(%arg0: i32) -> (i32, i32) {
    %c0_i32 = arith.constant 0 : i32
    %c0_i32_0 = arith.constant 0 : i32
    %c0_i32_1 = arith.constant 0 : i32
    return %c0_i32, %c0_i32_0 : i32, i32
  }
  func.func @transform_6(%arg0: i32) -> (i32, i32) {
    %c0_i32 = arith.constant 0 : i32
    %c0_i32_0 = arith.constant 0 : i32
    %c0_i32_1 = arith.constant 0 : i32
    return %c0_i32, %c0_i32_0 : i32, i32
  }
  func.func @transform_7(%arg0: i32) -> (i32, i32) {
    %c0_i32 = arith.constant 0 : i32
    %c0_i32_0 = arith.constant 0 : i32
    return %c0_i32, %arg0 : i32, i32
  }
  func.func @transform_8(%arg0: i32) -> (i32, i32, i32) {
    %c0_i32 = arith.constant 0 : i32
    %c0_i32_0 = arith.constant 0 : i32
    %c0_i32_1 = arith.constant 0 : i32
    return %arg0, %c0_i32, %c0_i32_0 : i32, i32, i32
  }
  func.func @transform_9(%arg0: i32) -> (i32, i32, i32) {
    %c0_i32 = arith.constant 0 : i32
    %c0_i32_0 = arith.constant 0 : i32
    %c0_i32_1 = arith.constant 0 : i32
    return %arg0, %c0_i32, %c0_i32_0 : i32, i32, i32
  }
}

module attributes {stable_mosaic.version = 11 : i64} {
  func.func @clam_mb_tile_kernel(%arg0: i32, %arg1: memref<128x128xf32, #tpu.memory_space<vmem>>, %arg2: memref<128x64xf32, #tpu.memory_space<vmem>>, %arg3: memref<1x64xf32, #tpu.memory_space<vmem>>, %arg4: memref<64x256xf32, #tpu.memory_space<vmem>>, %arg5: memref<1x256xf32, #tpu.memory_space<vmem>>, %arg6: memref<128x2xf32, #tpu.memory_space<vmem>>, %arg7: memref<1x2xf32, #tpu.memory_space<vmem>>, %arg8: memref<2x128xf32, #tpu.memory_space<vmem>>, %arg9: memref<1x2x2xf32, #tpu.memory_space<vmem>>, %arg10: memref<1x2x64xf32, #tpu.memory_space<vmem>>) attributes {dimension_semantics = [#tpu.dimension_semantics<parallel>], iteration_bounds = array<i64: 3>, scalar_prefetch = 0 : i64, scratch_operands = 0 : i64, tpu.core_type = #tpu.core_type<tc>, window_params = [{transform_indices = @transform_0, window_bounds = array<i64: 128, 128>}, {pipeline_mode = #tpu.pipeline_mode<synchronous>, transform_indices = @transform_1, window_bounds = array<i64: 128, 64>}, {pipeline_mode = #tpu.pipeline_mode<synchronous>, transform_indices = @transform_2, window_bounds = array<i64: 1, 64>}, {pipeline_mode = #tpu.pipeline_mode<synchronous>, transform_indices = @transform_3, window_bounds = array<i64: 64, 256>}, {pipeline_mode = #tpu.pipeline_mode<synchronous>, transform_indices = @transform_4, window_bounds = array<i64: 1, 256>}, {pipeline_mode = #tpu.pipeline_mode<synchronous>, transform_indices = @transform_5, window_bounds = array<i64: 128, 2>}, {pipeline_mode = #tpu.pipeline_mode<synchronous>, transform_indices = @transform_6, window_bounds = array<i64: 1, 2>}, {transform_indices = @transform_7, window_bounds = array<i64: 2, 128>}, {transform_indices = @transform_8, window_bounds = array<i64: 1, 2, 2>}, {transform_indices = @transform_9, window_bounds = array<i64: 1, 2, 64>}]} {
    %c0 = arith.constant 0 : index
    %c0_0 = arith.constant 0 : index
    %0 = vector.load %arg1[%c0, %c0_0] : memref<128x128xf32, #tpu.memory_space<vmem>>, vector<128x128xf32>
    %c0_1 = arith.constant 0 : index
    %c0_2 = arith.constant 0 : index
    %1 = vector.load %arg2[%c0_1, %c0_2] : memref<128x64xf32, #tpu.memory_space<vmem>>, vector<128x64xf32>
    %cst = arith.constant dense<0.000000e+00> : vector<128x64xf32>
    %2 = tpu.matmul %0, %1, %cst {dimension_numbers = #tpu.dot_dimension_numbers<[1], [0], [0], [1], [0, 0, 1, 1], [], []>} : vector<128x128xf32>, vector<128x64xf32>, vector<128x64xf32> -> vector<128x64xf32>
    %c0_3 = arith.constant 0 : index
    %c0_4 = arith.constant 0 : index
    %3 = vector.load %arg3[%c0_3, %c0_4] : memref<1x64xf32, #tpu.memory_space<vmem>>, vector<1x64xf32>
    %4 = vector.broadcast %3 : vector<1x64xf32> to vector<128x64xf32>
    %5 = arith.addf %2, %4 : vector<128x64xf32>
    %cst_5 = arith.constant 0.000000e+00 : f32
    %6 = vector.broadcast %cst_5 : f32 to vector<128x64xf32>
    %7 = arith.maximumf %5, %6 : vector<128x64xf32>
    %c0_6 = arith.constant 0 : index
    %c0_7 = arith.constant 0 : index
    %8 = vector.load %arg4[%c0_6, %c0_7] : memref<64x256xf32, #tpu.memory_space<vmem>>, vector<64x256xf32>
    %cst_8 = arith.constant dense<0.000000e+00> : vector<128x256xf32>
    %9 = tpu.matmul %7, %8, %cst_8 {dimension_numbers = #tpu.dot_dimension_numbers<[1], [0], [0], [1], [0, 0, 1, 1], [], []>} : vector<128x64xf32>, vector<64x256xf32>, vector<128x256xf32> -> vector<128x256xf32>
    %c0_9 = arith.constant 0 : index
    %c0_10 = arith.constant 0 : index
    %10 = vector.load %arg5[%c0_9, %c0_10] : memref<1x256xf32, #tpu.memory_space<vmem>>, vector<1x256xf32>
    %11 = vector.broadcast %10 : vector<1x256xf32> to vector<128x256xf32>
    %12 = arith.addf %9, %11 : vector<128x256xf32>
    %13 = vector.extract_strided_slice %12 {offsets = [0, 0], sizes = [128, 128], strides = [1, 1]} : vector<128x256xf32> to vector<128x128xf32>
    %14 = math.tanh %13 : vector<128x128xf32>
    %15 = vector.extract_strided_slice %12 {offsets = [0, 128], sizes = [128, 128], strides = [1, 1]} : vector<128x256xf32> to vector<128x128xf32>
    %16 = arith.negf %15 : vector<128x128xf32>
    %17 = math.exp %16 : vector<128x128xf32>
    %cst_11 = arith.constant 1.000000e+00 : f32
    %18 = vector.broadcast %cst_11 : f32 to vector<128x128xf32>
    %19 = arith.addf %18, %17 : vector<128x128xf32>
    %20 = arith.divf %18, %19 : vector<128x128xf32>
    %21 = arith.mulf %14, %20 : vector<128x128xf32>
    %c0_12 = arith.constant 0 : index
    %c0_13 = arith.constant 0 : index
    %22 = vector.load %arg6[%c0_12, %c0_13] : memref<128x2xf32, #tpu.memory_space<vmem>>, vector<128x2xf32>
    %cst_14 = arith.constant dense<0.000000e+00> : vector<128x2xf32>
    %23 = tpu.matmul %21, %22, %cst_14 {dimension_numbers = #tpu.dot_dimension_numbers<[1], [0], [0], [1], [0, 0, 1, 1], [], []>} : vector<128x128xf32>, vector<128x2xf32>, vector<128x2xf32> -> vector<128x2xf32>
    %c0_15 = arith.constant 0 : index
    %c0_16 = arith.constant 0 : index
    %24 = vector.load %arg7[%c0_15, %c0_16] : memref<1x2xf32, #tpu.memory_space<vmem>>, vector<1x2xf32>
    %25 = vector.broadcast %24 : vector<1x2xf32> to vector<128x2xf32>
    %26 = arith.addf %23, %25 : vector<128x2xf32>
    %27 = tpu.iota {dimensions = array<i32: 0>} : vector<128x1xi32>
    %c128_i32 = arith.constant 128 : i32
    %28 = arith.muli %arg0, %c128_i32 : i32
    %29 = vector.broadcast %28 : i32 to vector<128x1xi32>
    %30 = arith.addi %29, %27 : vector<128x1xi32>
    %c300_i32 = arith.constant 300 : i32
    %31 = vector.broadcast %c300_i32 : i32 to vector<128x1xi32>
    %32 = arith.cmpi slt, %30, %31 : vector<128x1xi32>
    %cst_17 = arith.constant -1.000000e+30 : f32
    %33 = vector.shape_cast %32 : vector<128x1xi1> to vector<128x1xi1>
    %34 = vector.broadcast %33 : vector<128x1xi1> to vector<128x2xi1>
    %35 = vector.broadcast %cst_17 : f32 to vector<128x2xf32>
    %36 = arith.select %34, %26, %35 : vector<128x2xi1>, vector<128x2xf32>
    %37 = tpu.transpose %36, [1, 0] : vector<128x2xf32> -> vector<2x128xf32>
    %c0_18 = arith.constant 0 : index
    %c0_19 = arith.constant 0 : index
    %38 = vector.load %arg8[%c0_18, %c0_19] : memref<2x128xf32, #tpu.memory_space<vmem>>, vector<2x128xf32>
    tpu.vector_store %arg8[%c0_18, %c0_19], %37 {strides = array<i32>} : memref<2x128xf32, #tpu.memory_space<vmem>>, vector<2x128xf32>,
    %cst_20 = arith.constant dense<0xFF800000> : vector<2xf32>
    %39 = vector.multi_reduction <maximumf>, %36, %cst_20 [0] : vector<128x2xf32> to vector<2xf32>
    %40 = vector.shape_cast %39 : vector<2xf32> to vector<1x2xf32>
    %41 = vector.broadcast %40 : vector<1x2xf32> to vector<128x2xf32>
    %42 = arith.subf %36, %41 : vector<128x2xf32>
    %43 = math.exp %42 : vector<128x2xf32>
    %cst_21 = arith.constant 0.000000e+00 : f32
    %44 = vector.shape_cast %32 : vector<128x1xi1> to vector<128x1xi1>
    %45 = vector.broadcast %44 : vector<128x1xi1> to vector<128x2xi1>
    %46 = vector.broadcast %cst_21 : f32 to vector<128x2xf32>
    %47 = arith.select %45, %43, %46 : vector<128x2xi1>, vector<128x2xf32>
    %cst_22 = arith.constant dense<0.000000e+00> : vector<2xf32>
    %48 = vector.multi_reduction <add>, %47, %cst_22 [0] : vector<128x2xf32> to vector<2xf32>
    %49 = vector.shape_cast %48 : vector<2xf32> to vector<1x2xf32>
    %50 = tpu.concatenate %40, %49 in 0 : vector<1x2xf32>, vector<1x2xf32> -> vector<2x2xf32>
    %51 = vector.shape_cast %50 : vector<2x2xf32> to vector<1x2x2xf32>
    %c0_23 = arith.constant 0 : index
    %c0_24 = arith.constant 0 : index
    %c0_25 = arith.constant 0 : index
    %52 = vector.load %arg9[%c0_23, %c0_24, %c0_25] : memref<1x2x2xf32, #tpu.memory_space<vmem>>, vector<1x2x2xf32>
    tpu.vector_store %arg9[%c0_23, %c0_24, %c0_25], %51 {strides = array<i32>} : memref<1x2x2xf32, #tpu.memory_space<vmem>>, vector<1x2x2xf32>,
    %cst_26 = arith.constant dense<0.000000e+00> : vector<2x64xf32>
    %53 = tpu.matmul %47, %7, %cst_26 {dimension_numbers = #tpu.dot_dimension_numbers<[0], [0], [1], [1], [0, 1, 1, 1], [], []>} : vector<128x2xf32>, vector<128x64xf32>, vector<2x64xf32> -> vector<2x64xf32>
    %54 = vector.shape_cast %53 : vector<2x64xf32> to vector<1x2x64xf32>
    %c0_27 = arith.constant 0 : index
    %c0_28 = arith.constant 0 : index
    %c0_29 = arith.constant 0 : index
    %55 = vector.load %arg10[%c0_27, %c0_28, %c0_29] : memref<1x2x64xf32, #tpu.memory_space<vmem>>, vector<1x2x64xf32>
    tpu.vector_store %arg10[%c0_27, %c0_28, %c0_29], %54 {strides = array<i32>} : memref<1x2x64xf32, #tpu.memory_space<vmem>>, vector<1x2x64xf32>,
    return
  }
  func.func @transform_0(%arg0: i32) -> (i32, i32) {
    %c0_i32 = arith.constant 0 : i32
    %c0_i32_0 = arith.constant 0 : i32
    return %arg0, %c0_i32 : i32, i32
  }
  func.func @transform_1(%arg0: i32) -> (i32, i32) {
    %c0_i32 = arith.constant 0 : i32
    %c0_i32_0 = arith.constant 0 : i32
    %c0_i32_1 = arith.constant 0 : i32
    return %c0_i32, %c0_i32_0 : i32, i32
  }
  func.func @transform_2(%arg0: i32) -> (i32, i32) {
    %c0_i32 = arith.constant 0 : i32
    %c0_i32_0 = arith.constant 0 : i32
    %c0_i32_1 = arith.constant 0 : i32
    return %c0_i32, %c0_i32_0 : i32, i32
  }
  func.func @transform_3(%arg0: i32) -> (i32, i32) {
    %c0_i32 = arith.constant 0 : i32
    %c0_i32_0 = arith.constant 0 : i32
    %c0_i32_1 = arith.constant 0 : i32
    return %c0_i32, %c0_i32_0 : i32, i32
  }
  func.func @transform_4(%arg0: i32) -> (i32, i32) {
    %c0_i32 = arith.constant 0 : i32
    %c0_i32_0 = arith.constant 0 : i32
    %c0_i32_1 = arith.constant 0 : i32
    return %c0_i32, %c0_i32_0 : i32, i32
  }
  func.func @transform_5(%arg0: i32) -> (i32, i32) {
    %c0_i32 = arith.constant 0 : i32
    %c0_i32_0 = arith.constant 0 : i32
    %c0_i32_1 = arith.constant 0 : i32
    return %c0_i32, %c0_i32_0 : i32, i32
  }
  func.func @transform_6(%arg0: i32) -> (i32, i32) {
    %c0_i32 = arith.constant 0 : i32
    %c0_i32_0 = arith.constant 0 : i32
    %c0_i32_1 = arith.constant 0 : i32
    return %c0_i32, %c0_i32_0 : i32, i32
  }
  func.func @transform_7(%arg0: i32) -> (i32, i32) {
    %c0_i32 = arith.constant 0 : i32
    %c0_i32_0 = arith.constant 0 : i32
    return %c0_i32, %arg0 : i32, i32
  }
  func.func @transform_8(%arg0: i32) -> (i32, i32, i32) {
    %c0_i32 = arith.constant 0 : i32
    %c0_i32_0 = arith.constant 0 : i32
    %c0_i32_1 = arith.constant 0 : i32
    return %arg0, %c0_i32, %c0_i32_0 : i32, i32, i32
  }
  func.func @transform_9(%arg0: i32) -> (i32, i32, i32) {
    %c0_i32 = arith.constant 0 : i32
    %c0_i32_0 = arith.constant 0 : i32
    %c0_i32_1 = arith.constant 0 : i32
    return %arg0, %c0_i32, %c0_i32_0 : i32, i32, i32
  }
}

</mosaic_0001>

<bundles_post_ra>
// kernel: tpu_custom_call.1
= control target key start
LH: loop header
LB: loop body
LE: loop exit
PB: predicated region body
PF: predicated region fallthrough
CT: control target
= control target key end

     0   :  { %s3167_s0 = inlined_call_operand.hbm [shape: f32[384,128], index: 0, kind: input, shape index: {}]   ;;  %s3168_s1 = inlined_call_operand.vmem [shape: f32[128,64], index: 1, kind: input, shape index: {}]   ;;  %s3169_s2 = inlined_call_operand.vmem [shape: f32[1,64], index: 2, kind: input, shape index: {}]   ;;  %s3170_s3 = inlined_call_operand.vmem [shape: f32[64,256], index: 3, kind: input, shape index: {}]   ;;  %s3171_s4 = inlined_call_operand.vmem [shape: f32[1,256], index: 4, kind: input, shape index: {}]   ;;  %s3172_s5 = inlined_call_operand.vmem [shape: f32[128,2], index: 5, kind: input, shape index: {}]   ;;  %s3173_s6 = inlined_call_operand.vmem [shape: f32[1,2], index: 6, kind: input, shape index: {}]   ;;  %s3174_s7 = inlined_call_operand.hbm [shape: f32[2,384], index: 7, kind: output, shape index: {0}]   ;;  %s3175_s8 = inlined_call_operand.vmem [shape: f32[3,2,2], index: 8, kind: output, shape index: {1}]   ;;  %s3176_s9 = inlined_call_operand.hbm [shape: f32[3,2,64], index: 9, kind: output, shape index: {2}]  }
   0x1   :  { %3181 = sst [smem:[#allocation12_spill]] %s3167_s0 }
   0x2   :  { %15 = vsyncpa [#allocation3], 0 }
   0x3   :  { %17 = vsyncpa [#allocation3 + $0x1], 0 }
   0x4   :  { %18 = vsyncpa [#allocation4], 0 }
   0x5   :  { %20 = vsyncpa [#allocation4 + $0x1], 0 }
   0x6   :  { %21 = vsyncpa [#allocation7], 0 }
   0x7   :  { %23 = vsyncpa [#allocation7 + $0x1], 0  ;;  %s2408_s30 = smov 0   ;;  %s2410_s10 = smov 0  }
   0x8   :  { %s2412_s11 = smov 0   ;;  %s2414_s12 = smov 0  }
   0x9 LB: > { %s2429_s13 = sadd.s32 4294967295, %s2348_s12   ;;  %s1651_s14 = sadd.s32 4294967294, %s2348_s12   ;;  %s2348_s12 = sphi %s2414_s12, %s3198_s12   ;;  %s2344_s11 = sphi %s2412_s11, %s3197_s11   ;;  %s2340_s10 = sphi %s2410_s10, %s3196_s10   ;;  %s2336_s30 = sphi %s2408_s30, %s3195_s30  }
   0xa   : > { %s2433_s15 = sadd.s32 1, %s2348_s12   ;;  %s36_s16 = sadd.s32 1, %s2344_s11 }
   0xb   : > { %s33_s17 = ssub.s32 %s2348_s12, %s2433_s15  ;;  %p43_p0 = scmp.ne.s32.totalorder %s2344_s11, %s2340_s10 }
   0xc   : > { %p34_p1 = scmp.eq.s32.totalorder %s33_s17, 0  ;;  %p44_p2 = scmp.eq.s32.totalorder %s2348_s12, 0 }
   0xd   : > { %p49_p3 = scmp.ne.s32.totalorder %s2340_s10, %s2336_s30  ;;  %p50_p4 = scmp.eq.s32.totalorder %s2429_s13, 0 }
   0xe   : > { %s2445_s18 = scalar_select %p34_p1, %s2344_s11, %s36_s16  }
   0xf   : > { %p2447_p5 = por %p44_p2, %p43_p0  ;;  %p2451_p6 = por %p50_p4, %p49_p3 }
  0x10   : > { %3182 = sst [smem:[#allocation11_spill]] %s2445_s18  ;;  %p199_p7 = scmp.eq.s32.totalorder %s2429_s13, 2 }
  0x11   : > { %p205_p8 = scmp.eq.s32.totalorder %s1651_s14, 2  ;;  %p2053_p9 = scmp.lt.s32.totalorder %s2348_s12, 3 }
  0x12   : > { %p2457_p10 = por %p199_p7, %p43_p0  ;;  %s295_s23 = sand.u32 1, %s2344_s11  }
  0x13   : > { %p2461_p11 = por %p205_p8, %p49_p3  ;;  %s1703_s24 = sshll.u32 %s2348_s12, 11 }
  0x14   : > { %s3185_s21 = scalar_select %p2457_p10, 1, 0 }
  0x15   : > { %s3186_s22 = scalar_select %p2461_p11, 1, 0 }
  0x16   : > { %s1654_s25 = sshll.u32 %s295_s23, 7  ;;  %s3187_s0 = sld [smem:[#allocation12_spill]] }
  0x17   : > { %s299_s29 = scalar_lea.vmem [#allocation2], %s1654_s25  ;;  %p2474_p12 = pnand %p2053_p9, %p2447_p5 }
  0x18   : > { %s306_s14 = sshll.u32 %s299_s29, 4  ;;  %s2480_s17 = scalar_lea.sflag [#allocation3], %s295_s23  ;;  %s2478_s14 = int_to_ptr.vmem [resolvable:$true] %s306_s14 }
  0x19   : > { %p2222_p0 = pneg %p2474_p12 }
  0x1c   : > { %s2470_s28 = scalar_lea.hbm %s3187_s0, %s1703_s24  ;;  %s2225_s25 = scalar_lea.hbm %s3187_s0, 6144 }
  0x1d   : > { %s2220_s26 = scalar_lea.hbm %s2470_s28, 2048  ;;  %p2226_p3 = scmp.lt.u32.totalorder %s2470_s28, %s3187_s0 }
  0x1e   : > { %p2221_p13 = scmp.ne.s32.totalorder %s2470_s28, %s2220_s26  ;;  %p2227_p4 = scmp.lt.u32.totalorder %s2225_s25, %s2220_s26 }
  0x1f   : > { %p2229_p7 = scmp.lt.u32.totalorder %s2220_s26, %s2470_s28 }
  0x20   : > { %p2223_p1 = pnand %p2222_p0, %p2221_p13  ;;  %p2228_p5 = por %p2227_p4, %p2226_p3 }
  0x22   : > { %p2224_p2 = pneg %p2223_p1  ;;  %p2230_p8 = por %p2229_p7, %p2228_p5 }
  0x24   : > { %p2231_p9 = pnand %p2230_p8, %p2224_p2 }
  0x26   : > { %2234 = shalt.err (!%p2231_p9)
}
  0x27   : > { %s2235_s23 = scalar_lea.vmem %s2478_s14, 2048  ;;  %s2350_s24 = smov [#allocation2]  }
  0x28   : > { %p2236_p13 = scmp.ne.s32.totalorder %s2478_s14, %s2235_s23  ;;  %s2240_s19 = sshll.u32 %s2350_s24, 4  ;;  %s2241_s19 = int_to_ptr.vmem [resolvable:$false] %s2240_s19 }
  0x29   : > { %s2242_s27 = scalar_lea.vmem %s2241_s19, 4096  ;;  %p2243_p10 = scmp.lt.s32.totalorder %s2478_s14, %s2241_s19 }
  0x2a   : > { %p2238_p1 = pnand %p2236_p13, %p2222_p0  ;;  %p2244_p3 = scmp.lt.s32.totalorder %s2242_s27, %s2235_s23 }
  0x2c   : > { %p2239_p11 = pneg %p2238_p1  ;;  %p2245_p4 = por %p2244_p3, %p2243_p10 }
  0x2e   : > { %p2246_p5 = pnand %p2245_p4, %p2239_p11 }
  0x30   : > { %2249 = shalt.err (!%p2246_p5)
}
  0x31   : > { %s2351_s26 = smov 128   ;;  %s2352_s25 = smov 8  }
  0x32   : > { %2045 = dma.hbm_to_vmem [thread:$0]  (!%p2474_p12), %s2470_s28, 2048, %s2478_s14, %s2480_s17, %s2351_s26, %s2351_s26, %s2352_s25  }
  0x33   : > { %p1657_p0 = scmp.ge.s32.totalorder %s2348_s12, 1  ;;  %p314_p2 = scmp.lt.s32.totalorder %s2348_s12, 4 }
  0x35   : > { %p315_p7 = pnand %p1657_p0, %p314_p2 }
  0x36   : > { %s2511_s29 = sand.u32 (!%p315_p7), 1, %s2340_s10  }
  0x37   : > { %318 = sbr.rel (%p315_p7) target bundleno = 1225 (0x4c9), region = 48  ;;  %s1658_s23 = sshll.u32 (!%p315_p7), %s2511_s29, 7 }
  0x38   : > { %s321_s24 = scalar_lea.sflag (!%p315_p7), [#allocation3], %s2511_s29  ;;  %s2515_s19 = scalar_lea.vmem (!%p315_p7), [#allocation2], %s1658_s23 }
  0x3e   : > { %2323 = dma.done.wait (%p2451_p6), %s321_s24, 2048  }
  0x3f   : > { %2325 = vsyncadd (%p2451_p6), %s321_s24, 4294965248  ;;  %v389_v0 = vld [vmem:[%s3168_s1] sm:$0xff]  ;;  %v390_v1 = vld [vmem:[%s3168_s1 + $0x8] sm:$0xff]  ;;  %vm601_vm0 = vcmask 523264   ;;  %s1696_s17 = sshll.u32 %s2429_s13, 7  ;;  %vm2355_vm9 = vmmov 0  }
  0x40   : > { %v391_v2 = vld [vmem:[%s3168_s1 + $0x10] sm:$0xff]  ;;  %v1932_v3 = vpack.c.bf16 %v390_v1, %v389_v0  ;;  %v392_v4 = vld [vmem:[%s3168_s1 + $0x18] sm:$0xff]  ;;  %v393_v6 = vld [vmem:[%s3168_s1 + $0x20] sm:$0xff]  ;;  %v2353_v0 = vmov 0.0   ;;  %v2354_v1 = vmov 0.0|0.0   ;;  %vm1239_vm10 = vcmask 15360  }
  0x41   : > { %v1936_v5 = vpack.c.bf16 %v392_v4, %v391_v2  ;;  %v394_v7 = vld [vmem:[%s3168_s1 + $0x28] sm:$0xff]  ;;  %v373_v9 = vld [vmem:[%s2515_s19] sm:$0xff]  ;;  %v395_v10 = vld [vmem:[%s3168_s1 + $0x30] sm:$0xff]  ;;  %714 = vmatprep.mubr.f32.mxu1 %v2353_v0  ;;  %p369_p6 = scmp.lt.s32.totalorder %s2429_s13, 2  ;;  %s3179_s18 = sshll.u32 %s2429_s13, 5 }
  0x42   : > { %1933 = vmatprep.subr.bf16.mxu0 %v1932_v3  ;;  %v1940_v8 = vpack.c.bf16 %v394_v7, %v393_v6  ;;  %v396_v11 = vld [vmem:[%s3168_s1 + $0x38] sm:$0xff]  ;;  %1817 = vmatprep.mubr.f32.mxu0 %v373_v9  ;;  %v397_v13 = vld [vmem:[%s3168_s1 + $0x40] sm:$0xff]  ;;  %v398_v14 = vld [vmem:[%s3168_s1 + $0x48] sm:$0xff]  ;;  %s1507_s27 = scalar_lea.hbm %s3174_s7, %s3179_s18  ;;  %s1487_s26 = scalar_lea.sflag [#allocation4], %s2511_s29 }
  0x43   : > { %1935 = vmatpush3.bf16.msra.mxu0 %v1932_v3  ;;  %v1944_v12 = vpack.c.bf16 %v396_v11, %v395_v10  ;;  %v574_v15 = vld [vmem:[%s3170_s3 + $0x8] sm:$0xff]  ;;  %v576_v16 = vld [vmem:[%s3170_s3 + $0x18] sm:$0xff]  ;;  %v573_v17 = vld [vmem:[%s3170_s3] sm:$0xff]  ;;  %v1948_v24 = vpack.c.bf16 %v398_v14, %v397_v13  ;;  %s370_s25 = scalar_select %p369_p6, %s2429_s13, 2 }
  0x44   : > { %1937 = vmatprep.subr.bf16.mxu0 %v1936_v5  ;;  %v575_v18 = vld [vmem:[%s3170_s3 + $0x10] sm:$0xff]  ;;  %v1964_v19 = vpack.c.bf16 %v576_v16, %v574_v15  ;;  %v578_v21 = vld [vmem:[%s3170_s3 + $0x28] sm:$0xff]  ;;  %v580_v22 = vld [vmem:[%s3170_s3 + $0x38] sm:$0xff]  ;;  %p3190_p11 = scmp.ne.s32.totalorder %s3185_s21, 0 }
  0x45   : > { %v1966_v20 = vpack.c.bf16 %v575_v18, %v573_v17  ;;  %v577_v23 = vld [vmem:[%s3170_s3 + $0x20] sm:$0xff]  ;;  %v1968_v25 = vpack.c.bf16 %v580_v22, %v578_v21  ;;  %v579_v26 = vld [vmem:[%s3170_s3 + $0x30] sm:$0xff]  ;;  %v582_v27 = vld [vmem:[%s3170_s3 + $0x48] sm:$0xff]  ;;  %s1661_s20 = sshll.u32 %s370_s25, 1 }
  0x46   : > { %v584_v28 = vld [vmem:[%s3170_s3 + $0x58] sm:$0xff]  ;;  %v399_v29 = vld [vmem:[%s3168_s1 + $0x50] sm:$0xff]  ;;  %1965 = vmatprep.subr.bf16.mxu1 %v1964_v19  ;;  %v1970_v31 = vpack.c.bf16 %v579_v26, %v577_v23  ;;  %v581_v33 = vld [vmem:[%s3170_s3 + $0x40] sm:$0xff]  ;;  %s372_s14 = scalar_lea.vmem %s3175_s8, %s1661_s20  ;;  %s2356_s20 = smov [#allocation5]  }
  0x47   : > { %1939 = vmatpush3.bf16.msra.mxu0 %v1936_v5  ;;  %v400_v30 = vld [vmem:[%s3168_s1 + $0x58] sm:$0xff]  ;;  %1967 = vmatpush1.bf16.msra.mxu1 %v1966_v20  ;;  %v1972_v32 = vpack.c.bf16 %v584_v28, %v582_v27  ;;  %v583_v34 = vld [vmem:[%s3170_s3 + $0x50] sm:$0xff]  ;;  %v401_v36 = vld [vmem:[%s3168_s1 + $0x60] sm:$0xff]  ;;  %s2254_s24 = sshll.u32 %s2356_s20, 4  ;;  %s2255_s24 = int_to_ptr.vmem [resolvable:$false] %s2254_s24 }
  0x48   : > { %1941 = vmatprep.subr.bf16.mxu0 %v1940_v8  ;;  %1969 = vmatprep.subr.bf16.mxu1 %v1968_v25  ;;  %v1952_v35 = vpack.c.bf16 %v400_v30, %v399_v29  ;;  %v402_v37 = vld [vmem:[%s3168_s1 + $0x68] sm:$0xff]  ;;  %v1974_v38 = vpack.c.bf16 %v583_v34, %v581_v33  ;;  %v403_v40 = vld [vmem:[%s3168_s1 + $0x70] sm:$0xff]  ;;  %v404_v41 = vld [vmem:[%s3168_s1 + $0x78] sm:$0xff] }
  0x49   : > { %v1956_v39 = vpack.c.bf16 %v402_v37, %v401_v36  ;;  %v1960_v42 = vpack.c.bf16 %v404_v41, %v403_v40  ;;  %v374_v43 = vld [vmem:[%s2515_s19 + $0x8] sm:$0xff]  ;;  %v375_v44 = vld [vmem:[%s2515_s19 + $0x10] sm:$0xff]  ;;  %v376_v45 = vld [vmem:[%s2515_s19 + $0x18] sm:$0xff] }
  0x4a   : > { %v377_v46 = vld [vmem:[%s2515_s19 + $0x20] sm:$0xff]  ;;  %v378_v47 = vld [vmem:[%s2515_s19 + $0x28] sm:$0xff]  ;;  %v379_v48 = vld [vmem:[%s2515_s19 + $0x30] sm:$0xff] }
  0x4b   : > { %1943 = vmatpush3.bf16.msra.mxu0 %v1940_v8  ;;  %1971 = vmatpush1.bf16.msra.mxu1 %v1970_v31  ;;  %v380_v49 = vld [vmem:[%s2515_s19 + $0x38] sm:$0xff]  ;;  %v381_v50 = vld [vmem:[%s2515_s19 + $0x40] sm:$0xff]  ;;  %v382_v51 = vld [vmem:[%s2515_s19 + $0x48] sm:$0xff] }
  0x4c   : > { %1945 = vmatprep.subr.bf16.mxu0 %v1944_v12  ;;  %1973 = vmatprep.subr.bf16.mxu1 %v1972_v32  ;;  %v383_v52 = vld [vmem:[%s2515_s19 + $0x50] sm:$0xff]  ;;  %v384_v53 = vld [vmem:[%s2515_s19 + $0x58] sm:$0xff]  ;;  %v385_v54 = vld [vmem:[%s2515_s19 + $0x60] sm:$0xff] }
  0x4d   : > { %v386_v55 = vld [vmem:[%s2515_s19 + $0x68] sm:$0xff]  ;;  %v387_v56 = vld [vmem:[%s2515_s19 + $0x70] sm:$0xff]  ;;  %v388_v57 = vld [vmem:[%s2515_s19 + $0x78] sm:$0xff]  ;;  %s3180_s19 = sshll.u32 %s2511_s29, 1 }
  0x4e   : > { %v586_v58 = vld [vmem:[%s3170_s3 + $0x68] sm:$0xff]  ;;  %v588_v59 = vld [vmem:[%s3170_s3 + $0x78] sm:$0xff]  ;;  %v585_v61 = vld [vmem:[%s3170_s3 + $0x60] sm:$0xff]  ;;  %s354_s23 = scalar_lea.vmem [#allocation5], %s3180_s19 }
  0x4f   : > { %1947 = vmatpush3.bf16.msra.mxu0 %v1944_v12  ;;  %1975 = vmatpush1.bf16.msra.mxu1 %v1974_v38  ;;  %v1976_v60 = vpack.c.bf16 %v588_v59, %v586_v58  ;;  %v587_v62 = vld [vmem:[%s3170_s3 + $0x70] sm:$0xff]  ;;  %v2638_v2 = vld [vmem:[%s3169_s2] ss:$0 sm:$0xff]  ;;  %s1509_s0 = sshll.u32 %s354_s23, 4  ;;  %s3092_s0 = int_to_ptr.vmem [resolvable:$true] %s1509_s0 }
  0x50   : > { %1949 = vmatprep.subr.bf16.mxu0 %v1948_v24  ;;  %v1978_v63 = vpack.c.bf16 %v587_v62, %v585_v61  ;;  %v939_v59 = vld [vmem:[%s3172_s5] sm:$0xff]  ;;  %v941_v62 = vld [vmem:[%s3172_s5 + $0x10] sm:$0xff]  ;;  %s2250_s25 = scalar_lea.vmem %s3092_s0, 32  ;;  %p2257_p9 = scmp.lt.s32.totalorder %s3092_s0, %s2255_s24 }
  0x51   : > { %1977 = vmatprep.subr.bf16.mxu1 %v1976_v60  ;;  %v940_v60 = vld [vmem:[%s3172_s5 + $0x8] sm:$0xff]  ;;  %p2251_p10 = scmp.ne.s32.totalorder %s3092_s0, %s2250_s25 }
  0x52   : > { %v1980_v61 = vpack.c.bf16 %v940_v60, %v939_v59 }
  0x53   : > { %1951 = vmatpush3.bf16.msra.mxu0 %v1948_v24  ;;  %1979 = vmatpush1.bf16.msra.mxu1 %v1978_v63  ;;  %v942_v63 = vld [vmem:[%s3172_s5 + $0x18] sm:$0xff]  ;;  %p2252_p12 = pnand %p2251_p10, %p3190_p11 }
  0x54   : > { %1953 = vmatprep.subr.bf16.mxu0 %v1952_v35  ;;  %2012 = vmatprep.subr.bf16.mxu1 %v2354_v1 }
  0x55   : > { %p2253_p8 = pneg %p2252_p12 }
  0x57   : > { %1955 = vmatpush3.bf16.msra.mxu0 %v1952_v35 }
  0x58   : > { %1957 = vmatprep.subr.bf16.mxu0 %v1956_v39 }
  0x5b   : > { %1959 = vmatpush3.bf16.msra.mxu0 %v1956_v39 }
  0x5c   : > { %1961 = vmatprep.subr.bf16.mxu0 %v1960_v42 }
  0x5f   : > { %1963 = vmatpush3.bf16.msra.mxu0 %v1960_v42 }
  0x60   : > { %1981 = vmatprep.subr.bf16.mxu0 %v1980_v61 }
  0x62   : > { %1818 = vmatmul.mubr.f32.vlgmr.msra.gmra.mrb[0].mxu0 %v374_v43 }
  0x63   : > { %1820 = vmatprep.mubr.f32.mxu0 %v375_v44  ;;  %1983 = vmatpush3.bf16.msra.mxu0 %v1980_v61 }
  0x66   : > { %1821 = vmatmul.mubr.f32.gmra.mrb[2].mxu0 %v376_v45 }
  0x67   : > { %1823 = vmatprep.mubr.f32.mxu0 %v377_v46 }
  0x6a   : > { %1824 = vmatmul.mubr.f32.gmra.mrb[4].mxu0 %v378_v47 }
  0x6b   : > { %1826 = vmatprep.mubr.f32.mxu0 %v379_v48 }
  0x6e   : > { %1827 = vmatmul.mubr.f32.gmra.mrb[6].mxu0 %v380_v49 }
  0x6f   : > { %1829 = vmatprep.mubr.f32.mxu0 %v381_v50 }
  0x72   : > { %1830 = vmatmul.mubr.f32.gmra.mrb[8].mxu0 %v382_v51 }
  0x73   : > { %1832 = vmatprep.mubr.f32.mxu0 %v383_v52 }
  0x76   : > { %1833 = vmatmul.mubr.f32.gmra.mrb[10].mxu0 %v384_v53 }
  0x77   : > { %1835 = vmatprep.mubr.f32.mxu0 %v385_v54 }
  0x7a   : > { %1836 = vmatmul.mubr.f32.gmra.mrb[12].mxu0 %v386_v55 }
  0x7b   : > { %1838 = vmatprep.mubr.f32.mxu0 %v387_v56 }
  0x7e   : > { %1839 = vmatmul.mubr.f32.gmra.mrb[14].mxu0 %v388_v57 }
 0x135   : > { %v1819_v3 = vpop.f32.mrb[0].mxu0 }
 0x136   : > { %v484_v4 = vadd.f32 %v1819_v3, %v2638_v2  ;;  %v478_v5 = vpop.f32.mrb[1].mxu0  ;;  %v944_v3 = vld [vmem:[%s3172_s5 + $0x28] sm:$0xff] }
 0x137   : > { %v479_v6 = vadd.f32 %v2638_v2, %v478_v5  ;;  %v945_v5 = vld [vmem:[%s3172_s5 + $0x30] sm:$0xff] }
 0x138   : > { %v558_v7 = vmax.f32 %v484_v4, 0.0 }
 0x139   : > { %v557_v8 = vmax.f32 %v479_v6, 0.0  ;;  %v1822_v9 = vpop.f32.mrb[2].mxu0  ;;  %v946_v6 = vld [vmem:[%s3172_s5 + $0x38] sm:$0xff] }
 0x13a   : > { %v494_v10 = vadd.f32 %v1822_v9, %v2638_v2  ;;  %v488_v11 = vpop.f32.mrb[3].mxu0  ;;  %v948_v9 = vld [vmem:[%s3172_s5 + $0x48] sm:$0xff] }
 0x13b   : > { %v2013_v12 = vpack.c.bf16 %v558_v7, %v557_v8  ;;  %1663 = vmatmul.mubr.msk.f32.vlgmr.msra.gmra.mrb[0].mxu1 %vm601_vm0, %v557_v8  ;;  %v489_v13 = vadd.f32 %v2638_v2, %v488_v11  ;;  %v947_v8 = vld [vmem:[%s3172_s5 + $0x40] sm:$0xff]  ;;  %v949_v11 = vld [vmem:[%s3172_s5 + $0x50] sm:$0xff] }
 0x13c   : > { %v560_v14 = vmax.f32 %v494_v10, 0.0  ;;  %720 = vmatprep.mubr.f32.mxu1 %v2353_v0  ;;  %v1996_v10 = vpack.c.bf16 %v948_v9, %v947_v8 }
 0x13d   : > { %v559_v15 = vmax.f32 %v489_v13, 0.0  ;;  %2014 = vmatpush3.bf16.msra.mxu1 %v2013_v12  ;;  %v1825_v16 = vpop.f32.mrb[4].mxu0  ;;  %v950_v12 = vld [vmem:[%s3172_s5 + $0x58] sm:$0xff] }
 0x13e   : > { %2015 = vmatprep.subr.bf16.mxu1 %v2354_v1  ;;  %v504_v17 = vadd.f32 %v1825_v16, %v2638_v2  ;;  %v498_v18 = vpop.f32.mrb[5].mxu0  ;;  %v2000_v13 = vpack.c.bf16 %v950_v12, %v949_v11 }
 0x13f   : > { %v2016_v19 = vpack.c.bf16 %v560_v14, %v559_v15  ;;  %1664 = vmatmul.mubr.msk.f32.gmra.mrb[2].mxu1 %vm601_vm0, %v558_v7  ;;  %v499_v20 = vadd.f32 %v2638_v2, %v498_v18  ;;  %v1992_v7 = vpack.c.bf16 %v946_v6, %v945_v5  ;;  %v954_v18 = vld [vmem:[%s3172_s5 + $0x78] sm:$0xff] }
 0x140   : > { %726 = vmatprep.mubr.f32.mxu1 %v2353_v0  ;;  %v562_v21 = vmax.f32 %v504_v17, 0.0  ;;  %v953_v17 = vld [vmem:[%s3172_s5 + $0x70] sm:$0xff] }
 0x141   : > { %2017 = vmatpush3.bf16.msra.mxu1 %v2016_v19  ;;  %v561_v22 = vmax.f32 %v499_v20, 0.0  ;;  %v1828_v23 = vpop.f32.mrb[6].mxu0  ;;  %v2008_v19 = vpack.c.bf16 %v954_v18, %v953_v17  ;;  %v591_v20 = vlaneseq }
 0x142   : > { %2018 = vmatprep.subr.bf16.mxu1 %v2354_v1  ;;  %v514_v24 = vadd.f32 %v1828_v23, %v2638_v2  ;;  %v508_v25 = vpop.f32.mrb[7].mxu0  ;;  %v589_v23 = vld [vmem:[%s3171_s4] sm:$0x3] }
 0x143   : > { %1665 = vmatmul.mubr.msk.f32.gmra.mrb[4].mxu1 %vm601_vm0, %v559_v15  ;;  %v2019_v26 = vpack.c.bf16 %v562_v21, %v561_v22  ;;  %v509_v27 = vadd.f32 %v2638_v2, %v508_v25  ;;  %v952_v15 = vld [vmem:[%s3172_s5 + $0x68] sm:$0xff] }
 0x144   : > { %732 = vmatprep.mubr.f32.mxu1 %v2353_v0  ;;  %v564_v28 = vmax.f32 %v514_v24, 0.0 }
 0x145   : > { %2020 = vmatpush3.bf16.msra.mxu1 %v2019_v26  ;;  %v563_v29 = vmax.f32 %v509_v27, 0.0  ;;  %v1831_v30 = vpop.f32.mrb[8].mxu0 }
 0x146   : > { %2021 = vmatprep.subr.bf16.mxu1 %v2354_v1  ;;  %v524_v31 = vadd.f32 %v1831_v30, %v2638_v2  ;;  %v518_v32 = vpop.f32.mrb[9].mxu0 }
 0x147   : > { %1666 = vmatmul.mubr.msk.f32.gmra.mrb[6].mxu1 %vm601_vm0, %v560_v14  ;;  %v2022_v33 = vpack.c.bf16 %v564_v28, %v563_v29  ;;  %v519_v34 = vadd.f32 %v2638_v2, %v518_v32  ;;  %v951_v14 = vld [vmem:[%s3172_s5 + $0x60] sm:$0xff] }
 0x148   : > { %738 = vmatprep.mubr.f32.mxu1 %v2353_v0  ;;  %v566_v35 = vmax.f32 %v524_v31, 0.0  ;;  %v2004_v16 = vpack.c.bf16 %v952_v15, %v951_v14 }
 0x149   : > { %2023 = vmatpush3.bf16.msra.mxu1 %v2022_v33  ;;  %v565_v36 = vmax.f32 %v519_v34, 0.0  ;;  %v1834_v37 = vpop.f32.mrb[10].mxu0 }
 0x14a   : > { %2024 = vmatprep.subr.bf16.mxu1 %v2354_v1  ;;  %v534_v38 = vadd.f32 %v1834_v37, %v2638_v2  ;;  %v528_v39 = vpop.f32.mrb[11].mxu0 }
 0x14b   : > { %1667 = vmatmul.mubr.msk.f32.gmra.mrb[8].mxu1 %vm601_vm0, %v561_v22  ;;  %v2025_v40 = vpack.c.bf16 %v566_v35, %v565_v36  ;;  %v529_v41 = vadd.f32 %v2638_v2, %v528_v39 }
 0x14c   : > { %744 = vmatprep.mubr.f32.mxu1 %v2353_v0  ;;  %v568_v42 = vmax.f32 %v534_v38, 0.0 }
 0x14d   : > { %2026 = vmatpush3.bf16.msra.mxu1 %v2025_v40  ;;  %v567_v43 = vmax.f32 %v529_v41, 0.0  ;;  %v1837_v44 = vpop.f32.mrb[12].mxu0 }
 0x14e   : > { %2027 = vmatprep.subr.bf16.mxu1 %v2354_v1  ;;  %v544_v45 = vadd.f32 %v1837_v44, %v2638_v2  ;;  %v538_v46 = vpop.f32.mrb[13].mxu0 }
 0x14f   : > { %1668 = vmatmul.mubr.msk.f32.gmra.mrb[10].mxu1 %vm601_vm0, %v562_v21  ;;  %v2028_v47 = vpack.c.bf16 %v568_v42, %v567_v43  ;;  %v539_v48 = vadd.f32 %v2638_v2, %v538_v46  ;;  %v2742_v21 = vshrl.u32 %v591_v20, 7 }
 0x150   : > { %750 = vmatprep.mubr.f32.mxu1 %v2353_v0  ;;  %v570_v49 = vmax.f32 %v544_v45, 0.0 }
 0x151   : > { %2029 = vmatpush3.bf16.msra.mxu1 %v2028_v47  ;;  %v569_v50 = vmax.f32 %v539_v48, 0.0  ;;  %v1840_v51 = vpop.f32.mrb[14].mxu0  ;;  %v597_v22 = vsub.s32 1, %v2742_v21  ;;  %v593_v30 = vsub.s32 0, %v2742_v21 }
 0x152   : > { %2030 = vmatprep.subr.bf16.mxu1 %v2354_v1  ;;  %v554_v52 = vadd.f32 %v1840_v51, %v2638_v2  ;;  %v548_v53 = vpop.f32.mrb[15].mxu0 }
 0x153   : > { %1669 = vmatmul.mubr.msk.f32.gmra.mrb[12].mxu1 %vm601_vm0, %v563_v29  ;;  %v2031_v54 = vpack.c.bf16 %v570_v49, %v569_v50  ;;  %v549_v55 = vadd.f32 %v2638_v2, %v548_v53  ;;  %v943_v2 = vld [vmem:[%s3172_s5 + $0x20] sm:$0xff]  ;;  %v2748_v24 = vrot.slane %v589_v23, %v597_v22 }
 0x154   : > { %756 = vmatprep.mubr.f32.mxu1 %v2353_v0  ;;  %v572_v56 = vmax.f32 %v554_v52, 0.0  ;;  %v1988_v4 = vpack.c.bf16 %v944_v3, %v943_v2 }
 0x155   : > { %2032 = vmatpush3.bf16.msra.mxu1 %v2031_v54  ;;  %v571_v57 = vmax.f32 %v549_v55, 0.0 }
 0x156   : > { %2033 = vmatprep.subr.bf16.mxu1 %v2354_v1  ;;  %v1984_v1 = vpack.c.bf16 %v942_v63, %v941_v62 }
 0x157   : > { %1670 = vmatmul.mubr.msk.f32.gmra.mrb[14].mxu1 %vm601_vm0, %v564_v28  ;;  %v2034_v58 = vpack.c.bf16 %v572_v56, %v571_v57 }
 0x158   : > { %762 = vmatprep.mubr.f32.mxu1 %v2353_v0  ;;  %1985 = vmatprep.subr.bf16.mxu0 %v1984_v1 }
 0x159   : > { %2035 = vmatpush3.bf16.msra.mxu1 %v2034_v58  ;;  %1987 = vmatpush3.bf16.msra.mxu0 %v1984_v1 }
 0x15a   : > { %1989 = vmatprep.subr.bf16.mxu0 %v1988_v4 }
 0x15b   : > { %1671 = vmatmul.mubr.msk.f32.gmra.mrb[16].mxu1 %vm601_vm0, %v565_v36 }
 0x15c   : > { %768 = vmatprep.mubr.f32.mxu1 %v2353_v0 }
 0x15d   : > { %1991 = vmatpush3.bf16.msra.mxu0 %v1988_v4 }
 0x15e   : > { %1993 = vmatprep.subr.bf16.mxu0 %v1992_v7 }
 0x15f   : > { %1672 = vmatmul.mubr.msk.f32.gmra.mrb[18].mxu1 %vm601_vm0, %v566_v35  ;;  %v2753_v35 = vrot.slane %v589_v23, %v593_v30 }
 0x160   : > { %774 = vmatprep.mubr.f32.mxu1 %v2353_v0 }
 0x161   : > { %1995 = vmatpush3.bf16.msra.mxu0 %v1992_v7 }
 0x162   : > { %1997 = vmatprep.subr.bf16.mxu0 %v1996_v10 }
 0x163   : > { %1673 = vmatmul.mubr.msk.f32.gmra.mrb[20].mxu1 %vm601_vm0, %v567_v43 }
 0x164   : > { %780 = vmatprep.mubr.f32.mxu1 %v2353_v0 }
 0x165   : > { %1999 = vmatpush3.bf16.msra.mxu0 %v1996_v10 }
 0x166   : > { %2001 = vmatprep.subr.bf16.mxu0 %v2000_v13 }
 0x167   : > { %1674 = vmatmul.mubr.msk.f32.gmra.mrb[22].mxu1 %vm601_vm0, %v568_v42 }
 0x168   : > { %786 = vmatprep.mubr.f32.mxu1 %v2353_v0 }
 0x169   : > { %2003 = vmatpush3.bf16.msra.mxu0 %v2000_v13 }
 0x16a   : > { %2005 = vmatprep.subr.bf16.mxu0 %v2004_v16 }
 0x16b   : > { %1675 = vmatmul.mubr.msk.f32.gmra.mrb[24].mxu1 %vm601_vm0, %v569_v50 }
 0x16c   : > { %792 = vmatprep.mubr.f32.mxu1 %v2353_v0 }
 0x16d   : > { %2007 = vmatpush3.bf16.msra.mxu0 %v2004_v16 }
 0x16e   : > { %2009 = vmatprep.subr.bf16.mxu0 %v2008_v19 }
 0x16f   : > { %1676 = vmatmul.mubr.msk.f32.gmra.mrb[26].mxu1 %vm601_vm0, %v570_v49 }
 0x170   : > { %798 = vmatprep.mubr.f32.mxu1 %v2353_v0 }
 0x171   : > { %2011 = vmatpush3.bf16.msra.mxu0 %v2008_v19 }
 0x173   : > { %1677 = vmatmul.mubr.msk.f32.gmra.mrb[28].mxu1 %vm601_vm0, %v571_v57 }
 0x174   : > { %804 = vmatprep.mubr.f32.mxu1 %v2353_v0 }
 0x177   : > { %1678 = vmatmul.mubr.msk.f32.gmra.mrb[30].mxu1 %vm601_vm0, %v572_v56 }
 0x178   : > { %1929 = vmatprep.mubr.msk.f32.mxu1 %vm2355_vm9, %v2353_v0  ;;  %v1118_v0 = vadd.s32 80, %v2742_v21 }
 0x20e   : > { %v716_v25 = vpop.f32.mrb[0].mxu1 }
 0x20f   : > { %v718_v26 = vpop.f32.mrb[1].mxu1  ;;  %v717_v40 = vadd.f32 %v716_v25, %v2753_v35 }
 0x210   : > { %v719_v27 = vadd.f32 %v718_v26, %v2748_v24 }
 0x212   : > { %v1679_v28 = vmul.f32 -1.442695, %v719_v27  ;;  %v722_v29 = vpop.f32.mrb[2].mxu1 }
 0x213   : > { %v724_v31 = vpop.f32.mrb[3].mxu1  ;;  %v723_v47 = vadd.f32 %v722_v29, %v2753_v35 }
 0x214   : > { %2092 = vpow2.f32 %v1679_v28  ;;  %v725_v32 = vadd.f32 %v724_v31, %v2748_v24 }
 0x216   : > { %v1680_v33 = vmul.f32 -1.442695, %v725_v32  ;;  %v728_v34 = vpop.f32.mrb[4].mxu1 }
 0x217   : > { %v730_v36 = vpop.f32.mrb[5].mxu1  ;;  %v729_v54 = vadd.f32 %v728_v34, %v2753_v35 }
 0x218   : > { %2094 = vpow2.f32 %v1680_v33  ;;  %v731_v37 = vadd.f32 %v730_v36, %v2748_v24 }
 0x21a   : > { %v1681_v38 = vmul.f32 -1.442695, %v731_v37  ;;  %v734_v39 = vpop.f32.mrb[6].mxu1 }
 0x21b   : > { %v736_v41 = vpop.f32.mrb[7].mxu1  ;;  %v735_v61 = vadd.f32 %v734_v39, %v2753_v35 }
 0x21c   : > { %2096 = vpow2.f32 %v1681_v38  ;;  %v737_v42 = vadd.f32 %v736_v41, %v2748_v24 }
 0x21d   : > { %2098 = vtanh.f32 %v717_v40 }
 0x21e   : > { %v2093_v43 = vpop.eup %2092  ;;  %v1682_v44 = vmul.f32 -1.442695, %v737_v42  ;;  %v740_v45 = vpop.f32.mrb[8].mxu1 }
 0x21f   : > { %v875_v46 = vadd.f32 1.0, %v2093_v43  ;;  %v742_v48 = vpop.f32.mrb[9].mxu1  ;;  %v741_v7 = vadd.f32 %v740_v45, %v2753_v35 }
 0x220   : > { %2100 = vpow2.f32 %v1682_v44  ;;  %v743_v49 = vadd.f32 %v742_v48, %v2748_v24 }
 0x221   : > { %2102 = vrcp.f32 %v875_v46 }
 0x222   : > { %v2095_v50 = vpop.eup %2094  ;;  %v1683_v51 = vmul.f32 -1.442695, %v743_v49  ;;  %v746_v52 = vpop.f32.mrb[10].mxu1  ;;  %2104 = vtanh.f32 %v723_v47 }
 0x223   : > { %v876_v53 = vadd.f32 1.0, %v2095_v50  ;;  %v748_v55 = vpop.f32.mrb[11].mxu1  ;;  %v747_v17 = vadd.f32 %v746_v52, %v2753_v35 }
 0x224   : > { %2106 = vpow2.f32 %v1683_v51  ;;  %v749_v56 = vadd.f32 %v748_v55, %v2748_v24 }
 0x225   : > { %2108 = vrcp.f32 %v876_v53 }
 0x226   : > { %v2097_v57 = vpop.eup %2096  ;;  %v1684_v58 = vmul.f32 -1.442695, %v749_v56  ;;  %v752_v59 = vpop.f32.mrb[12].mxu1  ;;  %2110 = vtanh.f32 %v729_v54 }
 0x227   : > { %v877_v60 = vadd.f32 1.0, %v2097_v57  ;;  %v754_v62 = vpop.f32.mrb[13].mxu1  ;;  %v2099_v1 = vpop.eup %2098  ;;  %v753_v29 = vadd.f32 %v752_v59, %v2753_v35 }
 0x228   : > { %2112 = vpow2.f32 %v1684_v58  ;;  %v755_v63 = vadd.f32 %v754_v62, %v2748_v24 }
 0x229   : > { %2114 = vrcp.f32 %v877_v60 }
 0x22a   : > { %v2101_v2 = vpop.eup %2100  ;;  %v1685_v3 = vmul.f32 -1.442695, %v755_v63  ;;  %v758_v4 = vpop.f32.mrb[14].mxu1  ;;  %2116 = vtanh.f32 %v735_v61 }
 0x22b   : > { %v2103_v5 = vpop.eup %2102  ;;  %v878_v6 = vadd.f32 1.0, %v2101_v2  ;;  %v760_v8 = vpop.f32.mrb[15].mxu1  ;;  %v759_v40 = vadd.f32 %v758_v4, %v2753_v35 }
 0x22c   : > { %2118 = vpow2.f32 %v1685_v3  ;;  %v761_v9 = vadd.f32 %v760_v8, %v2748_v24  ;;  %v923_v10 = vmul.f32 %v2103_v5, %v2099_v1  ;;  %v2105_v11 = vpop.eup %2104 }
 0x22d   : > { %2120 = vrcp.f32 %v878_v6 }
 0x22e   : > { %v2107_v12 = vpop.eup %2106  ;;  %v1686_v13 = vmul.f32 -1.442695, %v761_v9  ;;  %v764_v14 = vpop.f32.mrb[16].mxu1  ;;  %1873 = vmatprep.mubr.f32.mxu0 %v923_v10  ;;  %2122 = vtanh.f32 %v741_v7 }
 0x22f   : > { %v2109_v15 = vpop.eup %2108  ;;  %v879_v16 = vadd.f32 1.0, %v2107_v12  ;;  %v766_v18 = vpop.f32.mrb[17].mxu1  ;;  %v765_v50 = vadd.f32 %v764_v14, %v2753_v35 }
 0x230   : > { %2124 = vpow2.f32 %v1686_v13  ;;  %v767_v19 = vadd.f32 %v766_v18, %v2748_v24  ;;  %v924_v20 = vmul.f32 %v2109_v15, %v2105_v11  ;;  %v2111_v22 = vpop.eup %2110 }
 0x231   : > { %2126 = vrcp.f32 %v879_v16 }
 0x232   : > { %v2113_v23 = vpop.eup %2112  ;;  %v1687_v25 = vmul.f32 -1.442695, %v767_v19  ;;  %v770_v26 = vpop.f32.mrb[18].mxu1  ;;  %1874 = vmatmul.mubr.f32.vlgmr.msra.gmra.mrb[16].mxu0 %v924_v20  ;;  %2128 = vtanh.f32 %v747_v17 }
 0x233   : > { %v2115_v27 = vpop.eup %2114  ;;  %v880_v28 = vadd.f32 1.0, %v2113_v23  ;;  %v772_v30 = vpop.f32.mrb[19].mxu1  ;;  %v771_v60 = vadd.f32 %v770_v26, %v2753_v35 }
 0x234   : > { %2130 = vpow2.f32 %v1687_v25  ;;  %v773_v31 = vadd.f32 %v772_v30, %v2748_v24  ;;  %v925_v32 = vmul.f32 %v2115_v27, %v2111_v22  ;;  %v2117_v33 = vpop.eup %2116 }
 0x235   : > { %2132 = vrcp.f32 %v880_v28 }
 0x236   : > { %v2119_v34 = vpop.eup %2118  ;;  %v1688_v36 = vmul.f32 -1.442695, %v773_v31  ;;  %v776_v37 = vpop.f32.mrb[20].mxu1  ;;  %1876 = vmatprep.mubr.f32.mxu0 %v925_v32  ;;  %2134 = vtanh.f32 %v753_v29 }
 0x237   : > { %v2121_v38 = vpop.eup %2120  ;;  %v881_v39 = vadd.f32 1.0, %v2119_v34  ;;  %v778_v41 = vpop.f32.mrb[21].mxu1  ;;  %v777_v7 = vadd.f32 %v776_v37, %v2753_v35 }
 0x238   : > { %2136 = vpow2.f32 %v1688_v36  ;;  %v779_v42 = vadd.f32 %v778_v41, %v2748_v24  ;;  %v926_v43 = vmul.f32 %v2121_v38, %v2117_v33  ;;  %v2123_v44 = vpop.eup %2122 }
 0x239   : > { %2138 = vrcp.f32 %v881_v39 }
 0x23a   : > { %v2125_v45 = vpop.eup %2124  ;;  %v1689_v46 = vmul.f32 -1.442695, %v779_v42  ;;  %v782_v47 = vpop.f32.mrb[22].mxu1  ;;  %1877 = vmatmul.mubr.f32.gmra.mrb[18].mxu0 %v926_v43  ;;  %2140 = vtanh.f32 %v759_v40 }
 0x23b   : > { %v2127_v48 = vpop.eup %2126  ;;  %v882_v49 = vadd.f32 1.0, %v2125_v45  ;;  %v784_v51 = vpop.f32.mrb[23].mxu1  ;;  %v783_v17 = vadd.f32 %v782_v47, %v2753_v35 }
 0x23c   : > { %2142 = vpow2.f32 %v1689_v46  ;;  %v785_v52 = vadd.f32 %v784_v51, %v2748_v24  ;;  %v927_v53 = vmul.f32 %v2127_v48, %v2123_v44  ;;  %v2129_v54 = vpop.eup %2128 }
 0x23d   : > { %2144 = vrcp.f32 %v882_v49 }
 0x23e   : > { %v2131_v55 = vpop.eup %2130  ;;  %v1690_v56 = vmul.f32 -1.442695, %v785_v52  ;;  %v788_v57 = vpop.f32.mrb[24].mxu1  ;;  %1879 = vmatprep.mubr.f32.mxu0 %v927_v53  ;;  %2146 = vtanh.f32 %v765_v50 }
 0x23f   : > { %v2133_v58 = vpop.eup %2132  ;;  %v883_v59 = vadd.f32 1.0, %v2131_v55  ;;  %v790_v61 = vpop.f32.mrb[25].mxu1  ;;  %v789_v29 = vadd.f32 %v788_v57, %v2753_v35 }
 0x240   : > { %2148 = vpow2.f32 %v1690_v56  ;;  %v791_v62 = vadd.f32 %v790_v61, %v2748_v24  ;;  %v928_v63 = vmul.f32 %v2133_v58, %v2129_v54  ;;  %v2135_v1 = vpop.eup %2134 }
 0x241   : > { %2150 = vrcp.f32 %v883_v59 }
 0x242   : > { %v2137_v2 = vpop.eup %2136  ;;  %v1691_v3 = vmul.f32 -1.442695, %v791_v62  ;;  %v794_v4 = vpop.f32.mrb[26].mxu1  ;;  %1880 = vmatmul.mubr.f32.gmra.mrb[20].mxu0 %v928_v63  ;;  %2152 = vtanh.f32 %v771_v60 }
 0x243   : > { %v2139_v5 = vpop.eup %2138  ;;  %v884_v6 = vadd.f32 1.0, %v2137_v2  ;;  %v796_v8 = vpop.f32.mrb[27].mxu1  ;;  %v795_v39 = vadd.f32 %v794_v4, %v2753_v35  ;;  %v2786_v2 = vstv %s1696_s17  ;;  %v1109_v4 = vadd.s32 8, %v2742_v21 }
 0x244   : > { %2154 = vpow2.f32 %v1691_v3  ;;  %v797_v9 = vadd.f32 %v796_v8, %v2748_v24  ;;  %v929_v10 = vmul.f32 %v2139_v5, %v2135_v1  ;;  %v2141_v11 = vpop.eup %2140  ;;  %v2790_v3 = vadd.s32 %v2786_v2, %v2742_v21  ;;  %v2796_v5 = vld [vmem:[%s3173_s6] ss:$0 sm:$0xff] }
 0x245   : > { %2156 = vrcp.f32 %v884_v6  ;;  %v2800_v8 = vadd.s32 %v2786_v2, %v1109_v4  ;;  %v2921_v4 = vadd.s32 %v2786_v2, %v1118_v0 }
 0x246   : > { %v2143_v12 = vpop.eup %2142  ;;  %v1692_v13 = vmul.f32 -1.442695, %v797_v9  ;;  %v800_v14 = vpop.f32.mrb[28].mxu1  ;;  %1882 = vmatprep.mubr.f32.mxu0 %v929_v10  ;;  %2158 = vtanh.f32 %v777_v7  ;;  %vm1142_vm1 = vcmp.lt.s32.totalorder %v2790_v3, 300  ;;  %v1110_v9 = vadd.s32 16, %v2742_v21 }
 0x247   : > { %v2145_v15 = vpop.eup %2144  ;;  %v885_v16 = vadd.f32 1.0, %v2143_v12  ;;  %v802_v18 = vpop.f32.mrb[29].mxu1  ;;  %vm1143_vm2 = vcmp.lt.s32.totalorder %v2800_v8, 300  ;;  %vm1152_vm14 = vcmp.lt.s32.totalorder %v2921_v4, 300 }
 0x248   : > { %2160 = vpow2.f32 %v1692_v13  ;;  %v803_v19 = vadd.f32 %v802_v18, %v2748_v24  ;;  %v930_v20 = vmul.f32 %v2145_v15, %v2141_v11  ;;  %v2147_v22 = vpop.eup %2146  ;;  %v2812_v13 = vadd.s32 %v2786_v2, %v1110_v9 }
 0x249   : > { %2162 = vrcp.f32 %v885_v16 }
 0x24a   : > { %v2149_v23 = vpop.eup %2148  ;;  %v1693_v25 = vmul.f32 -1.442695, %v803_v19  ;;  %v806_v26 = vpop.f32.mrb[30].mxu1  ;;  %1883 = vmatmul.mubr.f32.gmra.mrb[22].mxu0 %v930_v20  ;;  %2164 = vtanh.f32 %v783_v17  ;;  %vm1144_vm3 = vcmp.lt.s32.totalorder %v2812_v13, 300  ;;  %v1112_v19 = vadd.s32 32, %v2742_v21 }
 0x24b   : > { %v2151_v27 = vpop.eup %2150  ;;  %v886_v28 = vadd.f32 1.0, %v2149_v23  ;;  %v808_v30 = vpop.f32.mrb[31].mxu1  ;;  %v807_v50 = vadd.f32 %v806_v26, %v2753_v35  ;;  %v1113_v26 = vadd.s32 40, %v2742_v21 }
 0x24c   : > { %2166 = vpow2.f32 %v1693_v25  ;;  %v809_v31 = vadd.f32 %v808_v30, %v2748_v24  ;;  %v931_v32 = vmul.f32 %v2151_v27, %v2147_v22  ;;  %v2153_v33 = vpop.eup %2152  ;;  %v801_v24 = vadd.f32 %v800_v14, %v2753_v35 }
 0x24d   : > { %2168 = vrcp.f32 %v886_v28  ;;  %v1111_v14 = vadd.s32 24, %v2742_v21  ;;  %v2834_v25 = vadd.s32 %v2786_v2, %v1112_v19  ;;  %v2844_v30 = vadd.s32 %v2786_v2, %v1113_v26 }
 0x24e   : > { %v2155_v34 = vpop.eup %2154  ;;  %v1694_v36 = vmul.f32 -1.442695, %v809_v31  ;;  %1885 = vmatprep.mubr.f32.mxu0 %v931_v32  ;;  %2170 = vtanh.f32 %v789_v29  ;;  %v1114_v31 = vadd.s32 48, %v2742_v21 }
 0x24f   : > { %v2157_v37 = vpop.eup %2156  ;;  %v887_v38 = vadd.f32 1.0, %v2155_v34  ;;  %v2822_v18 = vadd.s32 %v2786_v2, %v1111_v14  ;;  %vm1146_vm5 = vcmp.lt.s32.totalorder %v2834_v25, 300  ;;  %vm1147_vm6 = vcmp.lt.s32.totalorder %v2844_v30, 300 }
 0x250   : > { %2172 = vpow2.f32 %v1694_v36  ;;  %v932_v40 = vmul.f32 %v2157_v37, %v2153_v33  ;;  %v2159_v41 = vpop.eup %2158  ;;  %v2856_v36 = vadd.s32 %v2786_v2, %v1114_v31  ;;  %v1115_v37 = vadd.s32 56, %v2742_v21 }
 0x251   : > { %2174 = vrcp.f32 %v887_v38  ;;  %vm1145_vm4 = vcmp.lt.s32.totalorder %v2822_v18, 300 }
 0x252   : > { %v2161_v42 = vpop.eup %2160  ;;  %1886 = vmatmul.mubr.f32.gmra.mrb[24].mxu0 %v932_v40  ;;  %2176 = vtanh.f32 %v795_v39  ;;  %v1117_v40 = vadd.s32 72, %v2742_v21  ;;  %vm1148_vm7 = vcmp.lt.s32.totalorder %v2856_v36, 300 }
 0x253   : > { %v2163_v43 = vpop.eup %2162  ;;  %v888_v44 = vadd.f32 1.0, %v2161_v42  ;;  %v2867_v42 = vadd.s32 %v2786_v2, %v1115_v37 }
 0x254   : > { %v933_v45 = vmul.f32 %v2163_v43, %v2159_v41  ;;  %v2165_v46 = vpop.eup %2164  ;;  %v1116_v43 = vadd.s32 64, %v2742_v21 }
 0x255   : > { %2178 = vrcp.f32 %v888_v44  ;;  %vm1149_vm8 = vcmp.lt.s32.totalorder %v2867_v42, 300 }
 0x256   : > { %v2167_v47 = vpop.eup %2166  ;;  %1888 = vmatprep.mubr.f32.mxu0 %v933_v45  ;;  %2180 = vtanh.f32 %v801_v24 }
 0x257   : > { %v2169_v48 = vpop.eup %2168  ;;  %v889_v49 = vadd.f32 1.0, %v2167_v47  ;;  %v2882_v47 = vadd.s32 %v2786_v2, %v1116_v43 }
 0x258   : > { %v934_v51 = vmul.f32 %v2169_v48, %v2165_v46  ;;  %v2171_v52 = vpop.eup %2170  ;;  %v2877_v46 = vadd.s32 %v2786_v2, %v1117_v40 }
 0x259   : > { %2182 = vrcp.f32 %v889_v49  ;;  %vm1150_vm12 = vcmp.lt.s32.totalorder %v2882_v47, 300 }
 0x25a   : > { %v2173_v53 = vpop.eup %2172  ;;  %1889 = vmatmul.mubr.f32.gmra.mrb[26].mxu0 %v934_v51  ;;  %2184 = vtanh.f32 %v807_v50  ;;  %vm3178_vm11 = vcmp.lt.s32.totalorder %v2877_v46, 300  ;;  %v1119_v51 = vadd.s32 88, %v2742_v21 }
 0x25b   : > { %v2175_v54 = vpop.eup %2174  ;;  %v890_v55 = vadd.f32 1.0, %v2173_v53 }
 0x25c   : > { %v935_v56 = vmul.f32 %v2175_v54, %v2171_v52  ;;  %v2177_v57 = vpop.eup %2176 }
 0x25d   : > { %2186 = vrcp.f32 %v890_v55 }
 0x25e   : > { %1891 = vmatprep.mubr.f32.mxu0 %v935_v56 }
 0x25f   : > { %v2179_v58 = vpop.eup %2178 }
 0x260   : > { %v936_v59 = vmul.f32 %v2179_v58, %v2177_v57  ;;  %v2181_v60 = vpop.eup %2180 }
 0x262   : > { %1892 = vmatmul.mubr.f32.gmra.mrb[28].mxu0 %v936_v59 }
 0x263   : > { %v2183_v61 = vpop.eup %2182 }
 0x264   : > { %v937_v62 = vmul.f32 %v2183_v61, %v2181_v60  ;;  %v2185_v35 = vpop.eup %2184 }
 0x266   : > { %1894 = vmatprep.mubr.f32.mxu0 %v937_v62 }
 0x267   : > { %v2187_v63 = vpop.eup %2186 }
 0x268   : > { %v938_v1 = vmul.f32 %v2187_v63, %v2185_v35  ;;  %v2915_v35 = vadd.s32 %v2786_v2, %v1119_v51 }
 0x26a   : > { %1895 = vmatmul.mubr.f32.gmra.mrb[30].mxu0 %v938_v1  ;;  %vm1153_vm13 = vcmp.lt.s32.totalorder %v2915_v35, 300 }
 0x305   : > { %v1875_v6 = vpop.f32.mrb[16].mxu0 }
 0x306   : > { %v1028_v7 = vpop.f32.mrb[17].mxu0  ;;  %v1034_v11 = vadd.f32 %v1875_v6, %v2796_v5 }
 0x307   : > { %v1029_v10 = vadd.f32 %v2796_v5, %v1028_v7 }
 0x308   : > { %v2817_v16 = vsel %vm1143_vm2, %v1034_v11, -1e+30 }
 0x309   : > { %v2807_v12 = vsel %vm1142_vm1, %v1029_v10, -1e+30  ;;  %v1241_v55 = vsel %vm1239_vm10, %v2817_v16, -inf  ;;  %v1121_v10 = vadd.s32 104, %v2742_v21 }
 0x30a   : > { %1206 = vxpose.xlu1.b32.start [1/16] (narrow) %v2807_v12, 8  ;;  %v1240_v57 = vsel %vm1239_vm10, %v2807_v12, -inf }
 0x30d   : > { %v1878_v15 = vpop.f32.mrb[18].mxu0 }
 0x30e   : > { %v1038_v17 = vpop.f32.mrb[19].mxu0  ;;  %1207 = vxpose.xlu1.b32.cont [2/16] (narrow) %v2817_v16, 8  ;;  %v1044_v22 = vadd.f32 %v1878_v15, %v2796_v5 }
 0x30f   : > { %v1039_v20 = vadd.f32 %v2796_v5, %v1038_v17  ;;  %v1120_v17 = vadd.s32 96, %v2742_v21 }
 0x310   : > { %v2839_v28 = vsel %vm1145_vm4, %v1044_v22, -1e+30 }
 0x311   : > { %v2829_v23 = vsel %vm1144_vm3, %v1039_v20, -1e+30  ;;  %v1243_v19 = vsel %vm1239_vm10, %v2839_v28, -inf  ;;  %v2955_v40 = vadd.s32 %v2786_v2, %v1120_v17 }
 0x312   : > { %1208 = vxpose.xlu1.b32.cont [3/16] (narrow) %v2829_v23, 8  ;;  %v1242_v22 = vsel %vm1239_vm10, %v2829_v23, -inf }
 0x313   : > { %vm1154_vm0 = vcmp.lt.s32.totalorder %v2955_v40, 300 }
 0x315   : > { %v1881_v27 = vpop.f32.mrb[20].mxu0 }
 0x316   : > { %v1048_v29 = vpop.f32.mrb[21].mxu0  ;;  %1209 = vxpose.xlu1.b32.cont [4/16] (narrow) %v2839_v28, 8  ;;  %v1054_v33 = vadd.f32 %v1881_v27, %v2796_v5 }
 0x317   : > { %v1049_v32 = vadd.f32 %v2796_v5, %v1048_v29 }
 0x318   : > { %v2861_v39 = vsel %vm1147_vm6, %v1054_v33, -1e+30  ;;  %v2949_v33 = vadd.s32 %v2786_v2, %v1121_v10 }
 0x319   : > { %v2851_v34 = vsel %vm1146_vm5, %v1049_v32, -1e+30  ;;  %v1246_v48 = vsel %vm1239_vm10, %v2861_v39, -inf }
 0x31a   : > { %1210 = vxpose.xlu1.b32.cont [5/16] (narrow) %v2851_v34, 8  ;;  %v1244_v52 = vsel %vm1239_vm10, %v2851_v34, -inf  ;;  %v1247_v58 = vmax.f32 %v1241_v55, %v1246_v48  ;;  %vm1155_vm15 = vcmp.lt.s32.totalorder %v2949_v33, 300 }
 0x31b   : > { %v1245_v60 = vmax.f32 %v1240_v57, %v1244_v52 }
 0x31d   : > { %v1884_v38 = vpop.f32.mrb[22].mxu0 }
 0x31e   : > { %v1058_v41 = vpop.f32.mrb[23].mxu0  ;;  %1211 = vxpose.xlu1.b32.cont [6/16] (narrow) %v2861_v39, 8  ;;  %v1064_v24 = vadd.f32 %v1884_v38, %v2796_v5 }
 0x31f   : > { %v1059_v44 = vadd.f32 %v2796_v5, %v1058_v41 }
 0x320   : > { %v2889_v50 = vsel %vm1149_vm8, %v1064_v24, -1e+30 }
 0x321   : > { %v2874_v45 = vsel %vm1148_vm7, %v1059_v44, -1e+30  ;;  %v1250_v7 = vsel %vm1239_vm10, %v2889_v50, -inf  ;;  %v1123_v44 = vadd.s32 120, %v2742_v21 }
 0x322   : > { %1212 = vxpose.xlu1.b32.cont [7/16] (narrow) %v2874_v45, 8  ;;  %v1248_v11 = vsel %vm1239_vm10, %v2874_v45, -inf  ;;  %v1251_v26 = vmax.f32 %v1243_v19, %v1250_v7 }
 0x323   : > { %v1249_v29 = vmax.f32 %v1242_v22, %v1248_v11  ;;  %v2975_v0 = vadd.s32 %v2786_v2, %v1123_v44 }
 0x325   : > { %v1887_v49 = vpop.f32.mrb[24].mxu0  ;;  %vm1157_vm9 = vcmp.lt.s32.totalorder %v2975_v0, 300 }
 0x326   : > { %v1074_v53 = vadd.f32 %v1887_v49, %v2796_v5  ;;  %v1068_v54 = vpop.f32.mrb[25].mxu0  ;;  %1213 = vxpose.xlu1.b32.cont [8/16] (narrow) %v2889_v50, 8  ;;  %v1122_v49 = vadd.s32 112, %v2742_v21 }
 0x327   : > { %v1069_v56 = vadd.f32 %v2796_v5, %v1068_v54 }
 0x328   : > { %v2906_v59 = vsel %vm3178_vm11, %v1074_v53, -1e+30 }
 0x329   : > { %v2910_v61 = vsel %vm1150_vm12, %v1069_v56, -1e+30  ;;  %v1254_v62 = vsel %vm1239_vm10, %v2906_v59, -inf  ;;  %v2981_v56 = vadd.s32 %v2786_v2, %v1122_v49 }
 0x32a   : > { %v1252_v63 = vsel %vm1239_vm10, %v2910_v61, -inf  ;;  %1214 = vxpose.xlu1.b32.cont [9/16] (narrow) %v2910_v61, 8  ;;  %v1255_v1 = vmax.f32 %v1247_v58, %v1254_v62 }
 0x32b   : > { %v1253_v6 = vmax.f32 %v1245_v60, %v1252_v63  ;;  %vm1156_vm11 = vcmp.lt.s32.totalorder %v2981_v56, 300 }
 0x32d   : > { %v1890_v9 = vpop.f32.mrb[26].mxu0 }
 0x32e   : > { %v1084_v14 = vadd.f32 %v1890_v9, %v2796_v5  ;;  %v1078_v15 = vpop.f32.mrb[27].mxu0  ;;  %1215 = vxpose.xlu1.b32.cont [10/16] (narrow) %v2906_v59, 8 }
 0x32f   : > { %v1079_v20 = vadd.f32 %v2796_v5, %v1078_v15 }
 0x330   : > { %v2940_v27 = vsel %vm1153_vm13, %v1084_v14, -1e+30 }
 0x331   : > { %v2944_v31 = vsel %vm1152_vm14, %v1079_v20, -1e+30  ;;  %v1258_v32 = vsel %vm1239_vm10, %v2940_v27, -inf }
 0x332   : > { %v1256_v37 = vsel %vm1239_vm10, %v2944_v31, -inf  ;;  %1216 = vxpose.xlu1.b32.cont [11/16] (narrow) %v2944_v31, 8  ;;  %v1259_v38 = vmax.f32 %v1251_v26, %v1258_v32 }
 0x333   : > { %v1257_v41 = vmax.f32 %v1249_v29, %v1256_v37 }
 0x335   : > { %v1893_v43 = vpop.f32.mrb[28].mxu0 }
 0x336   : > { %v1094_v24 = vadd.f32 %v1893_v43, %v2796_v5  ;;  %v1088_v48 = vpop.f32.mrb[29].mxu0  ;;  %1217 = vxpose.xlu1.b32.cont [12/16] (narrow) %v2940_v27, 8 }
 0x337   : > { %v1089_v51 = vadd.f32 %v2796_v5, %v1088_v48 }
 0x338   : > { %v2966_v52 = vsel %vm1155_vm15, %v1094_v24, -1e+30 }
 0x339   : > { %v2970_v53 = vsel %vm1154_vm0, %v1089_v51, -1e+30  ;;  %v1262_v54 = vsel %vm1239_vm10, %v2966_v52, -inf }
 0x33a   : > { %v1260_v55 = vsel %vm1239_vm10, %v2970_v53, -inf  ;;  %1218 = vxpose.xlu1.b32.cont [13/16] (narrow) %v2970_v53, 8  ;;  %v1263_v21 = vmax.f32 %v1255_v1, %v1262_v54 }
 0x33b   : > { %v1261_v57 = vmax.f32 %v1253_v6, %v1260_v55 }
 0x33d   : > { %v1896_v58 = vpop.f32.mrb[30].mxu0  ;;  %v1268_v60 = vmax.f32 %v1261_v57, %v1263_v21 }
 0x33e   : > { %v1104_v62 = vadd.f32 %v1896_v58, %v2796_v5  ;;  %v1098_v63 = vpop.f32.mrb[31].mxu0  ;;  %1219 = vxpose.xlu1.b32.cont [14/16] (narrow) %v2966_v52, 8 }
 0x33f   : > { %v1099_v7 = vadd.f32 %v2796_v5, %v1098_v63 }
 0x340   : > { %v1205_v1 = vsel %vm1157_vm9, %v1104_v62, -1e+30 }
 0x341   : > { %v2992_v2 = vsel %vm1156_vm11, %v1099_v7, -1e+30  ;;  %v1266_v6 = vsel %vm1239_vm10, %v1205_v1, -inf }
 0x342   : > { %v1264_v9 = vsel %vm1239_vm10, %v2992_v2, -inf  ;;  %1220 = vxpose.xlu1.b32.cont [15/16] (narrow) %v2992_v2, 8  ;;  %v1267_v10 = vmax.f32 %v1259_v38, %v1266_v6 }
 0x343   : > { %v1265_v11 = vmax.f32 %v1257_v41, %v1264_v9 }
 0x345   : > { %v1269_v14 = vmax.f32 %v1265_v11, %v1267_v10 }
 0x346   : > { %1221 = vxpose.xlu1.b32.end [16/16] (narrow) %v1205_v1, 8 }
 0x347   : > { %v1270_v15 = vmax.f32 %v1268_v60, %v1269_v14 }
 0x349   : > { %v1271_v5 = vrot.slane %v1270_v15, 4 }
 0x34b   : > { %v1272_v17 = vmax.f32 %v1270_v15, %v1271_v5 }
 0x34d   : > { %v1273_v19 = vrot.slane %v1272_v17, 2 }
 0x34f   : > { %v1274_v20 = vmax.f32 %v1272_v17, %v1273_v19 }
 0x351   : > { %v1275_v22 = vrot.slane %v1274_v20, 1 }
 0x353   : > { %v2998_v26 = vmax.f32 %v1274_v20, %v1275_v22 }
 0x355   : > { %v1292_v29 = vsub.f32 %v1205_v1, %v2998_v26  ;;  %v1277_v32 = vsub.f32 %v2807_v12, %v2998_v26  ;;  %v1278_v37 = vsub.f32 %v2817_v16, %v2998_v26  ;;  %v1279_v38 = vsub.f32 %v2829_v23, %v2998_v26 }
 0x356   : > { %v1280_v41 = vsub.f32 %v2839_v28, %v2998_v26  ;;  %v1281_v43 = vsub.f32 %v2851_v34, %v2998_v26  ;;  %v1282_v44 = vsub.f32 %v2861_v39, %v2998_v26  ;;  %v1283_v24 = vsub.f32 %v2874_v45, %v2998_v26 }
 0x357   : > { %v1323_v48 = vmul.f32 1.442695, %v1292_v29  ;;  %v1293_v12 = vmul.f32 1.442695, %v1277_v32  ;;  %v1295_v49 = vmul.f32 1.442695, %v1278_v37  ;;  %v1284_v16 = vsub.f32 %v2889_v50, %v2998_v26 }
 0x358   : > { %v1297_v51 = vmul.f32 1.442695, %v1279_v38  ;;  %v1285_v23 = vsub.f32 %v2910_v61, %v2998_v26  ;;  %v1299_v28 = vmul.f32 1.442695, %v1280_v41  ;;  %v1301_v54 = vmul.f32 1.442695, %v1281_v43 }
 0x359   : > { %2188 = vpow2.f32 %v1323_v48  ;;  %v1303_v34 = vmul.f32 1.442695, %v1282_v44  ;;  %v1286_v39 = vsub.f32 %v2906_v59, %v2998_v26  ;;  %v1287_v45 = vsub.f32 %v2944_v31, %v2998_v26 }
 0x35a   : > { %2190 = vpow2.f32 %v1293_v12  ;;  %v1288_v55 = vsub.f32 %v2940_v27, %v2998_v26  ;;  %v1289_v50 = vsub.f32 %v2970_v53, %v2998_v26  ;;  %v1290_v61 = vsub.f32 %v2966_v52, %v2998_v26 }
 0x35b   : > { %2192 = vpow2.f32 %v1295_v49  ;;  %v1305_v21 = vmul.f32 1.442695, %v1283_v24  ;;  %v1291_v57 = vsub.f32 %v2992_v2, %v2998_v26  ;;  %v1307_v59 = vmul.f32 1.442695, %v1284_v16 }
 0x35c   : > { %2194 = vpow2.f32 %v1297_v51  ;;  %v1309_v58 = vmul.f32 1.442695, %v1285_v23  ;;  %v1311_v31 = vmul.f32 1.442695, %v1286_v39  ;;  %v1313_v60 = vmul.f32 1.442695, %v1287_v45 }
 0x35d   : > { %2196 = vpow2.f32 %v1299_v28  ;;  %v1315_v27 = vmul.f32 1.442695, %v1288_v55  ;;  %v1317_v53 = vmul.f32 1.442695, %v1289_v50  ;;  %v1319_v52 = vmul.f32 1.442695, %v1290_v61 }
 0x35e   : > { %2198 = vpow2.f32 %v1301_v54  ;;  %v1321_v43 = vmul.f32 1.442695, %v1291_v57 }
 0x35f   : > { %2200 = vpow2.f32 %v1303_v34 }
 0x360   : > { %2202 = vpow2.f32 %v1305_v21 }
 0x361   : > { %2204 = vpow2.f32 %v1307_v59 }
 0x362   : > { %2206 = vpow2.f32 %v1309_v58 }
 0x363   : > { %v2189_v62 = vpop.eup %2188  ;;  %2208 = vpow2.f32 %v1311_v31 }
 0x364   : > { %v2191_v63 = vpop.eup %2190  ;;  %2210 = vpow2.f32 %v1313_v60  ;;  %v3033_v7 = vsel %vm1157_vm9, %v2189_v62, 0.0 }
 0x365   : > { %v2193_v1 = vpop.eup %2192  ;;  %v1325_v2 = vsel %vm1142_vm1, %v2191_v63, 0.0  ;;  %2212 = vpow2.f32 %v1315_v27  ;;  %vm3189_vm1 = vcmp.lt.s32.totalorder %v2877_v46, 300 }
 0x366   : > { %v2195_v6 = vpop.eup %2194  ;;  %1382 = vxpose.xlu0.b32.start [1/16] (narrow) %v1325_v2, 8  ;;  %v1341_v9 = vsel %vm1239_vm10, %v1325_v2, 0.0  ;;  %v1326_v10 = vsel %vm1143_vm2, %v2193_v1, 0.0  ;;  %2214 = vpow2.f32 %v1317_v53  ;;  %vm1378_vm2 = vcmask 1040384  }
 0x367   : > { %v2197_v11 = vpop.eup %2196  ;;  %v1342_v14 = vsel %vm1239_vm10, %v1326_v10, 0.0  ;;  %v1327_v0 = vsel %vm1144_vm3, %v2195_v6, 0.0  ;;  %2216 = vpow2.f32 %v1319_v52  ;;  %v1370_v52 = vsel %vm1239_vm10, %v3033_v7, 0.0 }
 0x368   : > { %v2199_v15 = vpop.eup %2198  ;;  %v1343_v5 = vadd.f32 %v1342_v14, %v1341_v9  ;;  %v1328_v3 = vsel %vm1145_vm4, %v2197_v11, 0.0  ;;  %v1344_v19 = vsel %vm1239_vm10, %v1327_v0, 0.0  ;;  %2218 = vpow2.f32 %v1321_v43 }
 0x369   : > { %v2201_v17 = vpop.eup %2200  ;;  %v1329_v22 = vsel %vm1146_vm5, %v2199_v15, 0.0  ;;  %v1346_v32 = vsel %vm1239_vm10, %v1328_v3, 0.0  ;;  %vm1380_vm3 = vcmask 9216  }
 0x36a   : > { %v2203_v20 = vpop.eup %2202  ;;  %1383 = vxpose.xlu0.b32.cont [2/16] (narrow) %v1326_v10, 8  ;;  %v1345_v8 = vadd.f32 %v1344_v19, %v1343_v5  ;;  %v1330_v38 = vsel %vm1147_vm6, %v2201_v17, 0.0  ;;  %v1348_v18 = vsel %vm1239_vm10, %v1329_v22, 0.0 }
 0x36b   : > { %v2205_v29 = vpop.eup %2204  ;;  %v1331_v48 = vsel %vm1148_vm7, %v2203_v20, 0.0  ;;  %v1350_v12 = vsel %vm1239_vm10, %v1330_v38, 0.0 }
 0x36c   : > { %v2207_v13 = vpop.eup %2206  ;;  %v1347_v37 = vadd.f32 %v1346_v32, %v1345_v8  ;;  %v1332_v30 = vsel %vm1149_vm8, %v2205_v29, 0.0  ;;  %v1352_v54 = vsel %vm1239_vm10, %v1331_v48, 0.0 }
 0x36d   : > { %v2209_v41 = vpop.eup %2208  ;;  %v1333_v4 = vsel %vm1150_vm12, %v2207_v13, 0.0  ;;  %v1354_v42 = vsel %vm1239_vm10, %v1332_v30, 0.0 }
 0x36e   : > { %v2211_v44 = vpop.eup %2210  ;;  %1384 = vxpose.xlu0.b32.cont [3/16] (narrow) %v1327_v0, 8  ;;  %v1349_v24 = vadd.f32 %v1348_v18, %v1347_v37  ;;  %v1334_v35 = vsel %vm3189_vm1, %v2209_v41, 0.0  ;;  %v1356_v55 = vsel %vm1239_vm10, %v1333_v4, 0.0 }
 0x36f   : > { %v2213_v25 = vpop.eup %2212  ;;  %v1335_v49 = vsel %vm1152_vm14, %v2211_v44, 0.0  ;;  %v1358_v50 = vsel %vm1239_vm10, %v1334_v35, 0.0 }
 0x370   : > { %v2215_v16 = vpop.eup %2214  ;;  %v1351_v51 = vadd.f32 %v1350_v12, %v1349_v24  ;;  %v1336_v23 = vsel %vm1153_vm13, %v2213_v25, 0.0  ;;  %v1360_v21 = vsel %vm1239_vm10, %v1335_v49, 0.0 }
 0x371   : > { %v2217_v28 = vpop.eup %2216  ;;  %v1337_v36 = vsel %vm1154_vm0, %v2215_v16, 0.0  ;;  %v1362_v57 = vsel %vm1239_vm10, %v1336_v23, 0.0 }
 0x372   : > { %1385 = vxpose.xlu0.b32.cont [4/16] (narrow) %v1328_v3, 8  ;;  %v1353_v34 = vadd.f32 %v1352_v54, %v1351_v51  ;;  %v1338_v39 = vsel %vm1155_vm15, %v2217_v28, 0.0  ;;  %v2219_v33 = vpop.eup %2218  ;;  %v1364_v46 = vsel %vm1239_vm10, %v1337_v36, 0.0 }
 0x373   : > { %v1339_v31 = vsel %vm1156_vm11, %v2219_v33, 0.0  ;;  %v1366_v60 = vsel %vm1239_vm10, %v1338_v39, 0.0 }
 0x374   : > { %v1355_v45 = vadd.f32 %v1354_v42, %v1353_v34  ;;  %v1368_v53 = vsel %vm1239_vm10, %v1339_v31, 0.0 }
 0x376   : > { %1386 = vxpose.xlu0.b32.cont [5/16] (narrow) %v1329_v22, 8  ;;  %v1357_v40 = vadd.f32 %v1356_v55, %v1355_v45 }
 0x378   : > { %v1359_v61 = vadd.f32 %v1358_v50, %v1357_v40 }
 0x37a   : > { %1387 = vxpose.xlu0.b32.cont [6/16] (narrow) %v1330_v38, 8  ;;  %v1361_v47 = vadd.f32 %v1360_v21, %v1359_v61 }
 0x37c   : > { %v1363_v59 = vadd.f32 %v1362_v57, %v1361_v47 }
 0x37e   : > { %1388 = vxpose.xlu0.b32.cont [7/16] (narrow) %v1331_v48, 8  ;;  %v1365_v58 = vadd.f32 %v1364_v46, %v1363_v59 }
 0x380   : > { %v1367_v27 = vadd.f32 %v1366_v60, %v1365_v58 }
 0x382   : > { %1389 = vxpose.xlu0.b32.cont [8/16] (narrow) %v1332_v30, 8  ;;  %v1369_v62 = vadd.f32 %v1368_v53, %v1367_v27 }
 0x384   : > { %v1371_v63 = vadd.f32 %v1370_v52, %v1369_v62 }
 0x386   : > { %1390 = vxpose.xlu0.b32.cont [9/16] (narrow) %v1333_v4, 8  ;;  %v1372_v1 = vrot.slane %v1371_v63, 4 }
 0x388   : > { %v1373_v2 = vadd.f32 %v1372_v1, %v1371_v63 }
 0x38a   : > { %1391 = vxpose.xlu0.b32.cont [10/16] (narrow) %v1334_v35, 8  ;;  %v1374_v56 = vrot.slane %v1373_v2, 2  ;;  %v1222_v6 = vpop.trf.xlu1 }
 0x38b   : > { %1238 = vst [vmem:[%s354_s23] sm:$0x3] %v1222_v6  ;;  %s2256_s23 = scalar_lea.vmem %s2255_s24, 64 }
 0x38c   : > { %v1375_v9 = vadd.f32 %v1374_v56, %v1373_v2  ;;  %p2258_p13 = scmp.lt.s32.totalorder %s2256_s23, %s2250_s25 }
 0x38e   : > { %1392 = vxpose.xlu0.b32.cont [11/16] (narrow) %v1335_v49, 8  ;;  %v1376_v10 = vrot.slane %v1375_v9, 1  ;;  %p2259_p1 = por %p2258_p13, %p2257_p9 }
 0x390   : > { %v1377_v11 = vadd.f32 %v1376_v10, %v1375_v9  ;;  %p2260_p3 = pnand %p2259_p1, %p2253_p8 }
 0x392   : > { %1393 = vxpose.xlu0.b32.cont [12/16] (narrow) %v1336_v23, 8  ;;  %v1379_v14 = vsel %vm1378_vm2, %v2998_v26, %v1377_v11 }
 0x393   : > { %1381 = vst.msk [vmem:[%s372_s14] sm:$0x3] %vm1380_vm3, %v1379_v14 }
 0x396   : > { %1394 = vxpose.xlu0.b32.cont [13/16] (narrow) %v1337_v36, 8 }
 0x39a   : > { %1395 = vxpose.xlu0.b32.cont [14/16] (narrow) %v1338_v39, 8 }
 0x39e   : > { %1396 = vxpose.xlu0.b32.cont [15/16] (narrow) %v1339_v31, 8 }
 0x3a2   : > { %1397 = vxpose.xlu0.b32.end [16/16] (narrow) %v3033_v7, 8 }
 0x3e6   : > { %v1398_v0 = vpop.trf.xlu0 }
 0x3e7   : > { %1930 = vmatmul.mubr.f32.vlgmr.msra.gmra.mrb[32].mxu1 %v1398_v0 }
 0x3e8   : > { %2263 = shalt.err (!%p2260_p3)
}
 0x3e9   : > { %s2264_s28 = scalar_lea.hbm %s1507_s27, 32  ;;  %s2268_s17 = scalar_lea.hbm %s3174_s7, 96 }
 0x3ea   : > { %p2265_p4 = scmp.ne.s32.totalorder %s1507_s27, %s2264_s28  ;;  %p2269_p2 = scmp.lt.u32.totalorder %s1507_s27, %s3174_s7 }
 0x3eb   : > { %p2270_p7 = scmp.lt.u32.totalorder %s2268_s17, %s2264_s28  ;;  %p2272_p10 = scmp.lt.u32.totalorder %s2264_s28, %s1507_s27 }
 0x3ec   : > { %p2266_p5 = pnand %p2265_p4, %p3190_p11 }
 0x3ed   : > { %p2271_p6 = por %p2270_p7, %p2269_p2 }
 0x3ee   : > { %p2267_p0 = pneg %p2266_p5 }
 0x3ef   : > { %p2273_p12 = por %p2272_p10, %p2271_p6 }
 0x3f1   : > { %p2274_p8 = pnand %p2273_p12, %p2267_p0 }
 0x3f3   : > { %2277 = shalt.err (!%p2274_p8)
}
 0x3f4   : > { %2038 = dma.vmem_to_hbm [thread:$0]  (%p3190_p11), %s3092_s0, 32, %s1507_s27, %s1487_s26   ;;  %vm1484_vm4 = vcmask 517120  }
 0x3f5   : > { %s3191_s25 = sshll.u32 %s2511_s29, 1  ;;  %s3192_s19 = sshll.u32 %s2429_s13, 5 }
 0x3f6   : > { %s367_s20 = scalar_lea.vmem [#allocation6], %s3191_s25  ;;  %s3124_s28 = scalar_lea.hbm %s3176_s9, %s3192_s19 }
 0x3f7   : > { %s1525_s24 = sshll.u32 %s367_s20, 4  ;;  %s1496_s14 = scalar_lea.sflag [#allocation7], %s2511_s29  ;;  %s3126_s24 = int_to_ptr.vmem [resolvable:$true] %s1525_s24 }
 0x3f8   : > { %s2278_s0 = scalar_lea.vmem %s3126_s24, 32  ;;  %s2357_s13 = smov [#allocation6]  }
 0x3f9   : > { %p2279_p9 = scmp.ne.s32.totalorder %s3126_s24, %s2278_s0  ;;  %s2282_s27 = sshll.u32 %s2357_s13, 4  ;;  %s2283_s27 = int_to_ptr.vmem [resolvable:$false] %s2282_s27 }
 0x3fa   : > { %s2284_s26 = scalar_lea.vmem %s2283_s27, 64  ;;  %p2285_p3 = scmp.lt.s32.totalorder %s3126_s24, %s2283_s27 }
 0x3fb   : > { %p2280_p13 = pnand %p2279_p9, %p3190_p11  ;;  %p2286_p4 = scmp.lt.s32.totalorder %s2284_s26, %s2278_s0 }
 0x3fd   : > { %p2281_p1 = pneg %p2280_p13  ;;  %p2287_p5 = por %p2286_p4, %p2285_p3 }
 0x3ff   : > { %p2288_p0 = pnand %p2287_p5, %p2281_p1 }
 0x4ba   : > { %v1480_v26 = vpop.f32.mrb[32].mxu1 }
 0x4bb   : > { %1485 = vst.msk [vmem:[%s367_s20] sm:$0x3] %vm1484_vm4, %v1480_v26  ;;  %v1931_v7 = vpop.f32.mrb[33].mxu1 }
 0x4bc   : > { %2291 = shalt.err (!%p2288_p0)
}
 0x4bd   : > { %s2292_s29 = scalar_lea.hbm %s3124_s28, 32  ;;  %s2296_s25 = scalar_lea.hbm %s3176_s9, 96 }
 0x4be   : > { %p2293_p2 = scmp.ne.s32.totalorder %s3124_s28, %s2292_s29  ;;  %p2297_p10 = scmp.lt.u32.totalorder %s3124_s28, %s3176_s9 }
 0x4bf   : > { %p2298_p12 = scmp.lt.u32.totalorder %s2296_s25, %s2292_s29  ;;  %p2300_p9 = scmp.lt.u32.totalorder %s2292_s29, %s3124_s28 }
 0x4c0   : > { %p2294_p7 = pnand %p2293_p2, %p3190_p11 }
 0x4c1   : > { %p2299_p8 = por %p2298_p12, %p2297_p10 }
 0x4c2   : > { %p2295_p6 = pneg %p2294_p7 }
 0x4c3   : > { %p2301_p13 = por %p2300_p9, %p2299_p8 }
 0x4c5   : > { %p2302_p1 = pnand %p2301_p13, %p2295_p6 }
 0x4c7   : > { %2305 = shalt.err (!%p2302_p1)
}
 0x4c8   : > { %2039 = dma.vmem_to_hbm [thread:$0]  (%p3190_p11), %s3126_s24, 32, %s3124_s28, %s1496_s14  }
 0x4c9 PF: > { %p2054_p3 = scmp.ge.s32.totalorder %s2348_s12, 2  ;;  %s1537_s18 = sand.u32 1, %s2336_s30  }
 0x4ca   : > { %p3193_p4 = scmp.ne.s32.totalorder %s3186_s22, 0  ;;  %s1538_s23 = scalar_lea.sflag [#allocation4], %s1537_s18 }
 0x4cc   : > { %p2047_p5 = pnand %p2054_p3, %p3193_p4 }
 0x4ce   : > { %2327 = dma.done.wait (!%p2047_p5), %s1538_s23, 32  }
 0x4cf   : > { %2329 = vsyncadd (!%p2047_p5), %s1538_s23, 4294967264  ;;  %s1554_s0 = scalar_lea.sflag [#allocation7], %s1537_s18 }
 0x4d0   : > { %2331 = dma.done.wait (!%p2047_p5), %s1554_s0, 32  }
 0x4d1   : > { %2333 = vsyncadd (!%p2047_p5), %s1554_s0, 4294967264  ;;  %s3194_s21 = sld [smem:[#allocation11_spill]]  ;;  %p26_p11 = scmp.ge.s32.totalorder %s2433_s15, 5  }
 0x4d2   : > { %s3195_s30 = smov %s2340_s10  ;;  %s3196_s10 = smov %s2344_s11 }
 0x4d3   : > { %s3198_s12 = smov %s2433_s15  ;;  %28 = sbr.rel (!%p26_p11) target bundleno = 9 (0x9), region = 122 }
 0x4d7   : > { %s3197_s11 = smov %s3194_s21 }
 0x4da   :  { %1559 = vsyncpa [#allocation3], 1 }
 0x4db   :  { %1561 = vsyncpa [#allocation3 + $0x1], 1 }
 0x4dc   :  { %1562 = vsyncpa [#allocation4], 1 }
 0x4dd   :  { %1564 = vsyncpa [#allocation4 + $0x1], 1 }
 0x4de   :  { %1565 = vsyncpa [#allocation7], 1 }
 0x4df   :  { %1567 = vsyncpa [#allocation7 + $0x1], 1 }

// kernel: tpu_custom_call.1
= control target key start
LH: loop header
LB: loop body
LE: loop exit
PB: predicated region body
PF: predicated region fallthrough
CT: control target
= control target key end

     0   :  { %s3167_s0 = inlined_call_operand.hbm [shape: f32[384,128], index: 0, kind: input, shape index: {}]   ;;  %s3168_s1 = inlined_call_operand.vmem [shape: f32[128,64], index: 1, kind: input, shape index: {}]   ;;  %s3169_s2 = inlined_call_operand.vmem [shape: f32[1,64], index: 2, kind: input, shape index: {}]   ;;  %s3170_s3 = inlined_call_operand.vmem [shape: f32[64,256], index: 3, kind: input, shape index: {}]   ;;  %s3171_s4 = inlined_call_operand.vmem [shape: f32[1,256], index: 4, kind: input, shape index: {}]   ;;  %s3172_s5 = inlined_call_operand.vmem [shape: f32[128,2], index: 5, kind: input, shape index: {}]   ;;  %s3173_s6 = inlined_call_operand.vmem [shape: f32[1,2], index: 6, kind: input, shape index: {}]   ;;  %s3174_s7 = inlined_call_operand.hbm [shape: f32[2,384], index: 7, kind: output, shape index: {0}]   ;;  %s3175_s8 = inlined_call_operand.vmem [shape: f32[3,2,2], index: 8, kind: output, shape index: {1}]   ;;  %s3176_s9 = inlined_call_operand.hbm [shape: f32[3,2,64], index: 9, kind: output, shape index: {2}]  }
   0x1   :  { %3181 = sst [smem:[#allocation12_spill]] %s3167_s0 }
   0x2   :  { %15 = vsyncpa [#allocation3], 0 }
   0x3   :  { %17 = vsyncpa [#allocation3 + $0x1], 0 }
   0x4   :  { %18 = vsyncpa [#allocation4], 0 }
   0x5   :  { %20 = vsyncpa [#allocation4 + $0x1], 0 }
   0x6   :  { %21 = vsyncpa [#allocation7], 0 }
   0x7   :  { %23 = vsyncpa [#allocation7 + $0x1], 0  ;;  %s2408_s30 = smov 0   ;;  %s2410_s10 = smov 0  }
   0x8   :  { %s2412_s11 = smov 0   ;;  %s2414_s12 = smov 0  }
   0x9 LB: > { %s2429_s13 = sadd.s32 4294967295, %s2348_s12   ;;  %s1651_s14 = sadd.s32 4294967294, %s2348_s12   ;;  %s2348_s12 = sphi %s2414_s12, %s3198_s12   ;;  %s2344_s11 = sphi %s2412_s11, %s3197_s11   ;;  %s2340_s10 = sphi %s2410_s10, %s3196_s10   ;;  %s2336_s30 = sphi %s2408_s30, %s3195_s30  }
   0xa   : > { %s2433_s15 = sadd.s32 1, %s2348_s12   ;;  %s36_s16 = sadd.s32 1, %s2344_s11 }
   0xb   : > { %s33_s17 = ssub.s32 %s2348_s12, %s2433_s15  ;;  %p43_p0 = scmp.ne.s32.totalorder %s2344_s11, %s2340_s10 }
   0xc   : > { %p34_p1 = scmp.eq.s32.totalorder %s33_s17, 0  ;;  %p44_p2 = scmp.eq.s32.totalorder %s2348_s12, 0 }
   0xd   : > { %p49_p3 = scmp.ne.s32.totalorder %s2340_s10, %s2336_s30  ;;  %p50_p4 = scmp.eq.s32.totalorder %s2429_s13, 0 }
   0xe   : > { %s2445_s18 = scalar_select %p34_p1, %s2344_s11, %s36_s16  }
   0xf   : > { %p2447_p5 = por %p44_p2, %p43_p0  ;;  %p2451_p6 = por %p50_p4, %p49_p3 }
  0x10   : > { %3182 = sst [smem:[#allocation11_spill]] %s2445_s18  ;;  %p199_p7 = scmp.eq.s32.totalorder %s2429_s13, 2 }
  0x11   : > { %p205_p8 = scmp.eq.s32.totalorder %s1651_s14, 2  ;;  %p2053_p9 = scmp.lt.s32.totalorder %s2348_s12, 3 }
  0x12   : > { %p2457_p10 = por %p199_p7, %p43_p0  ;;  %s295_s23 = sand.u32 1, %s2344_s11  }
  0x13   : > { %p2461_p11 = por %p205_p8, %p49_p3  ;;  %s1703_s24 = sshll.u32 %s2348_s12, 11 }
  0x14   : > { %s3185_s21 = scalar_select %p2457_p10, 1, 0 }
  0x15   : > { %s3186_s22 = scalar_select %p2461_p11, 1, 0 }
  0x16   : > { %s1654_s25 = sshll.u32 %s295_s23, 7  ;;  %s3187_s0 = sld [smem:[#allocation12_spill]] }
  0x17   : > { %s299_s29 = scalar_lea.vmem [#allocation2], %s1654_s25  ;;  %p2474_p12 = pnand %p2053_p9, %p2447_p5 }
  0x18   : > { %s306_s14 = sshll.u32 %s299_s29, 4  ;;  %s2480_s17 = scalar_lea.sflag [#allocation3], %s295_s23  ;;  %s2478_s14 = int_to_ptr.vmem [resolvable:$true] %s306_s14 }
  0x19   : > { %p2222_p0 = pneg %p2474_p12 }
  0x1c   : > { %s2470_s28 = scalar_lea.hbm %s3187_s0, %s1703_s24  ;;  %s2225_s25 = scalar_lea.hbm %s3187_s0, 6144 }
  0x1d   : > { %s2220_s26 = scalar_lea.hbm %s2470_s28, 2048  ;;  %p2226_p3 = scmp.lt.u32.totalorder %s2470_s28, %s3187_s0 }
  0x1e   : > { %p2221_p13 = scmp.ne.s32.totalorder %s2470_s28, %s2220_s26  ;;  %p2227_p4 = scmp.lt.u32.totalorder %s2225_s25, %s2220_s26 }
  0x1f   : > { %p2229_p7 = scmp.lt.u32.totalorder %s2220_s26, %s2470_s28 }
  0x20   : > { %p2223_p1 = pnand %p2222_p0, %p2221_p13  ;;  %p2228_p5 = por %p2227_p4, %p2226_p3 }
  0x22   : > { %p2224_p2 = pneg %p2223_p1  ;;  %p2230_p8 = por %p2229_p7, %p2228_p5 }
  0x24   : > { %p2231_p9 = pnand %p2230_p8, %p2224_p2 }
  0x26   : > { %2234 = shalt.err (!%p2231_p9)
}
  0x27   : > { %s2235_s23 = scalar_lea.vmem %s2478_s14, 2048  ;;  %s2350_s24 = smov [#allocation2]  }
  0x28   : > { %p2236_p13 = scmp.ne.s32.totalorder %s2478_s14, %s2235_s23  ;;  %s2240_s19 = sshll.u32 %s2350_s24, 4  ;;  %s2241_s19 = int_to_ptr.vmem [resolvable:$false] %s2240_s19 }
  0x29   : > { %s2242_s27 = scalar_lea.vmem %s2241_s19, 4096  ;;  %p2243_p10 = scmp.lt.s32.totalorder %s2478_s14, %s2241_s19 }
  0x2a   : > { %p2238_p1 = pnand %p2236_p13, %p2222_p0  ;;  %p2244_p3 = scmp.lt.s32.totalorder %s2242_s27, %s2235_s23 }
  0x2c   : > { %p2239_p11 = pneg %p2238_p1  ;;  %p2245_p4 = por %p2244_p3, %p2243_p10 }
  0x2e   : > { %p2246_p5 = pnand %p2245_p4, %p2239_p11 }
  0x30   : > { %2249 = shalt.err (!%p2246_p5)
}
  0x31   : > { %s2351_s26 = smov 128   ;;  %s2352_s25 = smov 8  }
  0x32   : > { %2045 = dma.hbm_to_vmem [thread:$0]  (!%p2474_p12), %s2470_s28, 2048, %s2478_s14, %s2480_s17, %s2351_s26, %s2351_s26, %s2352_s25  }
  0x33   : > { %p1657_p0 = scmp.ge.s32.totalorder %s2348_s12, 1  ;;  %p314_p2 = scmp.lt.s32.totalorder %s2348_s12, 4 }
  0x35   : > { %p315_p7 = pnand %p1657_p0, %p314_p2 }
  0x36   : > { %s2511_s29 = sand.u32 (!%p315_p7), 1, %s2340_s10  }
  0x37   : > { %318 = sbr.rel (%p315_p7) target bundleno = 1225 (0x4c9), region = 48  ;;  %s1658_s23 = sshll.u32 (!%p315_p7), %s2511_s29, 7 }
  0x38   : > { %s321_s24 = scalar_lea.sflag (!%p315_p7), [#allocation3], %s2511_s29  ;;  %s2515_s19 = scalar_lea.vmem (!%p315_p7), [#allocation2], %s1658_s23 }
  0x3e   : > { %2323 = dma.done.wait (%p2451_p6), %s321_s24, 2048  }
  0x3f   : > { %2325 = vsyncadd (%p2451_p6), %s321_s24, 4294965248  ;;  %v389_v0 = vld [vmem:[%s3168_s1] sm:$0xff]  ;;  %v390_v1 = vld [vmem:[%s3168_s1 + $0x8] sm:$0xff]  ;;  %vm601_vm0 = vcmask 523264   ;;  %s1696_s17 = sshll.u32 %s2429_s13, 7  ;;  %vm2355_vm9 = vmmov 0  }
  0x40   : > { %v391_v2 = vld [vmem:[%s3168_s1 + $0x10] sm:$0xff]  ;;  %v1932_v3 = vpack.c.bf16 %v390_v1, %v389_v0  ;;  %v392_v4 = vld [vmem:[%s3168_s1 + $0x18] sm:$0xff]  ;;  %v393_v6 = vld [vmem:[%s3168_s1 + $0x20] sm:$0xff]  ;;  %v2353_v0 = vmov 0.0   ;;  %v2354_v1 = vmov 0.0|0.0   ;;  %vm1239_vm10 = vcmask 15360  }
  0x41   : > { %v1936_v5 = vpack.c.bf16 %v392_v4, %v391_v2  ;;  %v394_v7 = vld [vmem:[%s3168_s1 + $0x28] sm:$0xff]  ;;  %v373_v9 = vld [vmem:[%s2515_s19] sm:$0xff]  ;;  %v395_v10 = vld [vmem:[%s3168_s1 + $0x30] sm:$0xff]  ;;  %714 = vmatprep.mubr.f32.mxu1 %v2353_v0  ;;  %p369_p6 = scmp.lt.s32.totalorder %s2429_s13, 2  ;;  %s3179_s18 = sshll.u32 %s2429_s13, 5 }
  0x42   : > { %1933 = vmatprep.subr.bf16.mxu0 %v1932_v3  ;;  %v1940_v8 = vpack.c.bf16 %v394_v7, %v393_v6  ;;  %v396_v11 = vld [vmem:[%s3168_s1 + $0x38] sm:$0xff]  ;;  %1817 = vmatprep.mubr.f32.mxu0 %v373_v9  ;;  %v397_v13 = vld [vmem:[%s3168_s1 + $0x40] sm:$0xff]  ;;  %v398_v14 = vld [vmem:[%s3168_s1 + $0x48] sm:$0xff]  ;;  %s1507_s27 = scalar_lea.hbm %s3174_s7, %s3179_s18  ;;  %s1487_s26 = scalar_lea.sflag [#allocation4], %s2511_s29 }
  0x43   : > { %1935 = vmatpush3.bf16.msra.mxu0 %v1932_v3  ;;  %v1944_v12 = vpack.c.bf16 %v396_v11, %v395_v10  ;;  %v574_v15 = vld [vmem:[%s3170_s3 + $0x8] sm:$0xff]  ;;  %v576_v16 = vld [vmem:[%s3170_s3 + $0x18] sm:$0xff]  ;;  %v573_v17 = vld [vmem:[%s3170_s3] sm:$0xff]  ;;  %v1948_v24 = vpack.c.bf16 %v398_v14, %v397_v13  ;;  %s370_s25 = scalar_select %p369_p6, %s2429_s13, 2 }
  0x44   : > { %1937 = vmatprep.subr.bf16.mxu0 %v1936_v5  ;;  %v575_v18 = vld [vmem:[%s3170_s3 + $0x10] sm:$0xff]  ;;  %v1964_v19 = vpack.c.bf16 %v576_v16, %v574_v15  ;;  %v578_v21 = vld [vmem:[%s3170_s3 + $0x28] sm:$0xff]  ;;  %v580_v22 = vld [vmem:[%s3170_s3 + $0x38] sm:$0xff]  ;;  %p3190_p11 = scmp.ne.s32.totalorder %s3185_s21, 0 }
  0x45   : > { %v1966_v20 = vpack.c.bf16 %v575_v18, %v573_v17  ;;  %v577_v23 = vld [vmem:[%s3170_s3 + $0x20] sm:$0xff]  ;;  %v1968_v25 = vpack.c.bf16 %v580_v22, %v578_v21  ;;  %v579_v26 = vld [vmem:[%s3170_s3 + $0x30] sm:$0xff]  ;;  %v582_v27 = vld [vmem:[%s3170_s3 + $0x48] sm:$0xff]  ;;  %s1661_s20 = sshll.u32 %s370_s25, 1 }
  0x46   : > { %v584_v28 = vld [vmem:[%s3170_s3 + $0x58] sm:$0xff]  ;;  %v399_v29 = vld [vmem:[%s3168_s1 + $0x50] sm:$0xff]  ;;  %1965 = vmatprep.subr.bf16.mxu1 %v1964_v19  ;;  %v1970_v31 = vpack.c.bf16 %v579_v26, %v577_v23  ;;  %v581_v33 = vld [vmem:[%s3170_s3 + $0x40] sm:$0xff]  ;;  %s372_s14 = scalar_lea.vmem %s3175_s8, %s1661_s20  ;;  %s2356_s20 = smov [#allocation5]  }
  0x47   : > { %1939 = vmatpush3.bf16.msra.mxu0 %v1936_v5  ;;  %v400_v30 = vld [vmem:[%s3168_s1 + $0x58] sm:$0xff]  ;;  %1967 = vmatpush1.bf16.msra.mxu1 %v1966_v20  ;;  %v1972_v32 = vpack.c.bf16 %v584_v28, %v582_v27  ;;  %v583_v34 = vld [vmem:[%s3170_s3 + $0x50] sm:$0xff]  ;;  %v401_v36 = vld [vmem:[%s3168_s1 + $0x60] sm:$0xff]  ;;  %s2254_s24 = sshll.u32 %s2356_s20, 4  ;;  %s2255_s24 = int_to_ptr.vmem [resolvable:$false] %s2254_s24 }
  0x48   : > { %1941 = vmatprep.subr.bf16.mxu0 %v1940_v8  ;;  %1969 = vmatprep.subr.bf16.mxu1 %v1968_v25  ;;  %v1952_v35 = vpack.c.bf16 %v400_v30, %v399_v29  ;;  %v402_v37 = vld [vmem:[%s3168_s1 + $0x68] sm:$0xff]  ;;  %v1974_v38 = vpack.c.bf16 %v583_v34, %v581_v33  ;;  %v403_v40 = vld [vmem:[%s3168_s1 + $0x70] sm:$0xff]  ;;  %v404_v41 = vld [vmem:[%s3168_s1 + $0x78] sm:$0xff] }
  0x49   : > { %v1956_v39 = vpack.c.bf16 %v402_v37, %v401_v36  ;;  %v1960_v42 = vpack.c.bf16 %v404_v41, %v403_v40  ;;  %v374_v43 = vld [vmem:[%s2515_s19 + $0x8] sm:$0xff]  ;;  %v375_v44 = vld [vmem:[%s2515_s19 + $0x10] sm:$0xff]  ;;  %v376_v45 = vld [vmem:[%s2515_s19 + $0x18] sm:$0xff] }
  0x4a   : > { %v377_v46 = vld [vmem:[%s2515_s19 + $0x20] sm:$0xff]  ;;  %v378_v47 = vld [vmem:[%s2515_s19 + $0x28] sm:$0xff]  ;;  %v379_v48 = vld [vmem:[%s2515_s19 + $0x30] sm:$0xff] }
  0x4b   : > { %1943 = vmatpush3.bf16.msra.mxu0 %v1940_v8  ;;  %1971 = vmatpush1.bf16.msra.mxu1 %v1970_v31  ;;  %v380_v49 = vld [vmem:[%s2515_s19 + $0x38] sm:$0xff]  ;;  %v381_v50 = vld [vmem:[%s2515_s19 + $0x40] sm:$0xff]  ;;  %v382_v51 = vld [vmem:[%s2515_s19 + $0x48] sm:$0xff] }
  0x4c   : > { %1945 = vmatprep.subr.bf16.mxu0 %v1944_v12  ;;  %1973 = vmatprep.subr.bf16.mxu1 %v1972_v32  ;;  %v383_v52 = vld [vmem:[%s2515_s19 + $0x50] sm:$0xff]  ;;  %v384_v53 = vld [vmem:[%s2515_s19 + $0x58] sm:$0xff]  ;;  %v385_v54 = vld [vmem:[%s2515_s19 + $0x60] sm:$0xff] }
  0x4d   : > { %v386_v55 = vld [vmem:[%s2515_s19 + $0x68] sm:$0xff]  ;;  %v387_v56 = vld [vmem:[%s2515_s19 + $0x70] sm:$0xff]  ;;  %v388_v57 = vld [vmem:[%s2515_s19 + $0x78] sm:$0xff]  ;;  %s3180_s19 = sshll.u32 %s2511_s29, 1 }
  0x4e   : > { %v586_v58 = vld [vmem:[%s3170_s3 + $0x68] sm:$0xff]  ;;  %v588_v59 = vld [vmem:[%s3170_s3 + $0x78] sm:$0xff]  ;;  %v585_v61 = vld [vmem:[%s3170_s3 + $0x60] sm:$0xff]  ;;  %s354_s23 = scalar_lea.vmem [#allocation5], %s3180_s19 }
  0x4f   : > { %1947 = vmatpush3.bf16.msra.mxu0 %v1944_v12  ;;  %1975 = vmatpush1.bf16.msra.mxu1 %v1974_v38  ;;  %v1976_v60 = vpack.c.bf16 %v588_v59, %v586_v58  ;;  %v587_v62 = vld [vmem:[%s3170_s3 + $0x70] sm:$0xff]  ;;  %v2638_v2 = vld [vmem:[%s3169_s2] ss:$0 sm:$0xff]  ;;  %s1509_s0 = sshll.u32 %s354_s23, 4  ;;  %s3092_s0 = int_to_ptr.vmem [resolvable:$true] %s1509_s0 }
  0x50   : > { %1949 = vmatprep.subr.bf16.mxu0 %v1948_v24  ;;  %v1978_v63 = vpack.c.bf16 %v587_v62, %v585_v61  ;;  %v939_v59 = vld [vmem:[%s3172_s5] sm:$0xff]  ;;  %v941_v62 = vld [vmem:[%s3172_s5 + $0x10] sm:$0xff]  ;;  %s2250_s25 = scalar_lea.vmem %s3092_s0, 32  ;;  %p2257_p9 = scmp.lt.s32.totalorder %s3092_s0, %s2255_s24 }
  0x51   : > { %1977 = vmatprep.subr.bf16.mxu1 %v1976_v60  ;;  %v940_v60 = vld [vmem:[%s3172_s5 + $0x8] sm:$0xff]  ;;  %p2251_p10 = scmp.ne.s32.totalorder %s3092_s0, %s2250_s25 }
  0x52   : > { %v1980_v61 = vpack.c.bf16 %v940_v60, %v939_v59 }
  0x53   : > { %1951 = vmatpush3.bf16.msra.mxu0 %v1948_v24  ;;  %1979 = vmatpush1.bf16.msra.mxu1 %v1978_v63  ;;  %v942_v63 = vld [vmem:[%s3172_s5 + $0x18] sm:$0xff]  ;;  %p2252_p12 = pnand %p2251_p10, %p3190_p11 }
  0x54   : > { %1953 = vmatprep.subr.bf16.mxu0 %v1952_v35  ;;  %2012 = vmatprep.subr.bf16.mxu1 %v2354_v1 }
  0x55   : > { %p2253_p8 = pneg %p2252_p12 }
  0x57   : > { %1955 = vmatpush3.bf16.msra.mxu0 %v1952_v35 }
  0x58   : > { %1957 = vmatprep.subr.bf16.mxu0 %v1956_v39 }
  0x5b   : > { %1959 = vmatpush3.bf16.msra.mxu0 %v1956_v39 }
  0x5c   : > { %1961 = vmatprep.subr.bf16.mxu0 %v1960_v42 }
  0x5f   : > { %1963 = vmatpush3.bf16.msra.mxu0 %v1960_v42 }
  0x60   : > { %1981 = vmatprep.subr.bf16.mxu0 %v1980_v61 }
  0x62   : > { %1818 = vmatmul.mubr.f32.vlgmr.msra.gmra.mrb[0].mxu0 %v374_v43 }
  0x63   : > { %1820 = vmatprep.mubr.f32.mxu0 %v375_v44  ;;  %1983 = vmatpush3.bf16.msra.mxu0 %v1980_v61 }
  0x66   : > { %1821 = vmatmul.mubr.f32.gmra.mrb[2].mxu0 %v376_v45 }
  0x67   : > { %1823 = vmatprep.mubr.f32.mxu0 %v377_v46 }
  0x6a   : > { %1824 = vmatmul.mubr.f32.gmra.mrb[4].mxu0 %v378_v47 }
  0x6b   : > { %1826 = vmatprep.mubr.f32.mxu0 %v379_v48 }
  0x6e   : > { %1827 = vmatmul.mubr.f32.gmra.mrb[6].mxu0 %v380_v49 }
  0x6f   : > { %1829 = vmatprep.mubr.f32.mxu0 %v381_v50 }
  0x72   : > { %1830 = vmatmul.mubr.f32.gmra.mrb[8].mxu0 %v382_v51 }
  0x73   : > { %1832 = vmatprep.mubr.f32.mxu0 %v383_v52 }
  0x76   : > { %1833 = vmatmul.mubr.f32.gmra.mrb[10].mxu0 %v384_v53 }
  0x77   : > { %1835 = vmatprep.mubr.f32.mxu0 %v385_v54 }
  0x7a   : > { %1836 = vmatmul.mubr.f32.gmra.mrb[12].mxu0 %v386_v55 }
  0x7b   : > { %1838 = vmatprep.mubr.f32.mxu0 %v387_v56 }
  0x7e   : > { %1839 = vmatmul.mubr.f32.gmra.mrb[14].mxu0 %v388_v57 }
 0x135   : > { %v1819_v3 = vpop.f32.mrb[0].mxu0 }
 0x136   : > { %v484_v4 = vadd.f32 %v1819_v3, %v2638_v2  ;;  %v478_v5 = vpop.f32.mrb[1].mxu0  ;;  %v944_v3 = vld [vmem:[%s3172_s5 + $0x28] sm:$0xff] }
 0x137   : > { %v479_v6 = vadd.f32 %v2638_v2, %v478_v5  ;;  %v945_v5 = vld [vmem:[%s3172_s5 + $0x30] sm:$0xff] }
 0x138   : > { %v558_v7 = vmax.f32 %v484_v4, 0.0 }
 0x139   : > { %v557_v8 = vmax.f32 %v479_v6, 0.0  ;;  %v1822_v9 = vpop.f32.mrb[2].mxu0  ;;  %v946_v6 = vld [vmem:[%s3172_s5 + $0x38] sm:$0xff] }
 0x13a   : > { %v494_v10 = vadd.f32 %v1822_v9, %v2638_v2  ;;  %v488_v11 = vpop.f32.mrb[3].mxu0  ;;  %v948_v9 = vld [vmem:[%s3172_s5 + $0x48] sm:$0xff] }
 0x13b   : > { %v2013_v12 = vpack.c.bf16 %v558_v7, %v557_v8  ;;  %1663 = vmatmul.mubr.msk.f32.vlgmr.msra.gmra.mrb[0].mxu1 %vm601_vm0, %v557_v8  ;;  %v489_v13 = vadd.f32 %v2638_v2, %v488_v11  ;;  %v947_v8 = vld [vmem:[%s3172_s5 + $0x40] sm:$0xff]  ;;  %v949_v11 = vld [vmem:[%s3172_s5 + $0x50] sm:$0xff] }
 0x13c   : > { %v560_v14 = vmax.f32 %v494_v10, 0.0  ;;  %720 = vmatprep.mubr.f32.mxu1 %v2353_v0  ;;  %v1996_v10 = vpack.c.bf16 %v948_v9, %v947_v8 }
 0x13d   : > { %v559_v15 = vmax.f32 %v489_v13, 0.0  ;;  %2014 = vmatpush3.bf16.msra.mxu1 %v2013_v12  ;;  %v1825_v16 = vpop.f32.mrb[4].mxu0  ;;  %v950_v12 = vld [vmem:[%s3172_s5 + $0x58] sm:$0xff] }
 0x13e   : > { %2015 = vmatprep.subr.bf16.mxu1 %v2354_v1  ;;  %v504_v17 = vadd.f32 %v1825_v16, %v2638_v2  ;;  %v498_v18 = vpop.f32.mrb[5].mxu0  ;;  %v2000_v13 = vpack.c.bf16 %v950_v12, %v949_v11 }
 0x13f   : > { %v2016_v19 = vpack.c.bf16 %v560_v14, %v559_v15  ;;  %1664 = vmatmul.mubr.msk.f32.gmra.mrb[2].mxu1 %vm601_vm0, %v558_v7  ;;  %v499_v20 = vadd.f32 %v2638_v2, %v498_v18  ;;  %v1992_v7 = vpack.c.bf16 %v946_v6, %v945_v5  ;;  %v954_v18 = vld [vmem:[%s3172_s5 + $0x78] sm:$0xff] }
 0x140   : > { %726 = vmatprep.mubr.f32.mxu1 %v2353_v0  ;;  %v562_v21 = vmax.f32 %v504_v17, 0.0  ;;  %v953_v17 = vld [vmem:[%s3172_s5 + $0x70] sm:$0xff] }
 0x141   : > { %2017 = vmatpush3.bf16.msra.mxu1 %v2016_v19  ;;  %v561_v22 = vmax.f32 %v499_v20, 0.0  ;;  %v1828_v23 = vpop.f32.mrb[6].mxu0  ;;  %v2008_v19 = vpack.c.bf16 %v954_v18, %v953_v17  ;;  %v591_v20 = vlaneseq }
 0x142   : > { %2018 = vmatprep.subr.bf16.mxu1 %v2354_v1  ;;  %v514_v24 = vadd.f32 %v1828_v23, %v2638_v2  ;;  %v508_v25 = vpop.f32.mrb[7].mxu0  ;;  %v589_v23 = vld [vmem:[%s3171_s4] sm:$0x3] }
 0x143   : > { %1665 = vmatmul.mubr.msk.f32.gmra.mrb[4].mxu1 %vm601_vm0, %v559_v15  ;;  %v2019_v26 = vpack.c.bf16 %v562_v21, %v561_v22  ;;  %v509_v27 = vadd.f32 %v2638_v2, %v508_v25  ;;  %v952_v15 = vld [vmem:[%s3172_s5 + $0x68] sm:$0xff] }
 0x144   : > { %732 = vmatprep.mubr.f32.mxu1 %v2353_v0  ;;  %v564_v28 = vmax.f32 %v514_v24, 0.0 }
 0x145   : > { %2020 = vmatpush3.bf16.msra.mxu1 %v2019_v26  ;;  %v563_v29 = vmax.f32 %v509_v27, 0.0  ;;  %v1831_v30 = vpop.f32.mrb[8].mxu0 }
 0x146   : > { %2021 = vmatprep.subr.bf16.mxu1 %v2354_v1  ;;  %v524_v31 = vadd.f32 %v1831_v30, %v2638_v2  ;;  %v518_v32 = vpop.f32.mrb[9].mxu0 }
 0x147   : > { %1666 = vmatmul.mubr.msk.f32.gmra.mrb[6].mxu1 %vm601_vm0, %v560_v14  ;;  %v2022_v33 = vpack.c.bf16 %v564_v28, %v563_v29  ;;  %v519_v34 = vadd.f32 %v2638_v2, %v518_v32  ;;  %v951_v14 = vld [vmem:[%s3172_s5 + $0x60] sm:$0xff] }
 0x148   : > { %738 = vmatprep.mubr.f32.mxu1 %v2353_v0  ;;  %v566_v35 = vmax.f32 %v524_v31, 0.0  ;;  %v2004_v16 = vpack.c.bf16 %v952_v15, %v951_v14 }
 0x149   : > { %2023 = vmatpush3.bf16.msra.mxu1 %v2022_v33  ;;  %v565_v36 = vmax.f32 %v519_v34, 0.0  ;;  %v1834_v37 = vpop.f32.mrb[10].mxu0 }
 0x14a   : > { %2024 = vmatprep.subr.bf16.mxu1 %v2354_v1  ;;  %v534_v38 = vadd.f32 %v1834_v37, %v2638_v2  ;;  %v528_v39 = vpop.f32.mrb[11].mxu0 }
 0x14b   : > { %1667 = vmatmul.mubr.msk.f32.gmra.mrb[8].mxu1 %vm601_vm0, %v561_v22  ;;  %v2025_v40 = vpack.c.bf16 %v566_v35, %v565_v36  ;;  %v529_v41 = vadd.f32 %v2638_v2, %v528_v39 }
 0x14c   : > { %744 = vmatprep.mubr.f32.mxu1 %v2353_v0  ;;  %v568_v42 = vmax.f32 %v534_v38, 0.0 }
 0x14d   : > { %2026 = vmatpush3.bf16.msra.mxu1 %v2025_v40  ;;  %v567_v43 = vmax.f32 %v529_v41, 0.0  ;;  %v1837_v44 = vpop.f32.mrb[12].mxu0 }
 0x14e   : > { %2027 = vmatprep.subr.bf16.mxu1 %v2354_v1  ;;  %v544_v45 = vadd.f32 %v1837_v44, %v2638_v2  ;;  %v538_v46 = vpop.f32.mrb[13].mxu0 }
 0x14f   : > { %1668 = vmatmul.mubr.msk.f32.gmra.mrb[10].mxu1 %vm601_vm0, %v562_v21  ;;  %v2028_v47 = vpack.c.bf16 %v568_v42, %v567_v43  ;;  %v539_v48 = vadd.f32 %v2638_v2, %v538_v46  ;;  %v2742_v21 = vshrl.u32 %v591_v20, 7 }
 0x150   : > { %750 = vmatprep.mubr.f32.mxu1 %v2353_v0  ;;  %v570_v49 = vmax.f32 %v544_v45, 0.0 }
 0x151   : > { %2029 = vmatpush3.bf16.msra.mxu1 %v2028_v47  ;;  %v569_v50 = vmax.f32 %v539_v48, 0.0  ;;  %v1840_v51 = vpop.f32.mrb[14].mxu0  ;;  %v597_v22 = vsub.s32 1, %v2742_v21  ;;  %v593_v30 = vsub.s32 0, %v2742_v21 }
 0x152   : > { %2030 = vmatprep.subr.bf16.mxu1 %v2354_v1  ;;  %v554_v52 = vadd.f32 %v1840_v51, %v2638_v2  ;;  %v548_v53 = vpop.f32.mrb[15].mxu0 }
 0x153   : > { %1669 = vmatmul.mubr.msk.f32.gmra.mrb[12].mxu1 %vm601_vm0, %v563_v29  ;;  %v2031_v54 = vpack.c.bf16 %v570_v49, %v569_v50  ;;  %v549_v55 = vadd.f32 %v2638_v2, %v548_v53  ;;  %v943_v2 = vld [vmem:[%s3172_s5 + $0x20] sm:$0xff]  ;;  %v2748_v24 = vrot.slane %v589_v23, %v597_v22 }
 0x154   : > { %756 = vmatprep.mubr.f32.mxu1 %v2353_v0  ;;  %v572_v56 = vmax.f32 %v554_v52, 0.0  ;;  %v1988_v4 = vpack.c.bf16 %v944_v3, %v943_v2 }
 0x155   : > { %2032 = vmatpush3.bf16.msra.mxu1 %v2031_v54  ;;  %v571_v57 = vmax.f32 %v549_v55, 0.0 }
 0x156   : > { %2033 = vmatprep.subr.bf16.mxu1 %v2354_v1  ;;  %v1984_v1 = vpack.c.bf16 %v942_v63, %v941_v62 }
 0x157   : > { %1670 = vmatmul.mubr.msk.f32.gmra.mrb[14].mxu1 %vm601_vm0, %v564_v28  ;;  %v2034_v58 = vpack.c.bf16 %v572_v56, %v571_v57 }
 0x158   : > { %762 = vmatprep.mubr.f32.mxu1 %v2353_v0  ;;  %1985 = vmatprep.subr.bf16.mxu0 %v1984_v1 }
 0x159   : > { %2035 = vmatpush3.bf16.msra.mxu1 %v2034_v58  ;;  %1987 = vmatpush3.bf16.msra.mxu0 %v1984_v1 }
 0x15a   : > { %1989 = vmatprep.subr.bf16.mxu0 %v1988_v4 }
 0x15b   : > { %1671 = vmatmul.mubr.msk.f32.gmra.mrb[16].mxu1 %vm601_vm0, %v565_v36 }
 0x15c   : > { %768 = vmatprep.mubr.f32.mxu1 %v2353_v0 }
 0x15d   : > { %1991 = vmatpush3.bf16.msra.mxu0 %v1988_v4 }
 0x15e   : > { %1993 = vmatprep.subr.bf16.mxu0 %v1992_v7 }
 0x15f   : > { %1672 = vmatmul.mubr.msk.f32.gmra.mrb[18].mxu1 %vm601_vm0, %v566_v35  ;;  %v2753_v35 = vrot.slane %v589_v23, %v593_v30 }
 0x160   : > { %774 = vmatprep.mubr.f32.mxu1 %v2353_v0 }
 0x161   : > { %1995 = vmatpush3.bf16.msra.mxu0 %v1992_v7 }
 0x162   : > { %1997 = vmatprep.subr.bf16.mxu0 %v1996_v10 }
 0x163   : > { %1673 = vmatmul.mubr.msk.f32.gmra.mrb[20].mxu1 %vm601_vm0, %v567_v43 }
 0x164   : > { %780 = vmatprep.mubr.f32.mxu1 %v2353_v0 }
 0x165   : > { %1999 = vmatpush3.bf16.msra.mxu0 %v1996_v10 }
 0x166   : > { %2001 = vmatprep.subr.bf16.mxu0 %v2000_v13 }
 0x167   : > { %1674 = vmatmul.mubr.msk.f32.gmra.mrb[22].mxu1 %vm601_vm0, %v568_v42 }
 0x168   : > { %786 = vmatprep.mubr.f32.mxu1 %v2353_v0 }
 0x169   : > { %2003 = vmatpush3.bf16.msra.mxu0 %v2000_v13 }
 0x16a   : > { %2005 = vmatprep.subr.bf16.mxu0 %v2004_v16 }
 0x16b   : > { %1675 = vmatmul.mubr.msk.f32.gmra.mrb[24].mxu1 %vm601_vm0, %v569_v50 }
 0x16c   : > { %792 = vmatprep.mubr.f32.mxu1 %v2353_v0 }
 0x16d   : > { %2007 = vmatpush3.bf16.msra.mxu0 %v2004_v16 }
 0x16e   : > { %2009 = vmatprep.subr.bf16.mxu0 %v2008_v19 }
 0x16f   : > { %1676 = vmatmul.mubr.msk.f32.gmra.mrb[26].mxu1 %vm601_vm0, %v570_v49 }
 0x170   : > { %798 = vmatprep.mubr.f32.mxu1 %v2353_v0 }
 0x171   : > { %2011 = vmatpush3.bf16.msra.mxu0 %v2008_v19 }
 0x173   : > { %1677 = vmatmul.mubr.msk.f32.gmra.mrb[28].mxu1 %vm601_vm0, %v571_v57 }
 0x174   : > { %804 = vmatprep.mubr.f32.mxu1 %v2353_v0 }
 0x177   : > { %1678 = vmatmul.mubr.msk.f32.gmra.mrb[30].mxu1 %vm601_vm0, %v572_v56 }
 0x178   : > { %1929 = vmatprep.mubr.msk.f32.mxu1 %vm2355_vm9, %v2353_v0  ;;  %v1118_v0 = vadd.s32 80, %v2742_v21 }
 0x20e   : > { %v716_v25 = vpop.f32.mrb[0].mxu1 }
 0x20f   : > { %v718_v26 = vpop.f32.mrb[1].mxu1  ;;  %v717_v40 = vadd.f32 %v716_v25, %v2753_v35 }
 0x210   : > { %v719_v27 = vadd.f32 %v718_v26, %v2748_v24 }
 0x212   : > { %v1679_v28 = vmul.f32 -1.442695, %v719_v27  ;;  %v722_v29 = vpop.f32.mrb[2].mxu1 }
 0x213   : > { %v724_v31 = vpop.f32.mrb[3].mxu1  ;;  %v723_v47 = vadd.f32 %v722_v29, %v2753_v35 }
 0x214   : > { %2092 = vpow2.f32 %v1679_v28  ;;  %v725_v32 = vadd.f32 %v724_v31, %v2748_v24 }
 0x216   : > { %v1680_v33 = vmul.f32 -1.442695, %v725_v32  ;;  %v728_v34 = vpop.f32.mrb[4].mxu1 }
 0x217   : > { %v730_v36 = vpop.f32.mrb[5].mxu1  ;;  %v729_v54 = vadd.f32 %v728_v34, %v2753_v35 }
 0x218   : > { %2094 = vpow2.f32 %v1680_v33  ;;  %v731_v37 = vadd.f32 %v730_v36, %v2748_v24 }
 0x21a   : > { %v1681_v38 = vmul.f32 -1.442695, %v731_v37  ;;  %v734_v39 = vpop.f32.mrb[6].mxu1 }
 0x21b   : > { %v736_v41 = vpop.f32.mrb[7].mxu1  ;;  %v735_v61 = vadd.f32 %v734_v39, %v2753_v35 }
 0x21c   : > { %2096 = vpow2.f32 %v1681_v38  ;;  %v737_v42 = vadd.f32 %v736_v41, %v2748_v24 }
 0x21d   : > { %2098 = vtanh.f32 %v717_v40 }
 0x21e   : > { %v2093_v43 = vpop.eup %2092  ;;  %v1682_v44 = vmul.f32 -1.442695, %v737_v42  ;;  %v740_v45 = vpop.f32.mrb[8].mxu1 }
 0x21f   : > { %v875_v46 = vadd.f32 1.0, %v2093_v43  ;;  %v742_v48 = vpop.f32.mrb[9].mxu1  ;;  %v741_v7 = vadd.f32 %v740_v45, %v2753_v35 }
 0x220   : > { %2100 = vpow2.f32 %v1682_v44  ;;  %v743_v49 = vadd.f32 %v742_v48, %v2748_v24 }
 0x221   : > { %2102 = vrcp.f32 %v875_v46 }
 0x222   : > { %v2095_v50 = vpop.eup %2094  ;;  %v1683_v51 = vmul.f32 -1.442695, %v743_v49  ;;  %v746_v52 = vpop.f32.mrb[10].mxu1  ;;  %2104 = vtanh.f32 %v723_v47 }
 0x223   : > { %v876_v53 = vadd.f32 1.0, %v2095_v50  ;;  %v748_v55 = vpop.f32.mrb[11].mxu1  ;;  %v747_v17 = vadd.f32 %v746_v52, %v2753_v35 }
 0x224   : > { %2106 = vpow2.f32 %v1683_v51  ;;  %v749_v56 = vadd.f32 %v748_v55, %v2748_v24 }
 0x225   : > { %2108 = vrcp.f32 %v876_v53 }
 0x226   : > { %v2097_v57 = vpop.eup %2096  ;;  %v1684_v58 = vmul.f32 -1.442695, %v749_v56  ;;  %v752_v59 = vpop.f32.mrb[12].mxu1  ;;  %2110 = vtanh.f32 %v729_v54 }
 0x227   : > { %v877_v60 = vadd.f32 1.0, %v2097_v57  ;;  %v754_v62 = vpop.f32.mrb[13].mxu1  ;;  %v2099_v1 = vpop.eup %2098  ;;  %v753_v29 = vadd.f32 %v752_v59, %v2753_v35 }
 0x228   : > { %2112 = vpow2.f32 %v1684_v58  ;;  %v755_v63 = vadd.f32 %v754_v62, %v2748_v24 }
 0x229   : > { %2114 = vrcp.f32 %v877_v60 }
 0x22a   : > { %v2101_v2 = vpop.eup %2100  ;;  %v1685_v3 = vmul.f32 -1.442695, %v755_v63  ;;  %v758_v4 = vpop.f32.mrb[14].mxu1  ;;  %2116 = vtanh.f32 %v735_v61 }
 0x22b   : > { %v2103_v5 = vpop.eup %2102  ;;  %v878_v6 = vadd.f32 1.0, %v2101_v2  ;;  %v760_v8 = vpop.f32.mrb[15].mxu1  ;;  %v759_v40 = vadd.f32 %v758_v4, %v2753_v35 }
 0x22c   : > { %2118 = vpow2.f32 %v1685_v3  ;;  %v761_v9 = vadd.f32 %v760_v8, %v2748_v24  ;;  %v923_v10 = vmul.f32 %v2103_v5, %v2099_v1  ;;  %v2105_v11 = vpop.eup %2104 }
 0x22d   : > { %2120 = vrcp.f32 %v878_v6 }
 0x22e   : > { %v2107_v12 = vpop.eup %2106  ;;  %v1686_v13 = vmul.f32 -1.442695, %v761_v9  ;;  %v764_v14 = vpop.f32.mrb[16].mxu1  ;;  %1873 = vmatprep.mubr.f32.mxu0 %v923_v10  ;;  %2122 = vtanh.f32 %v741_v7 }
 0x22f   : > { %v2109_v15 = vpop.eup %2108  ;;  %v879_v16 = vadd.f32 1.0, %v2107_v12  ;;  %v766_v18 = vpop.f32.mrb[17].mxu1  ;;  %v765_v50 = vadd.f32 %v764_v14, %v2753_v35 }
 0x230   : > { %2124 = vpow2.f32 %v1686_v13  ;;  %v767_v19 = vadd.f32 %v766_v18, %v2748_v24  ;;  %v924_v20 = vmul.f32 %v2109_v15, %v2105_v11  ;;  %v2111_v22 = vpop.eup %2110 }
 0x231   : > { %2126 = vrcp.f32 %v879_v16 }
 0x232   : > { %v2113_v23 = vpop.eup %2112  ;;  %v1687_v25 = vmul.f32 -1.442695, %v767_v19  ;;  %v770_v26 = vpop.f32.mrb[18].mxu1  ;;  %1874 = vmatmul.mubr.f32.vlgmr.msra.gmra.mrb[16].mxu0 %v924_v20  ;;  %2128 = vtanh.f32 %v747_v17 }
 0x233   : > { %v2115_v27 = vpop.eup %2114  ;;  %v880_v28 = vadd.f32 1.0, %v2113_v23  ;;  %v772_v30 = vpop.f32.mrb[19].mxu1  ;;  %v771_v60 = vadd.f32 %v770_v26, %v2753_v35 }
 0x234   : > { %2130 = vpow2.f32 %v1687_v25  ;;  %v773_v31 = vadd.f32 %v772_v30, %v2748_v24  ;;  %v925_v32 = vmul.f32 %v2115_v27, %v2111_v22  ;;  %v2117_v33 = vpop.eup %2116 }
 0x235   : > { %2132 = vrcp.f32 %v880_v28 }
 0x236   : > { %v2119_v34 = vpop.eup %2118  ;;  %v1688_v36 = vmul.f32 -1.442695, %v773_v31  ;;  %v776_v37 = vpop.f32.mrb[20].mxu1  ;;  %1876 = vmatprep.mubr.f32.mxu0 %v925_v32  ;;  %2134 = vtanh.f32 %v753_v29 }
 0x237   : > { %v2121_v38 = vpop.eup %2120  ;;  %v881_v39 = vadd.f32 1.0, %v2119_v34  ;;  %v778_v41 = vpop.f32.mrb[21].mxu1  ;;  %v777_v7 = vadd.f32 %v776_v37, %v2753_v35 }
 0x238   : > { %2136 = vpow2.f32 %v1688_v36  ;;  %v779_v42 = vadd.f32 %v778_v41, %v2748_v24  ;;  %v926_v43 = vmul.f32 %v2121_v38, %v2117_v33  ;;  %v2123_v44 = vpop.eup %2122 }
 0x239   : > { %2138 = vrcp.f32 %v881_v39 }
 0x23a   : > { %v2125_v45 = vpop.eup %2124  ;;  %v1689_v46 = vmul.f32 -1.442695, %v779_v42  ;;  %v782_v47 = vpop.f32.mrb[22].mxu1  ;;  %1877 = vmatmul.mubr.f32.gmra.mrb[18].mxu0 %v926_v43  ;;  %2140 = vtanh.f32 %v759_v40 }
 0x23b   : > { %v2127_v48 = vpop.eup %2126  ;;  %v882_v49 = vadd.f32 1.0, %v2125_v45  ;;  %v784_v51 = vpop.f32.mrb[23].mxu1  ;;  %v783_v17 = vadd.f32 %v782_v47, %v2753_v35 }
 0x23c   : > { %2142 = vpow2.f32 %v1689_v46  ;;  %v785_v52 = vadd.f32 %v784_v51, %v2748_v24  ;;  %v927_v53 = vmul.f32 %v2127_v48, %v2123_v44  ;;  %v2129_v54 = vpop.eup %2128 }
 0x23d   : > { %2144 = vrcp.f32 %v882_v49 }
 0x23e   : > { %v2131_v55 = vpop.eup %2130  ;;  %v1690_v56 = vmul.f32 -1.442695, %v785_v52  ;;  %v788_v57 = vpop.f32.mrb[24].mxu1  ;;  %1879 = vmatprep.mubr.f32.mxu0 %v927_v53  ;;  %2146 = vtanh.f32 %v765_v50 }
 0x23f   : > { %v2133_v58 = vpop.eup %2132  ;;  %v883_v59 = vadd.f32 1.0, %v2131_v55  ;;  %v790_v61 = vpop.f32.mrb[25].mxu1  ;;  %v789_v29 = vadd.f32 %v788_v57, %v2753_v35 }
 0x240   : > { %2148 = vpow2.f32 %v1690_v56  ;;  %v791_v62 = vadd.f32 %v790_v61, %v2748_v24  ;;  %v928_v63 = vmul.f32 %v2133_v58, %v2129_v54  ;;  %v2135_v1 = vpop.eup %2134 }
 0x241   : > { %2150 = vrcp.f32 %v883_v59 }
 0x242   : > { %v2137_v2 = vpop.eup %2136  ;;  %v1691_v3 = vmul.f32 -1.442695, %v791_v62  ;;  %v794_v4 = vpop.f32.mrb[26].mxu1  ;;  %1880 = vmatmul.mubr.f32.gmra.mrb[20].mxu0 %v928_v63  ;;  %2152 = vtanh.f32 %v771_v60 }
 0x243   : > { %v2139_v5 = vpop.eup %2138  ;;  %v884_v6 = vadd.f32 1.0, %v2137_v2  ;;  %v796_v8 = vpop.f32.mrb[27].mxu1  ;;  %v795_v39 = vadd.f32 %v794_v4, %v2753_v35  ;;  %v2786_v2 = vstv %s1696_s17  ;;  %v1109_v4 = vadd.s32 8, %v2742_v21 }
 0x244   : > { %2154 = vpow2.f32 %v1691_v3  ;;  %v797_v9 = vadd.f32 %v796_v8, %v2748_v24  ;;  %v929_v10 = vmul.f32 %v2139_v5, %v2135_v1  ;;  %v2141_v11 = vpop.eup %2140  ;;  %v2790_v3 = vadd.s32 %v2786_v2, %v2742_v21  ;;  %v2796_v5 = vld [vmem:[%s3173_s6] ss:$0 sm:$0xff] }
 0x245   : > { %2156 = vrcp.f32 %v884_v6  ;;  %v2800_v8 = vadd.s32 %v2786_v2, %v1109_v4  ;;  %v2921_v4 = vadd.s32 %v2786_v2, %v1118_v0 }
 0x246   : > { %v2143_v12 = vpop.eup %2142  ;;  %v1692_v13 = vmul.f32 -1.442695, %v797_v9  ;;  %v800_v14 = vpop.f32.mrb[28].mxu1  ;;  %1882 = vmatprep.mubr.f32.mxu0 %v929_v10  ;;  %2158 = vtanh.f32 %v777_v7  ;;  %vm1142_vm1 = vcmp.lt.s32.totalorder %v2790_v3, 300  ;;  %v1110_v9 = vadd.s32 16, %v2742_v21 }
 0x247   : > { %v2145_v15 = vpop.eup %2144  ;;  %v885_v16 = vadd.f32 1.0, %v2143_v12  ;;  %v802_v18 = vpop.f32.mrb[29].mxu1  ;;  %vm1143_vm2 = vcmp.lt.s32.totalorder %v2800_v8, 300  ;;  %vm1152_vm14 = vcmp.lt.s32.totalorder %v2921_v4, 300 }
 0x248   : > { %2160 = vpow2.f32 %v1692_v13  ;;  %v803_v19 = vadd.f32 %v802_v18, %v2748_v24  ;;  %v930_v20 = vmul.f32 %v2145_v15, %v2141_v11  ;;  %v2147_v22 = vpop.eup %2146  ;;  %v2812_v13 = vadd.s32 %v2786_v2, %v1110_v9 }
 0x249   : > { %2162 = vrcp.f32 %v885_v16 }
 0x24a   : > { %v2149_v23 = vpop.eup %2148  ;;  %v1693_v25 = vmul.f32 -1.442695, %v803_v19  ;;  %v806_v26 = vpop.f32.mrb[30].mxu1  ;;  %1883 = vmatmul.mubr.f32.gmra.mrb[22].mxu0 %v930_v20  ;;  %2164 = vtanh.f32 %v783_v17  ;;  %vm1144_vm3 = vcmp.lt.s32.totalorder %v2812_v13, 300  ;;  %v1112_v19 = vadd.s32 32, %v2742_v21 }
 0x24b   : > { %v2151_v27 = vpop.eup %2150  ;;  %v886_v28 = vadd.f32 1.0, %v2149_v23  ;;  %v808_v30 = vpop.f32.mrb[31].mxu1  ;;  %v807_v50 = vadd.f32 %v806_v26, %v2753_v35  ;;  %v1113_v26 = vadd.s32 40, %v2742_v21 }
 0x24c   : > { %2166 = vpow2.f32 %v1693_v25  ;;  %v809_v31 = vadd.f32 %v808_v30, %v2748_v24  ;;  %v931_v32 = vmul.f32 %v2151_v27, %v2147_v22  ;;  %v2153_v33 = vpop.eup %2152  ;;  %v801_v24 = vadd.f32 %v800_v14, %v2753_v35 }
 0x24d   : > { %2168 = vrcp.f32 %v886_v28  ;;  %v1111_v14 = vadd.s32 24, %v2742_v21  ;;  %v2834_v25 = vadd.s32 %v2786_v2, %v1112_v19  ;;  %v2844_v30 = vadd.s32 %v2786_v2, %v1113_v26 }
 0x24e   : > { %v2155_v34 = vpop.eup %2154  ;;  %v1694_v36 = vmul.f32 -1.442695, %v809_v31  ;;  %1885 = vmatprep.mubr.f32.mxu0 %v931_v32  ;;  %2170 = vtanh.f32 %v789_v29  ;;  %v1114_v31 = vadd.s32 48, %v2742_v21 }
 0x24f   : > { %v2157_v37 = vpop.eup %2156  ;;  %v887_v38 = vadd.f32 1.0, %v2155_v34  ;;  %v2822_v18 = vadd.s32 %v2786_v2, %v1111_v14  ;;  %vm1146_vm5 = vcmp.lt.s32.totalorder %v2834_v25, 300  ;;  %vm1147_vm6 = vcmp.lt.s32.totalorder %v2844_v30, 300 }
 0x250   : > { %2172 = vpow2.f32 %v1694_v36  ;;  %v932_v40 = vmul.f32 %v2157_v37, %v2153_v33  ;;  %v2159_v41 = vpop.eup %2158  ;;  %v2856_v36 = vadd.s32 %v2786_v2, %v1114_v31  ;;  %v1115_v37 = vadd.s32 56, %v2742_v21 }
 0x251   : > { %2174 = vrcp.f32 %v887_v38  ;;  %vm1145_vm4 = vcmp.lt.s32.totalorder %v2822_v18, 300 }
 0x252   : > { %v2161_v42 = vpop.eup %2160  ;;  %1886 = vmatmul.mubr.f32.gmra.mrb[24].mxu0 %v932_v40  ;;  %2176 = vtanh.f32 %v795_v39  ;;  %v1117_v40 = vadd.s32 72, %v2742_v21  ;;  %vm1148_vm7 = vcmp.lt.s32.totalorder %v2856_v36, 300 }
 0x253   : > { %v2163_v43 = vpop.eup %2162  ;;  %v888_v44 = vadd.f32 1.0, %v2161_v42  ;;  %v2867_v42 = vadd.s32 %v2786_v2, %v1115_v37 }
 0x254   : > { %v933_v45 = vmul.f32 %v2163_v43, %v2159_v41  ;;  %v2165_v46 = vpop.eup %2164  ;;  %v1116_v43 = vadd.s32 64, %v2742_v21 }
 0x255   : > { %2178 = vrcp.f32 %v888_v44  ;;  %vm1149_vm8 = vcmp.lt.s32.totalorder %v2867_v42, 300 }
 0x256   : > { %v2167_v47 = vpop.eup %2166  ;;  %1888 = vmatprep.mubr.f32.mxu0 %v933_v45  ;;  %2180 = vtanh.f32 %v801_v24 }
 0x257   : > { %v2169_v48 = vpop.eup %2168  ;;  %v889_v49 = vadd.f32 1.0, %v2167_v47  ;;  %v2882_v47 = vadd.s32 %v2786_v2, %v1116_v43 }
 0x258   : > { %v934_v51 = vmul.f32 %v2169_v48, %v2165_v46  ;;  %v2171_v52 = vpop.eup %2170  ;;  %v2877_v46 = vadd.s32 %v2786_v2, %v1117_v40 }
 0x259   : > { %2182 = vrcp.f32 %v889_v49  ;;  %vm1150_vm12 = vcmp.lt.s32.totalorder %v2882_v47, 300 }
 0x25a   : > { %v2173_v53 = vpop.eup %2172  ;;  %1889 = vmatmul.mubr.f32.gmra.mrb[26].mxu0 %v934_v51  ;;  %2184 = vtanh.f32 %v807_v50  ;;  %vm3178_vm11 = vcmp.lt.s32.totalorder %v2877_v46, 300  ;;  %v1119_v51 = vadd.s32 88, %v2742_v21 }
 0x25b   : > { %v2175_v54 = vpop.eup %2174  ;;  %v890_v55 = vadd.f32 1.0, %v2173_v53 }
 0x25c   : > { %v935_v56 = vmul.f32 %v2175_v54, %v2171_v52  ;;  %v2177_v57 = vpop.eup %2176 }
 0x25d   : > { %2186 = vrcp.f32 %v890_v55 }
 0x25e   : > { %1891 = vmatprep.mubr.f32.mxu0 %v935_v56 }
 0x25f   : > { %v2179_v58 = vpop.eup %2178 }
 0x260   : > { %v936_v59 = vmul.f32 %v2179_v58, %v2177_v57  ;;  %v2181_v60 = vpop.eup %2180 }
 0x262   : > { %1892 = vmatmul.mubr.f32.gmra.mrb[28].mxu0 %v936_v59 }
 0x263   : > { %v2183_v61 = vpop.eup %2182 }
 0x264   : > { %v937_v62 = vmul.f32 %v2183_v61, %v2181_v60  ;;  %v2185_v35 = vpop.eup %2184 }
 0x266   : > { %1894 = vmatprep.mubr.f32.mxu0 %v937_v62 }
 0x267   : > { %v2187_v63 = vpop.eup %2186 }
 0x268   : > { %v938_v1 = vmul.f32 %v2187_v63, %v2185_v35  ;;  %v2915_v35 = vadd.s32 %v2786_v2, %v1119_v51 }
 0x26a   : > { %1895 = vmatmul.mubr.f32.gmra.mrb[30].mxu0 %v938_v1  ;;  %vm1153_vm13 = vcmp.lt.s32.totalorder %v2915_v35, 300 }
 0x305   : > { %v1875_v6 = vpop.f32.mrb[16].mxu0 }
 0x306   : > { %v1028_v7 = vpop.f32.mrb[17].mxu0  ;;  %v1034_v11 = vadd.f32 %v1875_v6, %v2796_v5 }
 0x307   : > { %v1029_v10 = vadd.f32 %v2796_v5, %v1028_v7 }
 0x308   : > { %v2817_v16 = vsel %vm1143_vm2, %v1034_v11, -1e+30 }
 0x309   : > { %v2807_v12 = vsel %vm1142_vm1, %v1029_v10, -1e+30  ;;  %v1241_v55 = vsel %vm1239_vm10, %v2817_v16, -inf  ;;  %v1121_v10 = vadd.s32 104, %v2742_v21 }
 0x30a   : > { %1206 = vxpose.xlu1.b32.start [1/16] (narrow) %v2807_v12, 8  ;;  %v1240_v57 = vsel %vm1239_vm10, %v2807_v12, -inf }
 0x30d   : > { %v1878_v15 = vpop.f32.mrb[18].mxu0 }
 0x30e   : > { %v1038_v17 = vpop.f32.mrb[19].mxu0  ;;  %1207 = vxpose.xlu1.b32.cont [2/16] (narrow) %v2817_v16, 8  ;;  %v1044_v22 = vadd.f32 %v1878_v15, %v2796_v5 }
 0x30f   : > { %v1039_v20 = vadd.f32 %v2796_v5, %v1038_v17  ;;  %v1120_v17 = vadd.s32 96, %v2742_v21 }
 0x310   : > { %v2839_v28 = vsel %vm1145_vm4, %v1044_v22, -1e+30 }
 0x311   : > { %v2829_v23 = vsel %vm1144_vm3, %v1039_v20, -1e+30  ;;  %v1243_v19 = vsel %vm1239_vm10, %v2839_v28, -inf  ;;  %v2955_v40 = vadd.s32 %v2786_v2, %v1120_v17 }
 0x312   : > { %1208 = vxpose.xlu1.b32.cont [3/16] (narrow) %v2829_v23, 8  ;;  %v1242_v22 = vsel %vm1239_vm10, %v2829_v23, -inf }
 0x313   : > { %vm1154_vm0 = vcmp.lt.s32.totalorder %v2955_v40, 300 }
 0x315   : > { %v1881_v27 = vpop.f32.mrb[20].mxu0 }
 0x316   : > { %v1048_v29 = vpop.f32.mrb[21].mxu0  ;;  %1209 = vxpose.xlu1.b32.cont [4/16] (narrow) %v2839_v28, 8  ;;  %v1054_v33 = vadd.f32 %v1881_v27, %v2796_v5 }
 0x317   : > { %v1049_v32 = vadd.f32 %v2796_v5, %v1048_v29 }
 0x318   : > { %v2861_v39 = vsel %vm1147_vm6, %v1054_v33, -1e+30  ;;  %v2949_v33 = vadd.s32 %v2786_v2, %v1121_v10 }
 0x319   : > { %v2851_v34 = vsel %vm1146_vm5, %v1049_v32, -1e+30  ;;  %v1246_v48 = vsel %vm1239_vm10, %v2861_v39, -inf }
 0x31a   : > { %1210 = vxpose.xlu1.b32.cont [5/16] (narrow) %v2851_v34, 8  ;;  %v1244_v52 = vsel %vm1239_vm10, %v2851_v34, -inf  ;;  %v1247_v58 = vmax.f32 %v1241_v55, %v1246_v48  ;;  %vm1155_vm15 = vcmp.lt.s32.totalorder %v2949_v33, 300 }
 0x31b   : > { %v1245_v60 = vmax.f32 %v1240_v57, %v1244_v52 }
 0x31d   : > { %v1884_v38 = vpop.f32.mrb[22].mxu0 }
 0x31e   : > { %v1058_v41 = vpop.f32.mrb[23].mxu0  ;;  %1211 = vxpose.xlu1.b32.cont [6/16] (narrow) %v2861_v39, 8  ;;  %v1064_v24 = vadd.f32 %v1884_v38, %v2796_v5 }
 0x31f   : > { %v1059_v44 = vadd.f32 %v2796_v5, %v1058_v41 }
 0x320   : > { %v2889_v50 = vsel %vm1149_vm8, %v1064_v24, -1e+30 }
 0x321   : > { %v2874_v45 = vsel %vm1148_vm7, %v1059_v44, -1e+30  ;;  %v1250_v7 = vsel %vm1239_vm10, %v2889_v50, -inf  ;;  %v1123_v44 = vadd.s32 120, %v2742_v21 }
 0x322   : > { %1212 = vxpose.xlu1.b32.cont [7/16] (narrow) %v2874_v45, 8  ;;  %v1248_v11 = vsel %vm1239_vm10, %v2874_v45, -inf  ;;  %v1251_v26 = vmax.f32 %v1243_v19, %v1250_v7 }
 0x323   : > { %v1249_v29 = vmax.f32 %v1242_v22, %v1248_v11  ;;  %v2975_v0 = vadd.s32 %v2786_v2, %v1123_v44 }
 0x325   : > { %v1887_v49 = vpop.f32.mrb[24].mxu0  ;;  %vm1157_vm9 = vcmp.lt.s32.totalorder %v2975_v0, 300 }
 0x326   : > { %v1074_v53 = vadd.f32 %v1887_v49, %v2796_v5  ;;  %v1068_v54 = vpop.f32.mrb[25].mxu0  ;;  %1213 = vxpose.xlu1.b32.cont [8/16] (narrow) %v2889_v50, 8  ;;  %v1122_v49 = vadd.s32 112, %v2742_v21 }
 0x327   : > { %v1069_v56 = vadd.f32 %v2796_v5, %v1068_v54 }
 0x328   : > { %v2906_v59 = vsel %vm3178_vm11, %v1074_v53, -1e+30 }
 0x329   : > { %v2910_v61 = vsel %vm1150_vm12, %v1069_v56, -1e+30  ;;  %v1254_v62 = vsel %vm1239_vm10, %v2906_v59, -inf  ;;  %v2981_v56 = vadd.s32 %v2786_v2, %v1122_v49 }
 0x32a   : > { %v1252_v63 = vsel %vm1239_vm10, %v2910_v61, -inf  ;;  %1214 = vxpose.xlu1.b32.cont [9/16] (narrow) %v2910_v61, 8  ;;  %v1255_v1 = vmax.f32 %v1247_v58, %v1254_v62 }
 0x32b   : > { %v1253_v6 = vmax.f32 %v1245_v60, %v1252_v63  ;;  %vm1156_vm11 = vcmp.lt.s32.totalorder %v2981_v56, 300 }
 0x32d   : > { %v1890_v9 = vpop.f32.mrb[26].mxu0 }
 0x32e   : > { %v1084_v14 = vadd.f32 %v1890_v9, %v2796_v5  ;;  %v1078_v15 = vpop.f32.mrb[27].mxu0  ;;  %1215 = vxpose.xlu1.b32.cont [10/16] (narrow) %v2906_v59, 8 }
 0x32f   : > { %v1079_v20 = vadd.f32 %v2796_v5, %v1078_v15 }
 0x330   : > { %v2940_v27 = vsel %vm1153_vm13, %v1084_v14, -1e+30 }
 0x331   : > { %v2944_v31 = vsel %vm1152_vm14, %v1079_v20, -1e+30  ;;  %v1258_v32 = vsel %vm1239_vm10, %v2940_v27, -inf }
 0x332   : > { %v1256_v37 = vsel %vm1239_vm10, %v2944_v31, -inf  ;;  %1216 = vxpose.xlu1.b32.cont [11/16] (narrow) %v2944_v31, 8  ;;  %v1259_v38 = vmax.f32 %v1251_v26, %v1258_v32 }
 0x333   : > { %v1257_v41 = vmax.f32 %v1249_v29, %v1256_v37 }
 0x335   : > { %v1893_v43 = vpop.f32.mrb[28].mxu0 }
 0x336   : > { %v1094_v24 = vadd.f32 %v1893_v43, %v2796_v5  ;;  %v1088_v48 = vpop.f32.mrb[29].mxu0  ;;  %1217 = vxpose.xlu1.b32.cont [12/16] (narrow) %v2940_v27, 8 }
 0x337   : > { %v1089_v51 = vadd.f32 %v2796_v5, %v1088_v48 }
 0x338   : > { %v2966_v52 = vsel %vm1155_vm15, %v1094_v24, -1e+30 }
 0x339   : > { %v2970_v53 = vsel %vm1154_vm0, %v1089_v51, -1e+30  ;;  %v1262_v54 = vsel %vm1239_vm10, %v2966_v52, -inf }
 0x33a   : > { %v1260_v55 = vsel %vm1239_vm10, %v2970_v53, -inf  ;;  %1218 = vxpose.xlu1.b32.cont [13/16] (narrow) %v2970_v53, 8  ;;  %v1263_v21 = vmax.f32 %v1255_v1, %v1262_v54 }
 0x33b   : > { %v1261_v57 = vmax.f32 %v1253_v6, %v1260_v55 }
 0x33d   : > { %v1896_v58 = vpop.f32.mrb[30].mxu0  ;;  %v1268_v60 = vmax.f32 %v1261_v57, %v1263_v21 }
 0x33e   : > { %v1104_v62 = vadd.f32 %v1896_v58, %v2796_v5  ;;  %v1098_v63 = vpop.f32.mrb[31].mxu0  ;;  %1219 = vxpose.xlu1.b32.cont [14/16] (narrow) %v2966_v52, 8 }
 0x33f   : > { %v1099_v7 = vadd.f32 %v2796_v5, %v1098_v63 }
 0x340   : > { %v1205_v1 = vsel %vm1157_vm9, %v1104_v62, -1e+30 }
 0x341   : > { %v2992_v2 = vsel %vm1156_vm11, %v1099_v7, -1e+30  ;;  %v1266_v6 = vsel %vm1239_vm10, %v1205_v1, -inf }
 0x342   : > { %v1264_v9 = vsel %vm1239_vm10, %v2992_v2, -inf  ;;  %1220 = vxpose.xlu1.b32.cont [15/16] (narrow) %v2992_v2, 8  ;;  %v1267_v10 = vmax.f32 %v1259_v38, %v1266_v6 }
 0x343   : > { %v1265_v11 = vmax.f32 %v1257_v41, %v1264_v9 }
 0x345   : > { %v1269_v14 = vmax.f32 %v1265_v11, %v1267_v10 }
 0x346   : > { %1221 = vxpose.xlu1.b32.end [16/16] (narrow) %v1205_v1, 8 }
 0x347   : > { %v1270_v15 = vmax.f32 %v1268_v60, %v1269_v14 }
 0x349   : > { %v1271_v5 = vrot.slane %v1270_v15, 4 }
 0x34b   : > { %v1272_v17 = vmax.f32 %v1270_v15, %v1271_v5 }
 0x34d   : > { %v1273_v19 = vrot.slane %v1272_v17, 2 }
 0x34f   : > { %v1274_v20 = vmax.f32 %v1272_v17, %v1273_v19 }
 0x351   : > { %v1275_v22 = vrot.slane %v1274_v20, 1 }
 0x353   : > { %v2998_v26 = vmax.f32 %v1274_v20, %v1275_v22 }
 0x355   : > { %v1292_v29 = vsub.f32 %v1205_v1, %v2998_v26  ;;  %v1277_v32 = vsub.f32 %v2807_v12, %v2998_v26  ;;  %v1278_v37 = vsub.f32 %v2817_v16, %v2998_v26  ;;  %v1279_v38 = vsub.f32 %v2829_v23, %v2998_v26 }
 0x356   : > { %v1280_v41 = vsub.f32 %v2839_v28, %v2998_v26  ;;  %v1281_v43 = vsub.f32 %v2851_v34, %v2998_v26  ;;  %v1282_v44 = vsub.f32 %v2861_v39, %v2998_v26  ;;  %v1283_v24 = vsub.f32 %v2874_v45, %v2998_v26 }
 0x357   : > { %v1323_v48 = vmul.f32 1.442695, %v1292_v29  ;;  %v1293_v12 = vmul.f32 1.442695, %v1277_v32  ;;  %v1295_v49 = vmul.f32 1.442695, %v1278_v37  ;;  %v1284_v16 = vsub.f32 %v2889_v50, %v2998_v26 }
 0x358   : > { %v1297_v51 = vmul.f32 1.442695, %v1279_v38  ;;  %v1285_v23 = vsub.f32 %v2910_v61, %v2998_v26  ;;  %v1299_v28 = vmul.f32 1.442695, %v1280_v41  ;;  %v1301_v54 = vmul.f32 1.442695, %v1281_v43 }
 0x359   : > { %2188 = vpow2.f32 %v1323_v48  ;;  %v1303_v34 = vmul.f32 1.442695, %v1282_v44  ;;  %v1286_v39 = vsub.f32 %v2906_v59, %v2998_v26  ;;  %v1287_v45 = vsub.f32 %v2944_v31, %v2998_v26 }
 0x35a   : > { %2190 = vpow2.f32 %v1293_v12  ;;  %v1288_v55 = vsub.f32 %v2940_v27, %v2998_v26  ;;  %v1289_v50 = vsub.f32 %v2970_v53, %v2998_v26  ;;  %v1290_v61 = vsub.f32 %v2966_v52, %v2998_v26 }
 0x35b   : > { %2192 = vpow2.f32 %v1295_v49  ;;  %v1305_v21 = vmul.f32 1.442695, %v1283_v24  ;;  %v1291_v57 = vsub.f32 %v2992_v2, %v2998_v26  ;;  %v1307_v59 = vmul.f32 1.442695, %v1284_v16 }
 0x35c   : > { %2194 = vpow2.f32 %v1297_v51  ;;  %v1309_v58 = vmul.f32 1.442695, %v1285_v23  ;;  %v1311_v31 = vmul.f32 1.442695, %v1286_v39  ;;  %v1313_v60 = vmul.f32 1.442695, %v1287_v45 }
 0x35d   : > { %2196 = vpow2.f32 %v1299_v28  ;;  %v1315_v27 = vmul.f32 1.442695, %v1288_v55  ;;  %v1317_v53 = vmul.f32 1.442695, %v1289_v50  ;;  %v1319_v52 = vmul.f32 1.442695, %v1290_v61 }
 0x35e   : > { %2198 = vpow2.f32 %v1301_v54  ;;  %v1321_v43 = vmul.f32 1.442695, %v1291_v57 }
 0x35f   : > { %2200 = vpow2.f32 %v1303_v34 }
 0x360   : > { %2202 = vpow2.f32 %v1305_v21 }
 0x361   : > { %2204 = vpow2.f32 %v1307_v59 }
 0x362   : > { %2206 = vpow2.f32 %v1309_v58 }
 0x363   : > { %v2189_v62 = vpop.eup %2188  ;;  %2208 = vpow2.f32 %v1311_v31 }
 0x364   : > { %v2191_v63 = vpop.eup %2190  ;;  %2210 = vpow2.f32 %v1313_v60  ;;  %v3033_v7 = vsel %vm1157_vm9, %v2189_v62, 0.0 }
 0x365   : > { %v2193_v1 = vpop.eup %2192  ;;  %v1325_v2 = vsel %vm1142_vm1, %v2191_v63, 0.0  ;;  %2212 = vpow2.f32 %v1315_v27  ;;  %vm3189_vm1 = vcmp.lt.s32.totalorder %v2877_v46, 300 }
 0x366   : > { %v2195_v6 = vpop.eup %2194  ;;  %1382 = vxpose.xlu0.b32.start [1/16] (narrow) %v1325_v2, 8  ;;  %v1341_v9 = vsel %vm1239_vm10, %v1325_v2, 0.0  ;;  %v1326_v10 = vsel %vm1143_vm2, %v2193_v1, 0.0  ;;  %2214 = vpow2.f32 %v1317_v53  ;;  %vm1378_vm2 = vcmask 1040384  }
 0x367   : > { %v2197_v11 = vpop.eup %2196  ;;  %v1342_v14 = vsel %vm1239_vm10, %v1326_v10, 0.0  ;;  %v1327_v0 = vsel %vm1144_vm3, %v2195_v6, 0.0  ;;  %2216 = vpow2.f32 %v1319_v52  ;;  %v1370_v52 = vsel %vm1239_vm10, %v3033_v7, 0.0 }
 0x368   : > { %v2199_v15 = vpop.eup %2198  ;;  %v1343_v5 = vadd.f32 %v1342_v14, %v1341_v9  ;;  %v1328_v3 = vsel %vm1145_vm4, %v2197_v11, 0.0  ;;  %v1344_v19 = vsel %vm1239_vm10, %v1327_v0, 0.0  ;;  %2218 = vpow2.f32 %v1321_v43 }
 0x369   : > { %v2201_v17 = vpop.eup %2200  ;;  %v1329_v22 = vsel %vm1146_vm5, %v2199_v15, 0.0  ;;  %v1346_v32 = vsel %vm1239_vm10, %v1328_v3, 0.0  ;;  %vm1380_vm3 = vcmask 9216  }
 0x36a   : > { %v2203_v20 = vpop.eup %2202  ;;  %1383 = vxpose.xlu0.b32.cont [2/16] (narrow) %v1326_v10, 8  ;;  %v1345_v8 = vadd.f32 %v1344_v19, %v1343_v5  ;;  %v1330_v38 = vsel %vm1147_vm6, %v2201_v17, 0.0  ;;  %v1348_v18 = vsel %vm1239_vm10, %v1329_v22, 0.0 }
 0x36b   : > { %v2205_v29 = vpop.eup %2204  ;;  %v1331_v48 = vsel %vm1148_vm7, %v2203_v20, 0.0  ;;  %v1350_v12 = vsel %vm1239_vm10, %v1330_v38, 0.0 }
 0x36c   : > { %v2207_v13 = vpop.eup %2206  ;;  %v1347_v37 = vadd.f32 %v1346_v32, %v1345_v8  ;;  %v1332_v30 = vsel %vm1149_vm8, %v2205_v29, 0.0  ;;  %v1352_v54 = vsel %vm1239_vm10, %v1331_v48, 0.0 }
 0x36d   : > { %v2209_v41 = vpop.eup %2208  ;;  %v1333_v4 = vsel %vm1150_vm12, %v2207_v13, 0.0  ;;  %v1354_v42 = vsel %vm1239_vm10, %v1332_v30, 0.0 }
 0x36e   : > { %v2211_v44 = vpop.eup %2210  ;;  %1384 = vxpose.xlu0.b32.cont [3/16] (narrow) %v1327_v0, 8  ;;  %v1349_v24 = vadd.f32 %v1348_v18, %v1347_v37  ;;  %v1334_v35 = vsel %vm3189_vm1, %v2209_v41, 0.0  ;;  %v1356_v55 = vsel %vm1239_vm10, %v1333_v4, 0.0 }
 0x36f   : > { %v2213_v25 = vpop.eup %2212  ;;  %v1335_v49 = vsel %vm1152_vm14, %v2211_v44, 0.0  ;;  %v1358_v50 = vsel %vm1239_vm10, %v1334_v35, 0.0 }
 0x370   : > { %v2215_v16 = vpop.eup %2214  ;;  %v1351_v51 = vadd.f32 %v1350_v12, %v1349_v24  ;;  %v1336_v23 = vsel %vm1153_vm13, %v2213_v25, 0.0  ;;  %v1360_v21 = vsel %vm1239_vm10, %v1335_v49, 0.0 }
 0x371   : > { %v2217_v28 = vpop.eup %2216  ;;  %v1337_v36 = vsel %vm1154_vm0, %v2215_v16, 0.0  ;;  %v1362_v57 = vsel %vm1239_vm10, %v1336_v23, 0.0 }
 0x372   : > { %1385 = vxpose.xlu0.b32.cont [4/16] (narrow) %v1328_v3, 8  ;;  %v1353_v34 = vadd.f32 %v1352_v54, %v1351_v51  ;;  %v1338_v39 = vsel %vm1155_vm15, %v2217_v28, 0.0  ;;  %v2219_v33 = vpop.eup %2218  ;;  %v1364_v46 = vsel %vm1239_vm10, %v1337_v36, 0.0 }
 0x373   : > { %v1339_v31 = vsel %vm1156_vm11, %v2219_v33, 0.0  ;;  %v1366_v60 = vsel %vm1239_vm10, %v1338_v39, 0.0 }
 0x374   : > { %v1355_v45 = vadd.f32 %v1354_v42, %v1353_v34  ;;  %v1368_v53 = vsel %vm1239_vm10, %v1339_v31, 0.0 }
 0x376   : > { %1386 = vxpose.xlu0.b32.cont [5/16] (narrow) %v1329_v22, 8  ;;  %v1357_v40 = vadd.f32 %v1356_v55, %v1355_v45 }
 0x378   : > { %v1359_v61 = vadd.f32 %v1358_v50, %v1357_v40 }
 0x37a   : > { %1387 = vxpose.xlu0.b32.cont [6/16] (narrow) %v1330_v38, 8  ;;  %v1361_v47 = vadd.f32 %v1360_v21, %v1359_v61 }
 0x37c   : > { %v1363_v59 = vadd.f32 %v1362_v57, %v1361_v47 }
 0x37e   : > { %1388 = vxpose.xlu0.b32.cont [7/16] (narrow) %v1331_v48, 8  ;;  %v1365_v58 = vadd.f32 %v1364_v46, %v1363_v59 }
 0x380   : > { %v1367_v27 = vadd.f32 %v1366_v60, %v1365_v58 }
 0x382   : > { %1389 = vxpose.xlu0.b32.cont [8/16] (narrow) %v1332_v30, 8  ;;  %v1369_v62 = vadd.f32 %v1368_v53, %v1367_v27 }
 0x384   : > { %v1371_v63 = vadd.f32 %v1370_v52, %v1369_v62 }
 0x386   : > { %1390 = vxpose.xlu0.b32.cont [9/16] (narrow) %v1333_v4, 8  ;;  %v1372_v1 = vrot.slane %v1371_v63, 4 }
 0x388   : > { %v1373_v2 = vadd.f32 %v1372_v1, %v1371_v63 }
 0x38a   : > { %1391 = vxpose.xlu0.b32.cont [10/16] (narrow) %v1334_v35, 8  ;;  %v1374_v56 = vrot.slane %v1373_v2, 2  ;;  %v1222_v6 = vpop.trf.xlu1 }
 0x38b   : > { %1238 = vst [vmem:[%s354_s23] sm:$0x3] %v1222_v6  ;;  %s2256_s23 = scalar_lea.vmem %s2255_s24, 64 }
 0x38c   : > { %v1375_v9 = vadd.f32 %v1374_v56, %v1373_v2  ;;  %p2258_p13 = scmp.lt.s32.totalorder %s2256_s23, %s2250_s25 }
 0x38e   : > { %1392 = vxpose.xlu0.b32.cont [11/16] (narrow) %v1335_v49, 8  ;;  %v1376_v10 = vrot.slane %v1375_v9, 1  ;;  %p2259_p1 = por %p2258_p13, %p2257_p9 }
 0x390   : > { %v1377_v11 = vadd.f32 %v1376_v10, %v1375_v9  ;;  %p2260_p3 = pnand %p2259_p1, %p2253_p8 }
 0x392   : > { %1393 = vxpose.xlu0.b32.cont [12/16] (narrow) %v1336_v23, 8  ;;  %v1379_v14 = vsel %vm1378_vm2, %v2998_v26, %v1377_v11 }
 0x393   : > { %1381 = vst.msk [vmem:[%s372_s14] sm:$0x3] %vm1380_vm3, %v1379_v14 }
 0x396   : > { %1394 = vxpose.xlu0.b32.cont [13/16] (narrow) %v1337_v36, 8 }
 0x39a   : > { %1395 = vxpose.xlu0.b32.cont [14/16] (narrow) %v1338_v39, 8 }
 0x39e   : > { %1396 = vxpose.xlu0.b32.cont [15/16] (narrow) %v1339_v31, 8 }
 0x3a2   : > { %1397 = vxpose.xlu0.b32.end [16/16] (narrow) %v3033_v7, 8 }
 0x3e6   : > { %v1398_v0 = vpop.trf.xlu0 }
 0x3e7   : > { %1930 = vmatmul.mubr.f32.vlgmr.msra.gmra.mrb[32].mxu1 %v1398_v0 }
 0x3e8   : > { %2263 = shalt.err (!%p2260_p3)
}
 0x3e9   : > { %s2264_s28 = scalar_lea.hbm %s1507_s27, 32  ;;  %s2268_s17 = scalar_lea.hbm %s3174_s7, 96 }
 0x3ea   : > { %p2265_p4 = scmp.ne.s32.totalorder %s1507_s27, %s2264_s28  ;;  %p2269_p2 = scmp.lt.u32.totalorder %s1507_s27, %s3174_s7 }
 0x3eb   : > { %p2270_p7 = scmp.lt.u32.totalorder %s2268_s17, %s2264_s28  ;;  %p2272_p10 = scmp.lt.u32.totalorder %s2264_s28, %s1507_s27 }
 0x3ec   : > { %p2266_p5 = pnand %p2265_p4, %p3190_p11 }
 0x3ed   : > { %p2271_p6 = por %p2270_p7, %p2269_p2 }
 0x3ee   : > { %p2267_p0 = pneg %p2266_p5 }
 0x3ef   : > { %p2273_p12 = por %p2272_p10, %p2271_p6 }
 0x3f1   : > { %p2274_p8 = pnand %p2273_p12, %p2267_p0 }
 0x3f3   : > { %2277 = shalt.err (!%p2274_p8)
}
 0x3f4   : > { %2038 = dma.vmem_to_hbm [thread:$0]  (%p3190_p11), %s3092_s0, 32, %s1507_s27, %s1487_s26   ;;  %vm1484_vm4 = vcmask 517120  }
 0x3f5   : > { %s3191_s25 = sshll.u32 %s2511_s29, 1  ;;  %s3192_s19 = sshll.u32 %s2429_s13, 5 }
 0x3f6   : > { %s367_s20 = scalar_lea.vmem [#allocation6], %s3191_s25  ;;  %s3124_s28 = scalar_lea.hbm %s3176_s9, %s3192_s19 }
 0x3f7   : > { %s1525_s24 = sshll.u32 %s367_s20, 4  ;;  %s1496_s14 = scalar_lea.sflag [#allocation7], %s2511_s29  ;;  %s3126_s24 = int_to_ptr.vmem [resolvable:$true] %s1525_s24 }
 0x3f8   : > { %s2278_s0 = scalar_lea.vmem %s3126_s24, 32  ;;  %s2357_s13 = smov [#allocation6]  }
 0x3f9   : > { %p2279_p9 = scmp.ne.s32.totalorder %s3126_s24, %s2278_s0  ;;  %s2282_s27 = sshll.u32 %s2357_s13, 4  ;;  %s2283_s27 = int_to_ptr.vmem [resolvable:$false] %s2282_s27 }
 0x3fa   : > { %s2284_s26 = scalar_lea.vmem %s2283_s27, 64  ;;  %p2285_p3 = scmp.lt.s32.totalorder %s3126_s24, %s2283_s27 }
 0x3fb   : > { %p2280_p13 = pnand %p2279_p9, %p3190_p11  ;;  %p2286_p4 = scmp.lt.s32.totalorder %s2284_s26, %s2278_s0 }
 0x3fd   : > { %p2281_p1 = pneg %p2280_p13  ;;  %p2287_p5 = por %p2286_p4, %p2285_p3 }
 0x3ff   : > { %p2288_p0 = pnand %p2287_p5, %p2281_p1 }
 0x4ba   : > { %v1480_v26 = vpop.f32.mrb[32].mxu1 }
 0x4bb   : > { %1485 = vst.msk [vmem:[%s367_s20] sm:$0x3] %vm1484_vm4, %v1480_v26  ;;  %v1931_v7 = vpop.f32.mrb[33].mxu1 }
 0x4bc   : > { %2291 = shalt.err (!%p2288_p0)
}
 0x4bd   : > { %s2292_s29 = scalar_lea.hbm %s3124_s28, 32  ;;  %s2296_s25 = scalar_lea.hbm %s3176_s9, 96 }
 0x4be   : > { %p2293_p2 = scmp.ne.s32.totalorder %s3124_s28, %s2292_s29  ;;  %p2297_p10 = scmp.lt.u32.totalorder %s3124_s28, %s3176_s9 }
 0x4bf   : > { %p2298_p12 = scmp.lt.u32.totalorder %s2296_s25, %s2292_s29  ;;  %p2300_p9 = scmp.lt.u32.totalorder %s2292_s29, %s3124_s28 }
 0x4c0   : > { %p2294_p7 = pnand %p2293_p2, %p3190_p11 }
 0x4c1   : > { %p2299_p8 = por %p2298_p12, %p2297_p10 }
 0x4c2   : > { %p2295_p6 = pneg %p2294_p7 }
 0x4c3   : > { %p2301_p13 = por %p2300_p9, %p2299_p8 }
 0x4c5   : > { %p2302_p1 = pnand %p2301_p13, %p2295_p6 }
 0x4c7   : > { %2305 = shalt.err (!%p2302_p1)
}
 0x4c8   : > { %2039 = dma.vmem_to_hbm [thread:$0]  (%p3190_p11), %s3126_s24, 32, %s3124_s28, %s1496_s14  }
 0x4c9 PF: > { %p2054_p3 = scmp.ge.s32.totalorder %s2348_s12, 2  ;;  %s1537_s18 = sand.u32 1, %s2336_s30  }
 0x4ca   : > { %p3193_p4 = scmp.ne.s32.totalorder %s3186_s22, 0  ;;  %s1538_s23 = scalar_lea.sflag [#allocation4], %s1537_s18 }
 0x4cc   : > { %p2047_p5 = pnand %p2054_p3, %p3193_p4 }
 0x4ce   : > { %2327 = dma.done.wait (!%p2047_p5), %s1538_s23, 32  }
 0x4cf   : > { %2329 = vsyncadd (!%p2047_p5), %s1538_s23, 4294967264  ;;  %s1554_s0 = scalar_lea.sflag [#allocation7], %s1537_s18 }
 0x4d0   : > { %2331 = dma.done.wait (!%p2047_p5), %s1554_s0, 32  }
 0x4d1   : > { %2333 = vsyncadd (!%p2047_p5), %s1554_s0, 4294967264  ;;  %s3194_s21 = sld [smem:[#allocation11_spill]]  ;;  %p26_p11 = scmp.ge.s32.totalorder %s2433_s15, 5  }
 0x4d2   : > { %s3195_s30 = smov %s2340_s10  ;;  %s3196_s10 = smov %s2344_s11 }
 0x4d3   : > { %s3198_s12 = smov %s2433_s15  ;;  %28 = sbr.rel (!%p26_p11) target bundleno = 9 (0x9), region = 122 }
 0x4d7   : > { %s3197_s11 = smov %s3194_s21 }
 0x4da   :  { %1559 = vsyncpa [#allocation3], 1 }
 0x4db   :  { %1561 = vsyncpa [#allocation3 + $0x1], 1 }
 0x4dc   :  { %1562 = vsyncpa [#allocation4], 1 }
 0x4dd   :  { %1564 = vsyncpa [#allocation4 + $0x1], 1 }
 0x4de   :  { %1565 = vsyncpa [#allocation7], 1 }
 0x4df   :  { %1567 = vsyncpa [#allocation7 + $0x1], 1 }

</bundles_post_ra>
